<compile_context>
chip_gen: v7x
topology: tpu7x:2x2x1
jax: 0.10.0
libtpu: 0.0.40
codegen_flags: <defaults>
</compile_context>

<pallas_src>
import functools
import math

import jax
import jax.numpy as jnp
from jax.experimental import pallas as pl
from jax.experimental.pallas import tpu as pltpu

# --- model hyper-parameters (small, consistent with the module) -------------
INPUT_DIM = 16
EMBED_DIM = 32
NUM_HEADS = 4
HIDDEN_DIM = 64
NUM_LAYERS = 2
NUM_CLASSES = 2
LN_EPS = 1e-5

BATCH = 2
SEQ = 8


def _layernorm(x, w, b):
    mu = jnp.mean(x, axis=-1, keepdims=True)
    var = jnp.mean((x - mu) ** 2, axis=-1, keepdims=True)
    return (x - mu) * jax.lax.rsqrt(var + LN_EPS) * w + b


# --- the Pallas kernel: whole forward pass for the (tiny) problem -----------
def _transformer_kernel(src_ref, pos_ref, w_emb_ref,
                        wq_ref, wk_ref, wv_ref, bq_ref, bk_ref, bv_ref,
                        wo_ref, bo_ref,
                        ln1w_ref, ln1b_ref, ln2w_ref, ln2b_ref,
                        w1_ref, b1_ref, w2_ref, b2_ref,
                        wfc_ref, bfc_ref, out_ref, *, B, S):
    E = w_emb_ref.shape[1]
    L = wq_ref.shape[0]
    nh = wq_ref.shape[1]
    hd = wq_ref.shape[3]

    # embedding Linear(input_dim -> embed_dim); bias + positional encoding are
    # pre-folded into pos_ref (already tiled to (B*S, E)) -> single flat add.
    x = jnp.dot(src_ref[...], w_emb_ref[...],
                preferred_element_type=jnp.float32) + pos_ref[...]       # (B*S, E)

    for l in range(L):
        # --- multi-head self-attention ---------------------------------
        # Heads are split in the *weights* (leading head axis), so every
        # in-kernel slice is a free leading-axis index: no lane slices of a
        # fused qkv, no lane-axis concatenate.
        attn = jnp.zeros((B * S, E), jnp.float32)
        for h in range(nh):
            # 1/sqrt(hd) scale is pre-folded into wq/bq in the wrapper.
            q = (jnp.dot(x, wq_ref[l, h], preferred_element_type=jnp.float32)
                 + bq_ref[l, h]).reshape(B, S, hd)
            k = (jnp.dot(x, wk_ref[l, h], preferred_element_type=jnp.float32)
                 + bk_ref[l, h]).reshape(B, S, hd)
            v = (jnp.dot(x, wv_ref[l, h], preferred_element_type=jnp.float32)
                 + bv_ref[l, h]).reshape(B, S, hd)

            sc = jnp.einsum('bqd,bkd->bqk', q, k,
                            preferred_element_type=jnp.float32)
            sc = sc - jnp.max(sc, axis=-1, keepdims=True)
            p = jnp.exp(sc)
            # softmax denom via EUP approx reciprocal (frees VALU divide)
            p = p * pl.reciprocal(jnp.sum(p, axis=-1, keepdims=True),
                                  approx=True)
            ctx = jnp.einsum('bqk,bkd->bqd', p, v,
                             preferred_element_type=jnp.float32)

            # per-head output projection, accumulated: replaces the lane-axis
            # concat + one big dot with an equivalent split-K accumulation.
            attn = attn + jnp.dot(ctx.reshape(B * S, hd), wo_ref[l, h],
                                  preferred_element_type=jnp.float32)
        attn = attn + bo_ref[l]

        x = _layernorm(x + attn, ln1w_ref[l], ln1b_ref[l])

        # --- feed-forward (ReLU, post-norm: PyTorch defaults) -----------
        ff = jnp.dot(x, w1_ref[l], preferred_element_type=jnp.float32) + b1_ref[l]
        ff = jnp.maximum(ff, 0.0)
        ff = jnp.dot(ff, w2_ref[l], preferred_element_type=jnp.float32) + b2_ref[l]
        x = _layernorm(x + ff, ln2w_ref[l], ln2b_ref[l])

    # mean over sequence axis, then final classifier.
    # (Output is only NUM_CLASSES=2 lanes wide -> masked store; negligible at
    #  this size.  If scaled / chained with other Pallas stages, emit pooled
    #  (B, E) instead and do the classifier in XLA.)
    pooled = jnp.mean(x.reshape(B, S, E), axis=1)                         # (B, E)
    out_ref[...] = jnp.dot(pooled, wfc_ref[...],
                           preferred_element_type=jnp.float32) + bfc_ref[...]


# --- wrapper -----------------------------------------------------------------
def make_positional_encoding(seq_len, embed_dim):
    position = jnp.arange(seq_len, dtype=jnp.float32)[:, None]
    div_term = jnp.exp(jnp.arange(0, embed_dim, 2, dtype=jnp.float32)
                       * (-math.log(10000.0) / embed_dim))
    pe = jnp.zeros((seq_len, embed_dim), jnp.float32)
    pe = pe.at[:, 0::2].set(jnp.sin(position * div_term))
    pe = pe.at[:, 1::2].set(jnp.cos(position * div_term))
    return pe


def init_params(key):
    def lin(key, fan_in, shape):
        bound = 1.0 / math.sqrt(fan_in)
        return jax.random.uniform(key, shape, jnp.float32, -bound, bound)

    ks = jax.random.split(key, 32)
    E, I, H, L, C = EMBED_DIM, INPUT_DIM, HIDDEN_DIM, NUM_LAYERS, NUM_CLASSES
    p = dict(
        w_emb=lin(ks[0], I, (I, E)),              # pre-transposed (in, out)
        b_emb=lin(ks[1], I, (1, E)),
        wqkv=lin(ks[2], E, (L, 3, E, E)),         # [q,k,v] on a leading axis
        bqkv=lin(ks[3], E, (L, 3, 1, E)),
        wo=lin(ks[4], E, (L, E, E)),
        bo=lin(ks[5], E, (L, 1, E)),
        ln1w=jnp.ones((L, 1, E), jnp.float32),
        ln1b=jnp.zeros((L, 1, E), jnp.float32),
        ln2w=jnp.ones((L, 1, E), jnp.float32),
        ln2b=jnp.zeros((L, 1, E), jnp.float32),
        w1=lin(ks[6], E, (L, E, H)),
        b1=lin(ks[7], E, (L, 1, H)),
        w2=lin(ks[8], H, (L, H, E)),
        b2=lin(ks[9], H, (L, 1, E)),
        wfc=lin(ks[10], E, (E, C)),
        bfc=lin(ks[11], E, (1, C)),
    )
    return p


@jax.jit
def transformer_forward(src, params):
    B, S, I = src.shape
    E, L, C = EMBED_DIM, NUM_LAYERS, NUM_CLASSES
    nh = NUM_HEADS
    hd = E // nh
    scale = 1.0 / math.sqrt(hd)

    # embedding bias + positional encoding folded into one flat (B*S, E) table
    pe = make_positional_encoding(S, E)
    pos_bias = jnp.tile(pe + params["b_emb"], (B, 1))                     # (B*S, E)

    # split q/k/v/out-proj weights per head in the wrapper (leading head axis)
    wqkv, bqkv = params["wqkv"], params["bqkv"]
    wq = (wqkv[:, 0] * scale).reshape(L, E, nh, hd).transpose(0, 2, 1, 3)  # (L,nh,E,hd)
    wk = wqkv[:, 1].reshape(L, E, nh, hd).transpose(0, 2, 1, 3)
    wv = wqkv[:, 2].reshape(L, E, nh, hd).transpose(0, 2, 1, 3)
    bq = (bqkv[:, 0, 0] * scale).reshape(L, nh, 1, hd)                     # (L,nh,1,hd)
    bk = bqkv[:, 1, 0].reshape(L, nh, 1, hd)
    bv = bqkv[:, 2, 0].reshape(L, nh, 1, hd)
    wo_heads = params["wo"].reshape(L, nh, hd, E)                          # (L,nh,hd,E)

    src_flat = src.reshape(B * S, I)

    kernel = functools.partial(_transformer_kernel, B=B, S=S)
    args = (src_flat, pos_bias, params["w_emb"],
            wq, wk, wv, bq, bk, bv, wo_heads, params["bo"],
            params["ln1w"], params["ln1b"], params["ln2w"], params["ln2b"],
            params["w1"], params["b1"], params["w2"], params["b2"],
            params["wfc"], params["bfc"])

    # Grid-less, everything resident in VMEM: total operands < 100 KB, so
    # BlockSpec tiling / a grid would only add per-step overhead here.
    return pl.pallas_call(
        kernel,
        out_shape=jax.ShapeDtypeStruct((B, C), jnp.float32),
        in_specs=[pl.BlockSpec(memory_space=pltpu.MemorySpace.VMEM)] * len(args),
        out_specs=pl.BlockSpec(memory_space=pltpu.MemorySpace.VMEM),
    )(*args)


# --- pure-JAX reference (same math) for a correctness check ------------------
def reference_forward(src, params):
    B, S, I = src.shape
    E, nh = EMBED_DIM, NUM_HEADS
    hd = E // nh
    pe = make_positional_encoding(S, E)
    x = src.reshape(B * S, I) @ params["w_emb"] + params["b_emb"]
    x = (x.reshape(B, S, E) + pe[None]).reshape(B * S, E)
    for l in range(NUM_LAYERS):
        q = (x @ params["wqkv"][l, 0] + params["bqkv"][l, 0]).reshape(B, S, nh, hd)
        k = (x @ params["wqkv"][l, 1] + params["bqkv"][l, 1]).reshape(B, S, nh, hd)
        v = (x @ params["wqkv"][l, 2] + params["bqkv"][l, 2]).reshape(B, S, nh, hd)
        sc = jnp.einsum('bqhd,bkhd->bhqk', q, k) / math.sqrt(hd)
        p = jax.nn.softmax(sc, axis=-1)
        ctx = jnp.einsum('bhqk,bkhd->bqhd', p, v).reshape(B * S, E)
        attn = ctx @ params["wo"][l] + params["bo"][l]
        x = _layernorm(x + attn, params["ln1w"][l], params["ln1b"][l])
        ff = jnp.maximum(x @ params["w1"][l] + params["b1"][l], 0.0)
        ff = ff @ params["w2"][l] + params["b2"][l]
        x = _layernorm(x + ff, params["ln2w"][l], params["ln2b"][l])
    pooled = jnp.mean(x.reshape(B, S, E), axis=1)
    return pooled @ params["wfc"] + params["bfc"]


if __name__ == "__main__":
    key = jax.random.PRNGKey(0)
    k_src, k_par = jax.random.split(key)
    src = jax.random.normal(k_src, (BATCH, SEQ, INPUT_DIM), jnp.float32)
    params = init_params(k_par)

    out = transformer_forward(src, params)
    out = jax.block_until_ready(out)

    ref = reference_forward(src, params)
    assert out.shape == (BATCH, NUM_CLASSES)
    # approx reciprocal in the in-kernel softmax -> small (≲1e-3) differences.
    assert jnp.allclose(out, ref, rtol=2e-3, atol=2e-3), (out, ref)
    print("KERNEL_OK")
</pallas_src>

<mosaic_0001>
module attributes {stable_mosaic.version = 11 : i64} {
  func.func @_transformer_kernel(%arg0: memref<16x16xf32, #tpu.memory_space<vmem>>, %arg1: memref<16x32xf32, #tpu.memory_space<vmem>>, %arg2: memref<16x32xf32, #tpu.memory_space<vmem>>, %arg3: memref<2x4x32x8xf32, #tpu.memory_space<vmem>>, %arg4: memref<2x4x32x8xf32, #tpu.memory_space<vmem>>, %arg5: memref<2x4x32x8xf32, #tpu.memory_space<vmem>>, %arg6: memref<2x4x1x8xf32, #tpu.memory_space<vmem>>, %arg7: memref<2x4x1x8xf32, #tpu.memory_space<vmem>>, %arg8: memref<2x4x1x8xf32, #tpu.memory_space<vmem>>, %arg9: memref<2x4x8x32xf32, #tpu.memory_space<vmem>>, %arg10: memref<2x1x32xf32, #tpu.memory_space<vmem>>, %arg11: memref<2x1x32xf32, #tpu.memory_space<vmem>>, %arg12: memref<2x1x32xf32, #tpu.memory_space<vmem>>, %arg13: memref<2x1x32xf32, #tpu.memory_space<vmem>>, %arg14: memref<2x1x32xf32, #tpu.memory_space<vmem>>, %arg15: memref<2x32x64xf32, #tpu.memory_space<vmem>>, %arg16: memref<2x1x64xf32, #tpu.memory_space<vmem>>, %arg17: memref<2x64x32xf32, #tpu.memory_space<vmem>>, %arg18: memref<2x1x32xf32, #tpu.memory_space<vmem>>, %arg19: memref<32x2xf32, #tpu.memory_space<vmem>>, %arg20: memref<1x2xf32, #tpu.memory_space<vmem>>, %arg21: memref<2x2xf32, #tpu.memory_space<vmem>>) attributes {dimension_semantics = [], scalar_prefetch = 0 : i64, scratch_operands = 0 : i64, tpu.core_type = #tpu.core_type<tc>} {
    %c0 = arith.constant 0 : index
    %c0_0 = arith.constant 0 : index
    %0 = vector.load %arg0[%c0, %c0_0] : memref<16x16xf32, #tpu.memory_space<vmem>>, vector<16x16xf32>
    %c0_1 = arith.constant 0 : index
    %c0_2 = arith.constant 0 : index
    %1 = vector.load %arg2[%c0_1, %c0_2] : memref<16x32xf32, #tpu.memory_space<vmem>>, vector<16x32xf32>
    %cst = arith.constant dense<0.000000e+00> : vector<16x32xf32>
    %2 = tpu.matmul %0, %1, %cst {dimension_numbers = #tpu.dot_dimension_numbers<[1], [0], [0], [1], [0, 0, 1, 1], [], []>} : vector<16x16xf32>, vector<16x32xf32>, vector<16x32xf32> -> vector<16x32xf32>
    %c0_3 = arith.constant 0 : index
    %c0_4 = arith.constant 0 : index
    %3 = vector.load %arg1[%c0_3, %c0_4] : memref<16x32xf32, #tpu.memory_space<vmem>>, vector<16x32xf32>
    %4 = arith.addf %2, %3 : vector<16x32xf32>
    %cst_5 = arith.constant 0.000000e+00 : f32
    %5 = vector.broadcast %cst_5 : f32 to vector<16x32xf32>
    %c0_6 = arith.constant 0 : index
    %c0_7 = arith.constant 0 : index
    %c0_8 = arith.constant 0 : index
    %c0_9 = arith.constant 0 : index
    %6 = vector.load %arg3[%c0_6, %c0_7, %c0_8, %c0_9] : memref<2x4x32x8xf32, #tpu.memory_space<vmem>>, vector<1x1x32x8xf32>
    %7 = vector.shape_cast %6 : vector<1x1x32x8xf32> to vector<32x8xf32>
    %cst_10 = arith.constant dense<0.000000e+00> : vector<16x8xf32>
    %8 = tpu.matmul %4, %7, %cst_10 {dimension_numbers = #tpu.dot_dimension_numbers<[1], [0], [0], [1], [0, 0, 1, 1], [], []>} : vector<16x32xf32>, vector<32x8xf32>, vector<16x8xf32> -> vector<16x8xf32>
    %c0_11 = arith.constant 0 : index
    %c0_12 = arith.constant 0 : index
    %c0_13 = arith.constant 0 : index
    %c0_14 = arith.constant 0 : index
    %9 = vector.load %arg6[%c0_11, %c0_12, %c0_13, %c0_14] : memref<2x4x1x8xf32, #tpu.memory_space<vmem>>, vector<1x1x1x8xf32>
    %10 = vector.shape_cast %9 : vector<1x1x1x8xf32> to vector<1x8xf32>
    %11 = vector.broadcast %10 : vector<1x8xf32> to vector<16x8xf32>
    %12 = arith.addf %8, %11 : vector<16x8xf32>
    %13 = vector.shape_cast %12 : vector<16x8xf32> to vector<2x8x8xf32>
    %c0_15 = arith.constant 0 : index
    %c0_16 = arith.constant 0 : index
    %c0_17 = arith.constant 0 : index
    %c0_18 = arith.constant 0 : index
    %14 = vector.load %arg4[%c0_15, %c0_16, %c0_17, %c0_18] : memref<2x4x32x8xf32, #tpu.memory_space<vmem>>, vector<1x1x32x8xf32>
    %15 = vector.shape_cast %14 : vector<1x1x32x8xf32> to vector<32x8xf32>
    %cst_19 = arith.constant dense<0.000000e+00> : vector<16x8xf32>
    %16 = tpu.matmul %4, %15, %cst_19 {dimension_numbers = #tpu.dot_dimension_numbers<[1], [0], [0], [1], [0, 0, 1, 1], [], []>} : vector<16x32xf32>, vector<32x8xf32>, vector<16x8xf32> -> vector<16x8xf32>
    %c0_20 = arith.constant 0 : index
    %c0_21 = arith.constant 0 : index
    %c0_22 = arith.constant 0 : index
    %c0_23 = arith.constant 0 : index
    %17 = vector.load %arg7[%c0_20, %c0_21, %c0_22, %c0_23] : memref<2x4x1x8xf32, #tpu.memory_space<vmem>>, vector<1x1x1x8xf32>
    %18 = vector.shape_cast %17 : vector<1x1x1x8xf32> to vector<1x8xf32>
    %19 = vector.broadcast %18 : vector<1x8xf32> to vector<16x8xf32>
    %20 = arith.addf %16, %19 : vector<16x8xf32>
    %21 = vector.shape_cast %20 : vector<16x8xf32> to vector<2x8x8xf32>
    %c0_24 = arith.constant 0 : index
    %c0_25 = arith.constant 0 : index
    %c0_26 = arith.constant 0 : index
    %c0_27 = arith.constant 0 : index
    %22 = vector.load %arg5[%c0_24, %c0_25, %c0_26, %c0_27] : memref<2x4x32x8xf32, #tpu.memory_space<vmem>>, vector<1x1x32x8xf32>
    %23 = vector.shape_cast %22 : vector<1x1x32x8xf32> to vector<32x8xf32>
    %cst_28 = arith.constant dense<0.000000e+00> : vector<16x8xf32>
    %24 = tpu.matmul %4, %23, %cst_28 {dimension_numbers = #tpu.dot_dimension_numbers<[1], [0], [0], [1], [0, 0, 1, 1], [], []>} : vector<16x32xf32>, vector<32x8xf32>, vector<16x8xf32> -> vector<16x8xf32>
    %c0_29 = arith.constant 0 : index
    %c0_30 = arith.constant 0 : index
    %c0_31 = arith.constant 0 : index
    %c0_32 = arith.constant 0 : index
    %25 = vector.load %arg8[%c0_29, %c0_30, %c0_31, %c0_32] : memref<2x4x1x8xf32, #tpu.memory_space<vmem>>, vector<1x1x1x8xf32>
    %26 = vector.shape_cast %25 : vector<1x1x1x8xf32> to vector<1x8xf32>
    %27 = vector.broadcast %26 : vector<1x8xf32> to vector<16x8xf32>
    %28 = arith.addf %24, %27 : vector<16x8xf32>
    %29 = vector.shape_cast %28 : vector<16x8xf32> to vector<2x8x8xf32>
    "tpu.trace_start"() <{level = 10 : i32, message = "bqd,bkd->bqk"}> : () -> ()
    %cst_33 = arith.constant dense<0.000000e+00> : vector<2x8x8xf32>
    %30 = tpu.matmul %13, %21, %cst_33 {dimension_numbers = #tpu.dot_dimension_numbers<[2], [2], [1], [1], [0, 0, 0, 1, 1, 1], [0], [0]>} : vector<2x8x8xf32>, vector<2x8x8xf32>, vector<2x8x8xf32> -> vector<2x8x8xf32>
    "tpu.trace_stop"() : () -> ()
    %cst_34 = arith.constant dense<0xFF800000> : vector<2x8xf32>
    %31 = vector.multi_reduction <maximumf>, %30, %cst_34 [2] : vector<2x8x8xf32> to vector<2x8xf32>
    %32 = vector.shape_cast %31 : vector<2x8xf32> to vector<2x8x1xf32>
    %33 = vector.broadcast %32 : vector<2x8x1xf32> to vector<2x8x8xf32>
    %34 = arith.subf %30, %33 : vector<2x8x8xf32>
    %35 = math.exp %34 : vector<2x8x8xf32>
    %cst_35 = arith.constant dense<0.000000e+00> : vector<2x8xf32>
    %36 = vector.multi_reduction <add>, %35, %cst_35 [2] : vector<2x8x8xf32> to vector<2x8xf32>
    %37 = vector.shape_cast %36 : vector<2x8xf32> to vector<2x8x1xf32>
    %38 = tpu.reciprocal %37 {approx = true} : vector<2x8x1xf32> -> vector<2x8x1xf32>
    %39 = vector.broadcast %38 : vector<2x8x1xf32> to vector<2x8x8xf32>
    %40 = arith.mulf %35, %39 : vector<2x8x8xf32>
    "tpu.trace_start"() <{level = 10 : i32, message = "bqk,bkd->bqd"}> : () -> ()
    %cst_36 = arith.constant dense<0.000000e+00> : vector<2x8x8xf32>
    %41 = tpu.matmul %40, %29, %cst_36 {dimension_numbers = #tpu.dot_dimension_numbers<[2], [1], [1], [2], [0, 0, 0, 1, 1, 2], [0], [0]>} : vector<2x8x8xf32>, vector<2x8x8xf32>, vector<2x8x8xf32> -> vector<2x8x8xf32>
    "tpu.trace_stop"() : () -> ()
    %42 = vector.shape_cast %41 : vector<2x8x8xf32> to vector<16x8xf32>
    %c0_37 = arith.constant 0 : index
    %c0_38 = arith.constant 0 : index
    %c0_39 = arith.constant 0 : index
    %c0_40 = arith.constant 0 : index
    %43 = vector.load %arg9[%c0_37, %c0_38, %c0_39, %c0_40] : memref<2x4x8x32xf32, #tpu.memory_space<vmem>>, vector<1x1x8x32xf32>
    %44 = vector.shape_cast %43 : vector<1x1x8x32xf32> to vector<8x32xf32>
    %cst_41 = arith.constant dense<0.000000e+00> : vector<16x32xf32>
    %45 = tpu.matmul %42, %44, %cst_41 {dimension_numbers = #tpu.dot_dimension_numbers<[1], [0], [0], [1], [0, 0, 1, 1], [], []>} : vector<16x8xf32>, vector<8x32xf32>, vector<16x32xf32> -> vector<16x32xf32>
    %46 = arith.addf %5, %45 : vector<16x32xf32>
    %c0_42 = arith.constant 0 : index
    %c1 = arith.constant 1 : index
    %c0_43 = arith.constant 0 : index
    %c0_44 = arith.constant 0 : index
    %47 = vector.load %arg3[%c0_42, %c1, %c0_43, %c0_44] : memref<2x4x32x8xf32, #tpu.memory_space<vmem>>, vector<1x1x32x8xf32>
    %48 = vector.shape_cast %47 : vector<1x1x32x8xf32> to vector<32x8xf32>
    %cst_45 = arith.constant dense<0.000000e+00> : vector<16x8xf32>
    %49 = tpu.matmul %4, %48, %cst_45 {dimension_numbers = #tpu.dot_dimension_numbers<[1], [0], [0], [1], [0, 0, 1, 1], [], []>} : vector<16x32xf32>, vector<32x8xf32>, vector<16x8xf32> -> vector<16x8xf32>
    %c0_46 = arith.constant 0 : index
    %c1_47 = arith.constant 1 : index
    %c0_48 = arith.constant 0 : index
    %c0_49 = arith.constant 0 : index
    %50 = vector.load %arg6[%c0_46, %c1_47, %c0_48, %c0_49] : memref<2x4x1x8xf32, #tpu.memory_space<vmem>>, vector<1x1x1x8xf32>
    %51 = vector.shape_cast %50 : vector<1x1x1x8xf32> to vector<1x8xf32>
    %52 = vector.broadcast %51 : vector<1x8xf32> to vector<16x8xf32>
    %53 = arith.addf %49, %52 : vector<16x8xf32>
    %54 = vector.shape_cast %53 : vector<16x8xf32> to vector<2x8x8xf32>
    %c0_50 = arith.constant 0 : index
    %c1_51 = arith.constant 1 : index
    %c0_52 = arith.constant 0 : index
    %c0_53 = arith.constant 0 : index
    %55 = vector.load %arg4[%c0_50, %c1_51, %c0_52, %c0_53] : memref<2x4x32x8xf32, #tpu.memory_space<vmem>>, vector<1x1x32x8xf32>
    %56 = vector.shape_cast %55 : vector<1x1x32x8xf32> to vector<32x8xf32>
    %cst_54 = arith.constant dense<0.000000e+00> : vector<16x8xf32>
    %57 = tpu.matmul %4, %56, %cst_54 {dimension_numbers = #tpu.dot_dimension_numbers<[1], [0], [0], [1], [0, 0, 1, 1], [], []>} : vector<16x32xf32>, vector<32x8xf32>, vector<16x8xf32> -> vector<16x8xf32>
    %c0_55 = arith.constant 0 : index
    %c1_56 = arith.constant 1 : index
    %c0_57 = arith.constant 0 : index
    %c0_58 = arith.constant 0 : index
    %58 = vector.load %arg7[%c0_55, %c1_56, %c0_57, %c0_58] : memref<2x4x1x8xf32, #tpu.memory_space<vmem>>, vector<1x1x1x8xf32>
    %59 = vector.shape_cast %58 : vector<1x1x1x8xf32> to vector<1x8xf32>
    %60 = vector.broadcast %59 : vector<1x8xf32> to vector<16x8xf32>
    %61 = arith.addf %57, %60 : vector<16x8xf32>
    %62 = vector.shape_cast %61 : vector<16x8xf32> to vector<2x8x8xf32>
    %c0_59 = arith.constant 0 : index
    %c1_60 = arith.constant 1 : index
    %c0_61 = arith.constant 0 : index
    %c0_62 = arith.constant 0 : index
    %63 = vector.load %arg5[%c0_59, %c1_60, %c0_61, %c0_62] : memref<2x4x32x8xf32, #tpu.memory_space<vmem>>, vector<1x1x32x8xf32>
    %64 = vector.shape_cast %63 : vector<1x1x32x8xf32> to vector<32x8xf32>
    %cst_63 = arith.constant dense<0.000000e+00> : vector<16x8xf32>
    %65 = tpu.matmul %4, %64, %cst_63 {dimension_numbers = #tpu.dot_dimension_numbers<[1], [0], [0], [1], [0, 0, 1, 1], [], []>} : vector<16x32xf32>, vector<32x8xf32>, vector<16x8xf32> -> vector<16x8xf32>
    %c0_64 = arith.constant 0 : index
    %c1_65 = arith.constant 1 : index
    %c0_66 = arith.constant 0 : index
    %c0_67 = arith.constant 0 : index
    %66 = vector.load %arg8[%c0_64, %c1_65, %c0_66, %c0_67] : memref<2x4x1x8xf32, #tpu.memory_space<vmem>>, vector<1x1x1x8xf32>
    %67 = vector.shape_cast %66 : vector<1x1x1x8xf32> to vector<1x8xf32>
    %68 = vector.broadcast %67 : vector<1x8xf32> to vector<16x8xf32>
    %69 = arith.addf %65, %68 : vector<16x8xf32>
    %70 = vector.shape_cast %69 : vector<16x8xf32> to vector<2x8x8xf32>
    "tpu.trace_start"() <{level = 10 : i32, message = "bqd,bkd->bqk"}> : () -> ()
    %cst_68 = arith.constant dense<0.000000e+00> : vector<2x8x8xf32>
    %71 = tpu.matmul %54, %62, %cst_68 {dimension_numbers = #tpu.dot_dimension_numbers<[2], [2], [1], [1], [0, 0, 0, 1, 1, 1], [0], [0]>} : vector<2x8x8xf32>, vector<2x8x8xf32>, vector<2x8x8xf32> -> vector<2x8x8xf32>
    "tpu.trace_stop"() : () -> ()
    %cst_69 = arith.constant dense<0xFF800000> : vector<2x8xf32>
    %72 = vector.multi_reduction <maximumf>, %71, %cst_69 [2] : vector<2x8x8xf32> to vector<2x8xf32>
    %73 = vector.shape_cast %72 : vector<2x8xf32> to vector<2x8x1xf32>
    %74 = vector.broadcast %73 : vector<2x8x1xf32> to vector<2x8x8xf32>
    %75 = arith.subf %71, %74 : vector<2x8x8xf32>
    %76 = math.exp %75 : vector<2x8x8xf32>
    %cst_70 = arith.constant dense<0.000000e+00> : vector<2x8xf32>
    %77 = vector.multi_reduction <add>, %76, %cst_70 [2] : vector<2x8x8xf32> to vector<2x8xf32>
    %78 = vector.shape_cast %77 : vector<2x8xf32> to vector<2x8x1xf32>
    %79 = tpu.reciprocal %78 {approx = true} : vector<2x8x1xf32> -> vector<2x8x1xf32>
    %80 = vector.broadcast %79 : vector<2x8x1xf32> to vector<2x8x8xf32>
    %81 = arith.mulf %76, %80 : vector<2x8x8xf32>
    "tpu.trace_start"() <{level = 10 : i32, message = "bqk,bkd->bqd"}> : () -> ()
    %cst_71 = arith.constant dense<0.000000e+00> : vector<2x8x8xf32>
    %82 = tpu.matmul %81, %70, %cst_71 {dimension_numbers = #tpu.dot_dimension_numbers<[2], [1], [1], [2], [0, 0, 0, 1, 1, 2], [0], [0]>} : vector<2x8x8xf32>, vector<2x8x8xf32>, vector<2x8x8xf32> -> vector<2x8x8xf32>
    "tpu.trace_stop"() : () -> ()
    %83 = vector.shape_cast %82 : vector<2x8x8xf32> to vector<16x8xf32>
    %c0_72 = arith.constant 0 : index
    %c1_73 = arith.constant 1 : index
    %c0_74 = arith.constant 0 : index
    %c0_75 = arith.constant 0 : index
    %84 = vector.load %arg9[%c0_72, %c1_73, %c0_74, %c0_75] : memref<2x4x8x32xf32, #tpu.memory_space<vmem>>, vector<1x1x8x32xf32>
    %85 = vector.shape_cast %84 : vector<1x1x8x32xf32> to vector<8x32xf32>
    %cst_76 = arith.constant dense<0.000000e+00> : vector<16x32xf32>
    %86 = tpu.matmul %83, %85, %cst_76 {dimension_numbers = #tpu.dot_dimension_numbers<[1], [0], [0], [1], [0, 0, 1, 1], [], []>} : vector<16x8xf32>, vector<8x32xf32>, vector<16x32xf32> -> vector<16x32xf32>
    %87 = arith.addf %46, %86 : vector<16x32xf32>
    %c0_77 = arith.constant 0 : index
    %c2 = arith.constant 2 : index
    %c0_78 = arith.constant 0 : index
    %c0_79 = arith.constant 0 : index
    %88 = vector.load %arg3[%c0_77, %c2, %c0_78, %c0_79] : memref<2x4x32x8xf32, #tpu.memory_space<vmem>>, vector<1x1x32x8xf32>
    %89 = vector.shape_cast %88 : vector<1x1x32x8xf32> to vector<32x8xf32>
    %cst_80 = arith.constant dense<0.000000e+00> : vector<16x8xf32>
    %90 = tpu.matmul %4, %89, %cst_80 {dimension_numbers = #tpu.dot_dimension_numbers<[1], [0], [0], [1], [0, 0, 1, 1], [], []>} : vector<16x32xf32>, vector<32x8xf32>, vector<16x8xf32> -> vector<16x8xf32>
    %c0_81 = arith.constant 0 : index
    %c2_82 = arith.constant 2 : index
    %c0_83 = arith.constant 0 : index
    %c0_84 = arith.constant 0 : index
    %91 = vector.load %arg6[%c0_81, %c2_82, %c0_83, %c0_84] : memref<2x4x1x8xf32, #tpu.memory_space<vmem>>, vector<1x1x1x8xf32>
    %92 = vector.shape_cast %91 : vector<1x1x1x8xf32> to vector<1x8xf32>
    %93 = vector.broadcast %92 : vector<1x8xf32> to vector<16x8xf32>
    %94 = arith.addf %90, %93 : vector<16x8xf32>
    %95 = vector.shape_cast %94 : vector<16x8xf32> to vector<2x8x8xf32>
    %c0_85 = arith.constant 0 : index
    %c2_86 = arith.constant 2 : index
    %c0_87 = arith.constant 0 : index
    %c0_88 = arith.constant 0 : index
    %96 = vector.load %arg4[%c0_85, %c2_86, %c0_87, %c0_88] : memref<2x4x32x8xf32, #tpu.memory_space<vmem>>, vector<1x1x32x8xf32>
    %97 = vector.shape_cast %96 : vector<1x1x32x8xf32> to vector<32x8xf32>
    %cst_89 = arith.constant dense<0.000000e+00> : vector<16x8xf32>
    %98 = tpu.matmul %4, %97, %cst_89 {dimension_numbers = #tpu.dot_dimension_numbers<[1], [0], [0], [1], [0, 0, 1, 1], [], []>} : vector<16x32xf32>, vector<32x8xf32>, vector<16x8xf32> -> vector<16x8xf32>
    %c0_90 = arith.constant 0 : index
    %c2_91 = arith.constant 2 : index
    %c0_92 = arith.constant 0 : index
    %c0_93 = arith.constant 0 : index
    %99 = vector.load %arg7[%c0_90, %c2_91, %c0_92, %c0_93] : memref<2x4x1x8xf32, #tpu.memory_space<vmem>>, vector<1x1x1x8xf32>
    %100 = vector.shape_cast %99 : vector<1x1x1x8xf32> to vector<1x8xf32>
    %101 = vector.broadcast %100 : vector<1x8xf32> to vector<16x8xf32>
    %102 = arith.addf %98, %101 : vector<16x8xf32>
    %103 = vector.shape_cast %102 : vector<16x8xf32> to vector<2x8x8xf32>
    %c0_94 = arith.constant 0 : index
    %c2_95 = arith.constant 2 : index
    %c0_96 = arith.constant 0 : index
    %c0_97 = arith.constant 0 : index
    %104 = vector.load %arg5[%c0_94, %c2_95, %c0_96, %c0_97] : memref<2x4x32x8xf32, #tpu.memory_space<vmem>>, vector<1x1x32x8xf32>
    %105 = vector.shape_cast %104 : vector<1x1x32x8xf32> to vector<32x8xf32>
    %cst_98 = arith.constant dense<0.000000e+00> : vector<16x8xf32>
    %106 = tpu.matmul %4, %105, %cst_98 {dimension_numbers = #tpu.dot_dimension_numbers<[1], [0], [0], [1], [0, 0, 1, 1], [], []>} : vector<16x32xf32>, vector<32x8xf32>, vector<16x8xf32> -> vector<16x8xf32>
    %c0_99 = arith.constant 0 : index
    %c2_100 = arith.constant 2 : index
    %c0_101 = arith.constant 0 : index
    %c0_102 = arith.constant 0 : index
    %107 = vector.load %arg8[%c0_99, %c2_100, %c0_101, %c0_102] : memref<2x4x1x8xf32, #tpu.memory_space<vmem>>, vector<1x1x1x8xf32>
    %108 = vector.shape_cast %107 : vector<1x1x1x8xf32> to vector<1x8xf32>
    %109 = vector.broadcast %108 : vector<1x8xf32> to vector<16x8xf32>
    %110 = arith.addf %106, %109 : vector<16x8xf32>
    %111 = vector.shape_cast %110 : vector<16x8xf32> to vector<2x8x8xf32>
    "tpu.trace_start"() <{level = 10 : i32, message = "bqd,bkd->bqk"}> : () -> ()
    %cst_103 = arith.constant dense<0.000000e+00> : vector<2x8x8xf32>
    %112 = tpu.matmul %95, %103, %cst_103 {dimension_numbers = #tpu.dot_dimension_numbers<[2], [2], [1], [1], [0, 0, 0, 1, 1, 1], [0], [0]>} : vector<2x8x8xf32>, vector<2x8x8xf32>, vector<2x8x8xf32> -> vector<2x8x8xf32>
    "tpu.trace_stop"() : () -> ()
    %cst_104 = arith.constant dense<0xFF800000> : vector<2x8xf32>
    %113 = vector.multi_reduction <maximumf>, %112, %cst_104 [2] : vector<2x8x8xf32> to vector<2x8xf32>
    %114 = vector.shape_cast %113 : vector<2x8xf32> to vector<2x8x1xf32>
    %115 = vector.broadcast %114 : vector<2x8x1xf32> to vector<2x8x8xf32>
    %116 = arith.subf %112, %115 : vector<2x8x8xf32>
    %117 = math.exp %116 : vector<2x8x8xf32>
    %cst_105 = arith.constant dense<0.000000e+00> : vector<2x8xf32>
    %118 = vector.multi_reduction <add>, %117, %cst_105 [2] : vector<2x8x8xf32> to vector<2x8xf32>
    %119 = vector.shape_cast %118 : vector<2x8xf32> to vector<2x8x1xf32>
    %120 = tpu.reciprocal %119 {approx = true} : vector<2x8x1xf32> -> vector<2x8x1xf32>
    %121 = vector.broadcast %120 : vector<2x8x1xf32> to vector<2x8x8xf32>
    %122 = arith.mulf %117, %121 : vector<2x8x8xf32>
    "tpu.trace_start"() <{level = 10 : i32, message = "bqk,bkd->bqd"}> : () -> ()
    %cst_106 = arith.constant dense<0.000000e+00> : vector<2x8x8xf32>
    %123 = tpu.matmul %122, %111, %cst_106 {dimension_numbers = #tpu.dot_dimension_numbers<[2], [1], [1], [2], [0, 0, 0, 1, 1, 2], [0], [0]>} : vector<2x8x8xf32>, vector<2x8x8xf32>, vector<2x8x8xf32> -> vector<2x8x8xf32>
    "tpu.trace_stop"() : () -> ()
    %124 = vector.shape_cast %123 : vector<2x8x8xf32> to vector<16x8xf32>
    %c0_107 = arith.constant 0 : index
    %c2_108 = arith.constant 2 : index
    %c0_109 = arith.constant 0 : index
    %c0_110 = arith.constant 0 : index
    %125 = vector.load %arg9[%c0_107, %c2_108, %c0_109, %c0_110] : memref<2x4x8x32xf32, #tpu.memory_space<vmem>>, vector<1x1x8x32xf32>
    %126 = vector.shape_cast %125 : vector<1x1x8x32xf32> to vector<8x32xf32>
    %cst_111 = arith.constant dense<0.000000e+00> : vector<16x32xf32>
    %127 = tpu.matmul %124, %126, %cst_111 {dimension_numbers = #tpu.dot_dimension_numbers<[1], [0], [0], [1], [0, 0, 1, 1], [], []>} : vector<16x8xf32>, vector<8x32xf32>, vector<16x32xf32> -> vector<16x32xf32>
    %128 = arith.addf %87, %127 : vector<16x32xf32>
    %c0_112 = arith.constant 0 : index
    %c3 = arith.constant 3 : index
    %c0_113 = arith.constant 0 : index
    %c0_114 = arith.constant 0 : index
    %129 = vector.load %arg3[%c0_112, %c3, %c0_113, %c0_114] : memref<2x4x32x8xf32, #tpu.memory_space<vmem>>, vector<1x1x32x8xf32>
    %130 = vector.shape_cast %129 : vector<1x1x32x8xf32> to vector<32x8xf32>
    %cst_115 = arith.constant dense<0.000000e+00> : vector<16x8xf32>
    %131 = tpu.matmul %4, %130, %cst_115 {dimension_numbers = #tpu.dot_dimension_numbers<[1], [0], [0], [1], [0, 0, 1, 1], [], []>} : vector<16x32xf32>, vector<32x8xf32>, vector<16x8xf32> -> vector<16x8xf32>
    %c0_116 = arith.constant 0 : index
    %c3_117 = arith.constant 3 : index
    %c0_118 = arith.constant 0 : index
    %c0_119 = arith.constant 0 : index
    %132 = vector.load %arg6[%c0_116, %c3_117, %c0_118, %c0_119] : memref<2x4x1x8xf32, #tpu.memory_space<vmem>>, vector<1x1x1x8xf32>
    %133 = vector.shape_cast %132 : vector<1x1x1x8xf32> to vector<1x8xf32>
    %134 = vector.broadcast %133 : vector<1x8xf32> to vector<16x8xf32>
    %135 = arith.addf %131, %134 : vector<16x8xf32>
    %136 = vector.shape_cast %135 : vector<16x8xf32> to vector<2x8x8xf32>
    %c0_120 = arith.constant 0 : index
    %c3_121 = arith.constant 3 : index
    %c0_122 = arith.constant 0 : index
    %c0_123 = arith.constant 0 : index
    %137 = vector.load %arg4[%c0_120, %c3_121, %c0_122, %c0_123] : memref<2x4x32x8xf32, #tpu.memory_space<vmem>>, vector<1x1x32x8xf32>
    %138 = vector.shape_cast %137 : vector<1x1x32x8xf32> to vector<32x8xf32>
    %cst_124 = arith.constant dense<0.000000e+00> : vector<16x8xf32>
    %139 = tpu.matmul %4, %138, %cst_124 {dimension_numbers = #tpu.dot_dimension_numbers<[1], [0], [0], [1], [0, 0, 1, 1], [], []>} : vector<16x32xf32>, vector<32x8xf32>, vector<16x8xf32> -> vector<16x8xf32>
    %c0_125 = arith.constant 0 : index
    %c3_126 = arith.constant 3 : index
    %c0_127 = arith.constant 0 : index
    %c0_128 = arith.constant 0 : index
    %140 = vector.load %arg7[%c0_125, %c3_126, %c0_127, %c0_128] : memref<2x4x1x8xf32, #tpu.memory_space<vmem>>, vector<1x1x1x8xf32>
    %141 = vector.shape_cast %140 : vector<1x1x1x8xf32> to vector<1x8xf32>
    %142 = vector.broadcast %141 : vector<1x8xf32> to vector<16x8xf32>
    %143 = arith.addf %139, %142 : vector<16x8xf32>
    %144 = vector.shape_cast %143 : vector<16x8xf32> to vector<2x8x8xf32>
    %c0_129 = arith.constant 0 : index
    %c3_130 = arith.constant 3 : index
    %c0_131 = arith.constant 0 : index
    %c0_132 = arith.constant 0 : index
    %145 = vector.load %arg5[%c0_129, %c3_130, %c0_131, %c0_132] : memref<2x4x32x8xf32, #tpu.memory_space<vmem>>, vector<1x1x32x8xf32>
    %146 = vector.shape_cast %145 : vector<1x1x32x8xf32> to vector<32x8xf32>
    %cst_133 = arith.constant dense<0.000000e+00> : vector<16x8xf32>
    %147 = tpu.matmul %4, %146, %cst_133 {dimension_numbers = #tpu.dot_dimension_numbers<[1], [0], [0], [1], [0, 0, 1, 1], [], []>} : vector<16x32xf32>, vector<32x8xf32>, vector<16x8xf32> -> vector<16x8xf32>
    %c0_134 = arith.constant 0 : index
    %c3_135 = arith.constant 3 : index
    %c0_136 = arith.constant 0 : index
    %c0_137 = arith.constant 0 : index
    %148 = vector.load %arg8[%c0_134, %c3_135, %c0_136, %c0_137] : memref<2x4x1x8xf32, #tpu.memory_space<vmem>>, vector<1x1x1x8xf32>
    %149 = vector.shape_cast %148 : vector<1x1x1x8xf32> to vector<1x8xf32>
    %150 = vector.broadcast %149 : vector<1x8xf32> to vector<16x8xf32>
    %151 = arith.addf %147, %150 : vector<16x8xf32>
    %152 = vector.shape_cast %151 : vector<16x8xf32> to vector<2x8x8xf32>
    "tpu.trace_start"() <{level = 10 : i32, message = "bqd,bkd->bqk"}> : () -> ()
    %cst_138 = arith.constant dense<0.000000e+00> : vector<2x8x8xf32>
    %153 = tpu.matmul %136, %144, %cst_138 {dimension_numbers = #tpu.dot_dimension_numbers<[2], [2], [1], [1], [0, 0, 0, 1, 1, 1], [0], [0]>} : vector<2x8x8xf32>, vector<2x8x8xf32>, vector<2x8x8xf32> -> vector<2x8x8xf32>
    "tpu.trace_stop"() : () -> ()
    %cst_139 = arith.constant dense<0xFF800000> : vector<2x8xf32>
    %154 = vector.multi_reduction <maximumf>, %153, %cst_139 [2] : vector<2x8x8xf32> to vector<2x8xf32>
    %155 = vector.shape_cast %154 : vector<2x8xf32> to vector<2x8x1xf32>
    %156 = vector.broadcast %155 : vector<2x8x1xf32> to vector<2x8x8xf32>
    %157 = arith.subf %153, %156 : vector<2x8x8xf32>
    %158 = math.exp %157 : vector<2x8x8xf32>
    %cst_140 = arith.constant dense<0.000000e+00> : vector<2x8xf32>
    %159 = vector.multi_reduction <add>, %158, %cst_140 [2] : vector<2x8x8xf32> to vector<2x8xf32>
    %160 = vector.shape_cast %159 : vector<2x8xf32> to vector<2x8x1xf32>
    %161 = tpu.reciprocal %160 {approx = true} : vector<2x8x1xf32> -> vector<2x8x1xf32>
    %162 = vector.broadcast %161 : vector<2x8x1xf32> to vector<2x8x8xf32>
    %163 = arith.mulf %158, %162 : vector<2x8x8xf32>
    "tpu.trace_start"() <{level = 10 : i32, message = "bqk,bkd->bqd"}> : () -> ()
    %cst_141 = arith.constant dense<0.000000e+00> : vector<2x8x8xf32>
    %164 = tpu.matmul %163, %152, %cst_141 {dimension_numbers = #tpu.dot_dimension_numbers<[2], [1], [1], [2], [0, 0, 0, 1, 1, 2], [0], [0]>} : vector<2x8x8xf32>, vector<2x8x8xf32>, vector<2x8x8xf32> -> vector<2x8x8xf32>
    "tpu.trace_stop"() : () -> ()
    %165 = vector.shape_cast %164 : vector<2x8x8xf32> to vector<16x8xf32>
    %c0_142 = arith.constant 0 : index
    %c3_143 = arith.constant 3 : index
    %c0_144 = arith.constant 0 : index
    %c0_145 = arith.constant 0 : index
    %166 = vector.load %arg9[%c0_142, %c3_143, %c0_144, %c0_145] : memref<2x4x8x32xf32, #tpu.memory_space<vmem>>, vector<1x1x8x32xf32>
    %167 = vector.shape_cast %166 : vector<1x1x8x32xf32> to vector<8x32xf32>
    %cst_146 = arith.constant dense<0.000000e+00> : vector<16x32xf32>
    %168 = tpu.matmul %165, %167, %cst_146 {dimension_numbers = #tpu.dot_dimension_numbers<[1], [0], [0], [1], [0, 0, 1, 1], [], []>} : vector<16x8xf32>, vector<8x32xf32>, vector<16x32xf32> -> vector<16x32xf32>
    %169 = arith.addf %128, %168 : vector<16x32xf32>
    %c0_147 = arith.constant 0 : index
    %c0_148 = arith.constant 0 : index
    %c0_149 = arith.constant 0 : index
    %170 = vector.load %arg10[%c0_147, %c0_148, %c0_149] : memref<2x1x32xf32, #tpu.memory_space<vmem>>, vector<1x1x32xf32>
    %171 = vector.shape_cast %170 : vector<1x1x32xf32> to vector<1x32xf32>
    %172 = vector.broadcast %171 : vector<1x32xf32> to vector<16x32xf32>
    %173 = arith.addf %169, %172 : vector<16x32xf32>
    %174 = arith.addf %4, %173 : vector<16x32xf32>
    %c0_150 = arith.constant 0 : index
    %c0_151 = arith.constant 0 : index
    %c0_152 = arith.constant 0 : index
    %175 = vector.load %arg11[%c0_150, %c0_151, %c0_152] : memref<2x1x32xf32, #tpu.memory_space<vmem>>, vector<1x1x32xf32>
    %176 = vector.shape_cast %175 : vector<1x1x32xf32> to vector<1x32xf32>
    %c0_153 = arith.constant 0 : index
    %c0_154 = arith.constant 0 : index
    %c0_155 = arith.constant 0 : index
    %177 = vector.load %arg12[%c0_153, %c0_154, %c0_155] : memref<2x1x32xf32, #tpu.memory_space<vmem>>, vector<1x1x32xf32>
    %178 = vector.shape_cast %177 : vector<1x1x32xf32> to vector<1x32xf32>
    %cst_156 = arith.constant dense<0.000000e+00> : vector<16xf32>
    %179 = vector.multi_reduction <add>, %174, %cst_156 [1] : vector<16x32xf32> to vector<16xf32>
    %180 = vector.shape_cast %179 : vector<16xf32> to vector<16x1xf32>
    %cst_157 = arith.constant 3.200000e+01 : f32
    %181 = vector.broadcast %cst_157 : f32 to vector<16x1xf32>
    %182 = arith.divf %180, %181 : vector<16x1xf32>
    %183 = vector.broadcast %182 : vector<16x1xf32> to vector<16x32xf32>
    %184 = arith.subf %174, %183 : vector<16x32xf32>
    %185 = arith.mulf %184, %184 : vector<16x32xf32>
    %cst_158 = arith.constant dense<0.000000e+00> : vector<16xf32>
    %186 = vector.multi_reduction <add>, %185, %cst_158 [1] : vector<16x32xf32> to vector<16xf32>
    %187 = vector.shape_cast %186 : vector<16xf32> to vector<16x1xf32>
    %cst_159 = arith.constant 3.200000e+01 : f32
    %188 = vector.broadcast %cst_159 : f32 to vector<16x1xf32>
    %189 = arith.divf %187, %188 : vector<16x1xf32>
    %190 = vector.broadcast %182 : vector<16x1xf32> to vector<16x32xf32>
    %191 = arith.subf %174, %190 : vector<16x32xf32>
    %cst_160 = arith.constant 9.99999974E-6 : f32
    %192 = vector.broadcast %cst_160 : f32 to vector<16x1xf32>
    %193 = arith.addf %189, %192 : vector<16x1xf32>
    %194 = math.rsqrt %193 : vector<16x1xf32>
    %195 = vector.broadcast %194 : vector<16x1xf32> to vector<16x32xf32>
    %196 = arith.mulf %191, %195 : vector<16x32xf32>
    %197 = vector.broadcast %176 : vector<1x32xf32> to vector<16x32xf32>
    %198 = arith.mulf %196, %197 : vector<16x32xf32>
    %199 = vector.broadcast %178 : vector<1x32xf32> to vector<16x32xf32>
    %200 = arith.addf %198, %199 : vector<16x32xf32>
    %c0_161 = arith.constant 0 : index
    %c0_162 = arith.constant 0 : index
    %c0_163 = arith.constant 0 : index
    %201 = vector.load %arg15[%c0_161, %c0_162, %c0_163] : memref<2x32x64xf32, #tpu.memory_space<vmem>>, vector<1x32x64xf32>
    %202 = vector.shape_cast %201 : vector<1x32x64xf32> to vector<32x64xf32>
    %cst_164 = arith.constant dense<0.000000e+00> : vector<16x64xf32>
    %203 = tpu.matmul %200, %202, %cst_164 {dimension_numbers = #tpu.dot_dimension_numbers<[1], [0], [0], [1], [0, 0, 1, 1], [], []>} : vector<16x32xf32>, vector<32x64xf32>, vector<16x64xf32> -> vector<16x64xf32>
    %c0_165 = arith.constant 0 : index
    %c0_166 = arith.constant 0 : index
    %c0_167 = arith.constant 0 : index
    %204 = vector.load %arg16[%c0_165, %c0_166, %c0_167] : memref<2x1x64xf32, #tpu.memory_space<vmem>>, vector<1x1x64xf32>
    %205 = vector.shape_cast %204 : vector<1x1x64xf32> to vector<1x64xf32>
    %206 = vector.broadcast %205 : vector<1x64xf32> to vector<16x64xf32>
    %207 = arith.addf %203, %206 : vector<16x64xf32>
    %cst_168 = arith.constant 0.000000e+00 : f32
    %208 = vector.broadcast %cst_168 : f32 to vector<16x64xf32>
    %209 = arith.maximumf %207, %208 : vector<16x64xf32>
    %c0_169 = arith.constant 0 : index
    %c0_170 = arith.constant 0 : index
    %c0_171 = arith.constant 0 : index
    %210 = vector.load %arg17[%c0_169, %c0_170, %c0_171] : memref<2x64x32xf32, #tpu.memory_space<vmem>>, vector<1x64x32xf32>
    %211 = vector.shape_cast %210 : vector<1x64x32xf32> to vector<64x32xf32>
    %cst_172 = arith.constant dense<0.000000e+00> : vector<16x32xf32>
    %212 = tpu.matmul %209, %211, %cst_172 {dimension_numbers = #tpu.dot_dimension_numbers<[1], [0], [0], [1], [0, 0, 1, 1], [], []>} : vector<16x64xf32>, vector<64x32xf32>, vector<16x32xf32> -> vector<16x32xf32>
    %c0_173 = arith.constant 0 : index
    %c0_174 = arith.constant 0 : index
    %c0_175 = arith.constant 0 : index
    %213 = vector.load %arg18[%c0_173, %c0_174, %c0_175] : memref<2x1x32xf32, #tpu.memory_space<vmem>>, vector<1x1x32xf32>
    %214 = vector.shape_cast %213 : vector<1x1x32xf32> to vector<1x32xf32>
    %215 = vector.broadcast %214 : vector<1x32xf32> to vector<16x32xf32>
    %216 = arith.addf %212, %215 : vector<16x32xf32>
    %217 = arith.addf %200, %216 : vector<16x32xf32>
    %c0_176 = arith.constant 0 : index
    %c0_177 = arith.constant 0 : index
    %c0_178 = arith.constant 0 : index
    %218 = vector.load %arg13[%c0_176, %c0_177, %c0_178] : memref<2x1x32xf32, #tpu.memory_space<vmem>>, vector<1x1x32xf32>
    %219 = vector.shape_cast %218 : vector<1x1x32xf32> to vector<1x32xf32>
    %c0_179 = arith.constant 0 : index
    %c0_180 = arith.constant 0 : index
    %c0_181 = arith.constant 0 : index
    %220 = vector.load %arg14[%c0_179, %c0_180, %c0_181] : memref<2x1x32xf32, #tpu.memory_space<vmem>>, vector<1x1x32xf32>
    %221 = vector.shape_cast %220 : vector<1x1x32xf32> to vector<1x32xf32>
    %cst_182 = arith.constant dense<0.000000e+00> : vector<16xf32>
    %222 = vector.multi_reduction <add>, %217, %cst_182 [1] : vector<16x32xf32> to vector<16xf32>
    %223 = vector.shape_cast %222 : vector<16xf32> to vector<16x1xf32>
    %cst_183 = arith.constant 3.200000e+01 : f32
    %224 = vector.broadcast %cst_183 : f32 to vector<16x1xf32>
    %225 = arith.divf %223, %224 : vector<16x1xf32>
    %226 = vector.broadcast %225 : vector<16x1xf32> to vector<16x32xf32>
    %227 = arith.subf %217, %226 : vector<16x32xf32>
    %228 = arith.mulf %227, %227 : vector<16x32xf32>
    %cst_184 = arith.constant dense<0.000000e+00> : vector<16xf32>
    %229 = vector.multi_reduction <add>, %228, %cst_184 [1] : vector<16x32xf32> to vector<16xf32>
    %230 = vector.shape_cast %229 : vector<16xf32> to vector<16x1xf32>
    %cst_185 = arith.constant 3.200000e+01 : f32
    %231 = vector.broadcast %cst_185 : f32 to vector<16x1xf32>
    %232 = arith.divf %230, %231 : vector<16x1xf32>
    %233 = vector.broadcast %225 : vector<16x1xf32> to vector<16x32xf32>
    %234 = arith.subf %217, %233 : vector<16x32xf32>
    %cst_186 = arith.constant 9.99999974E-6 : f32
    %235 = vector.broadcast %cst_186 : f32 to vector<16x1xf32>
    %236 = arith.addf %232, %235 : vector<16x1xf32>
    %237 = math.rsqrt %236 : vector<16x1xf32>
    %238 = vector.broadcast %237 : vector<16x1xf32> to vector<16x32xf32>
    %239 = arith.mulf %234, %238 : vector<16x32xf32>
    %240 = vector.broadcast %219 : vector<1x32xf32> to vector<16x32xf32>
    %241 = arith.mulf %239, %240 : vector<16x32xf32>
    %242 = vector.broadcast %221 : vector<1x32xf32> to vector<16x32xf32>
    %243 = arith.addf %241, %242 : vector<16x32xf32>
    %cst_187 = arith.constant 0.000000e+00 : f32
    %244 = vector.broadcast %cst_187 : f32 to vector<16x32xf32>
    %c1_188 = arith.constant 1 : index
    %c0_189 = arith.constant 0 : index
    %c0_190 = arith.constant 0 : index
    %c0_191 = arith.constant 0 : index
    %245 = vector.load %arg3[%c1_188, %c0_189, %c0_190, %c0_191] : memref<2x4x32x8xf32, #tpu.memory_space<vmem>>, vector<1x1x32x8xf32>
    %246 = vector.shape_cast %245 : vector<1x1x32x8xf32> to vector<32x8xf32>
    %cst_192 = arith.constant dense<0.000000e+00> : vector<16x8xf32>
    %247 = tpu.matmul %243, %246, %cst_192 {dimension_numbers = #tpu.dot_dimension_numbers<[1], [0], [0], [1], [0, 0, 1, 1], [], []>} : vector<16x32xf32>, vector<32x8xf32>, vector<16x8xf32> -> vector<16x8xf32>
    %c1_193 = arith.constant 1 : index
    %c0_194 = arith.constant 0 : index
    %c0_195 = arith.constant 0 : index
    %c0_196 = arith.constant 0 : index
    %248 = vector.load %arg6[%c1_193, %c0_194, %c0_195, %c0_196] : memref<2x4x1x8xf32, #tpu.memory_space<vmem>>, vector<1x1x1x8xf32>
    %249 = vector.shape_cast %248 : vector<1x1x1x8xf32> to vector<1x8xf32>
    %250 = vector.broadcast %249 : vector<1x8xf32> to vector<16x8xf32>
    %251 = arith.addf %247, %250 : vector<16x8xf32>
    %252 = vector.shape_cast %251 : vector<16x8xf32> to vector<2x8x8xf32>
    %c1_197 = arith.constant 1 : index
    %c0_198 = arith.constant 0 : index
    %c0_199 = arith.constant 0 : index
    %c0_200 = arith.constant 0 : index
    %253 = vector.load %arg4[%c1_197, %c0_198, %c0_199, %c0_200] : memref<2x4x32x8xf32, #tpu.memory_space<vmem>>, vector<1x1x32x8xf32>
    %254 = vector.shape_cast %253 : vector<1x1x32x8xf32> to vector<32x8xf32>
    %cst_201 = arith.constant dense<0.000000e+00> : vector<16x8xf32>
    %255 = tpu.matmul %243, %254, %cst_201 {dimension_numbers = #tpu.dot_dimension_numbers<[1], [0], [0], [1], [0, 0, 1, 1], [], []>} : vector<16x32xf32>, vector<32x8xf32>, vector<16x8xf32> -> vector<16x8xf32>
    %c1_202 = arith.constant 1 : index
    %c0_203 = arith.constant 0 : index
    %c0_204 = arith.constant 0 : index
    %c0_205 = arith.constant 0 : index
    %256 = vector.load %arg7[%c1_202, %c0_203, %c0_204, %c0_205] : memref<2x4x1x8xf32, #tpu.memory_space<vmem>>, vector<1x1x1x8xf32>
    %257 = vector.shape_cast %256 : vector<1x1x1x8xf32> to vector<1x8xf32>
    %258 = vector.broadcast %257 : vector<1x8xf32> to vector<16x8xf32>
    %259 = arith.addf %255, %258 : vector<16x8xf32>
    %260 = vector.shape_cast %259 : vector<16x8xf32> to vector<2x8x8xf32>
    %c1_206 = arith.constant 1 : index
    %c0_207 = arith.constant 0 : index
    %c0_208 = arith.constant 0 : index
    %c0_209 = arith.constant 0 : index
    %261 = vector.load %arg5[%c1_206, %c0_207, %c0_208, %c0_209] : memref<2x4x32x8xf32, #tpu.memory_space<vmem>>, vector<1x1x32x8xf32>
    %262 = vector.shape_cast %261 : vector<1x1x32x8xf32> to vector<32x8xf32>
    %cst_210 = arith.constant dense<0.000000e+00> : vector<16x8xf32>
    %263 = tpu.matmul %243, %262, %cst_210 {dimension_numbers = #tpu.dot_dimension_numbers<[1], [0], [0], [1], [0, 0, 1, 1], [], []>} : vector<16x32xf32>, vector<32x8xf32>, vector<16x8xf32> -> vector<16x8xf32>
    %c1_211 = arith.constant 1 : index
    %c0_212 = arith.constant 0 : index
    %c0_213 = arith.constant 0 : index
    %c0_214 = arith.constant 0 : index
    %264 = vector.load %arg8[%c1_211, %c0_212, %c0_213, %c0_214] : memref<2x4x1x8xf32, #tpu.memory_space<vmem>>, vector<1x1x1x8xf32>
    %265 = vector.shape_cast %264 : vector<1x1x1x8xf32> to vector<1x8xf32>
    %266 = vector.broadcast %265 : vector<1x8xf32> to vector<16x8xf32>
    %267 = arith.addf %263, %266 : vector<16x8xf32>
    %268 = vector.shape_cast %267 : vector<16x8xf32> to vector<2x8x8xf32>
    "tpu.trace_start"() <{level = 10 : i32, message = "bqd,bkd->bqk"}> : () -> ()
    %cst_215 = arith.constant dense<0.000000e+00> : vector<2x8x8xf32>
    %269 = tpu.matmul %252, %260, %cst_215 {dimension_numbers = #tpu.dot_dimension_numbers<[2], [2], [1], [1], [0, 0, 0, 1, 1, 1], [0], [0]>} : vector<2x8x8xf32>, vector<2x8x8xf32>, vector<2x8x8xf32> -> vector<2x8x8xf32>
    "tpu.trace_stop"() : () -> ()
    %cst_216 = arith.constant dense<0xFF800000> : vector<2x8xf32>
    %270 = vector.multi_reduction <maximumf>, %269, %cst_216 [2] : vector<2x8x8xf32> to vector<2x8xf32>
    %271 = vector.shape_cast %270 : vector<2x8xf32> to vector<2x8x1xf32>
    %272 = vector.broadcast %271 : vector<2x8x1xf32> to vector<2x8x8xf32>
    %273 = arith.subf %269, %272 : vector<2x8x8xf32>
    %274 = math.exp %273 : vector<2x8x8xf32>
    %cst_217 = arith.constant dense<0.000000e+00> : vector<2x8xf32>
    %275 = vector.multi_reduction <add>, %274, %cst_217 [2] : vector<2x8x8xf32> to vector<2x8xf32>
    %276 = vector.shape_cast %275 : vector<2x8xf32> to vector<2x8x1xf32>
    %277 = tpu.reciprocal %276 {approx = true} : vector<2x8x1xf32> -> vector<2x8x1xf32>
    %278 = vector.broadcast %277 : vector<2x8x1xf32> to vector<2x8x8xf32>
    %279 = arith.mulf %274, %278 : vector<2x8x8xf32>
    "tpu.trace_start"() <{level = 10 : i32, message = "bqk,bkd->bqd"}> : () -> ()
    %cst_218 = arith.constant dense<0.000000e+00> : vector<2x8x8xf32>
    %280 = tpu.matmul %279, %268, %cst_218 {dimension_numbers = #tpu.dot_dimension_numbers<[2], [1], [1], [2], [0, 0, 0, 1, 1, 2], [0], [0]>} : vector<2x8x8xf32>, vector<2x8x8xf32>, vector<2x8x8xf32> -> vector<2x8x8xf32>
    "tpu.trace_stop"() : () -> ()
    %281 = vector.shape_cast %280 : vector<2x8x8xf32> to vector<16x8xf32>
    %c1_219 = arith.constant 1 : index
    %c0_220 = arith.constant 0 : index
    %c0_221 = arith.constant 0 : index
    %c0_222 = arith.constant 0 : index
    %282 = vector.load %arg9[%c1_219, %c0_220, %c0_221, %c0_222] : memref<2x4x8x32xf32, #tpu.memory_space<vmem>>, vector<1x1x8x32xf32>
    %283 = vector.shape_cast %282 : vector<1x1x8x32xf32> to vector<8x32xf32>
    %cst_223 = arith.constant dense<0.000000e+00> : vector<16x32xf32>
    %284 = tpu.matmul %281, %283, %cst_223 {dimension_numbers = #tpu.dot_dimension_numbers<[1], [0], [0], [1], [0, 0, 1, 1], [], []>} : vector<16x8xf32>, vector<8x32xf32>, vector<16x32xf32> -> vector<16x32xf32>
    %285 = arith.addf %244, %284 : vector<16x32xf32>
    %c1_224 = arith.constant 1 : index
    %c1_225 = arith.constant 1 : index
    %c0_226 = arith.constant 0 : index
    %c0_227 = arith.constant 0 : index
    %286 = vector.load %arg3[%c1_224, %c1_225, %c0_226, %c0_227] : memref<2x4x32x8xf32, #tpu.memory_space<vmem>>, vector<1x1x32x8xf32>
    %287 = vector.shape_cast %286 : vector<1x1x32x8xf32> to vector<32x8xf32>
    %cst_228 = arith.constant dense<0.000000e+00> : vector<16x8xf32>
    %288 = tpu.matmul %243, %287, %cst_228 {dimension_numbers = #tpu.dot_dimension_numbers<[1], [0], [0], [1], [0, 0, 1, 1], [], []>} : vector<16x32xf32>, vector<32x8xf32>, vector<16x8xf32> -> vector<16x8xf32>
    %c1_229 = arith.constant 1 : index
    %c1_230 = arith.constant 1 : index
    %c0_231 = arith.constant 0 : index
    %c0_232 = arith.constant 0 : index
    %289 = vector.load %arg6[%c1_229, %c1_230, %c0_231, %c0_232] : memref<2x4x1x8xf32, #tpu.memory_space<vmem>>, vector<1x1x1x8xf32>
    %290 = vector.shape_cast %289 : vector<1x1x1x8xf32> to vector<1x8xf32>
    %291 = vector.broadcast %290 : vector<1x8xf32> to vector<16x8xf32>
    %292 = arith.addf %288, %291 : vector<16x8xf32>
    %293 = vector.shape_cast %292 : vector<16x8xf32> to vector<2x8x8xf32>
    %c1_233 = arith.constant 1 : index
    %c1_234 = arith.constant 1 : index
    %c0_235 = arith.constant 0 : index
    %c0_236 = arith.constant 0 : index
    %294 = vector.load %arg4[%c1_233, %c1_234, %c0_235, %c0_236] : memref<2x4x32x8xf32, #tpu.memory_space<vmem>>, vector<1x1x32x8xf32>
    %295 = vector.shape_cast %294 : vector<1x1x32x8xf32> to vector<32x8xf32>
    %cst_237 = arith.constant dense<0.000000e+00> : vector<16x8xf32>
    %296 = tpu.matmul %243, %295, %cst_237 {dimension_numbers = #tpu.dot_dimension_numbers<[1], [0], [0], [1], [0, 0, 1, 1], [], []>} : vector<16x32xf32>, vector<32x8xf32>, vector<16x8xf32> -> vector<16x8xf32>
    %c1_238 = arith.constant 1 : index
    %c1_239 = arith.constant 1 : index
    %c0_240 = arith.constant 0 : index
    %c0_241 = arith.constant 0 : index
    %297 = vector.load %arg7[%c1_238, %c1_239, %c0_240, %c0_241] : memref<2x4x1x8xf32, #tpu.memory_space<vmem>>, vector<1x1x1x8xf32>
    %298 = vector.shape_cast %297 : vector<1x1x1x8xf32> to vector<1x8xf32>
    %299 = vector.broadcast %298 : vector<1x8xf32> to vector<16x8xf32>
    %300 = arith.addf %296, %299 : vector<16x8xf32>
    %301 = vector.shape_cast %300 : vector<16x8xf32> to vector<2x8x8xf32>
    %c1_242 = arith.constant 1 : index
    %c1_243 = arith.constant 1 : index
    %c0_244 = arith.constant 0 : index
    %c0_245 = arith.constant 0 : index
    %302 = vector.load %arg5[%c1_242, %c1_243, %c0_244, %c0_245] : memref<2x4x32x8xf32, #tpu.memory_space<vmem>>, vector<1x1x32x8xf32>
    %303 = vector.shape_cast %302 : vector<1x1x32x8xf32> to vector<32x8xf32>
    %cst_246 = arith.constant dense<0.000000e+00> : vector<16x8xf32>
    %304 = tpu.matmul %243, %303, %cst_246 {dimension_numbers = #tpu.dot_dimension_numbers<[1], [0], [0], [1], [0, 0, 1, 1], [], []>} : vector<16x32xf32>, vector<32x8xf32>, vector<16x8xf32> -> vector<16x8xf32>
    %c1_247 = arith.constant 1 : index
    %c1_248 = arith.constant 1 : index
    %c0_249 = arith.constant 0 : index
    %c0_250 = arith.constant 0 : index
    %305 = vector.load %arg8[%c1_247, %c1_248, %c0_249, %c0_250] : memref<2x4x1x8xf32, #tpu.memory_space<vmem>>, vector<1x1x1x8xf32>
    %306 = vector.shape_cast %305 : vector<1x1x1x8xf32> to vector<1x8xf32>
    %307 = vector.broadcast %306 : vector<1x8xf32> to vector<16x8xf32>
    %308 = arith.addf %304, %307 : vector<16x8xf32>
    %309 = vector.shape_cast %308 : vector<16x8xf32> to vector<2x8x8xf32>
    "tpu.trace_start"() <{level = 10 : i32, message = "bqd,bkd->bqk"}> : () -> ()
    %cst_251 = arith.constant dense<0.000000e+00> : vector<2x8x8xf32>
    %310 = tpu.matmul %293, %301, %cst_251 {dimension_numbers = #tpu.dot_dimension_numbers<[2], [2], [1], [1], [0, 0, 0, 1, 1, 1], [0], [0]>} : vector<2x8x8xf32>, vector<2x8x8xf32>, vector<2x8x8xf32> -> vector<2x8x8xf32>
    "tpu.trace_stop"() : () -> ()
    %cst_252 = arith.constant dense<0xFF800000> : vector<2x8xf32>
    %311 = vector.multi_reduction <maximumf>, %310, %cst_252 [2] : vector<2x8x8xf32> to vector<2x8xf32>
    %312 = vector.shape_cast %311 : vector<2x8xf32> to vector<2x8x1xf32>
    %313 = vector.broadcast %312 : vector<2x8x1xf32> to vector<2x8x8xf32>
    %314 = arith.subf %310, %313 : vector<2x8x8xf32>
    %315 = math.exp %314 : vector<2x8x8xf32>
    %cst_253 = arith.constant dense<0.000000e+00> : vector<2x8xf32>
    %316 = vector.multi_reduction <add>, %315, %cst_253 [2] : vector<2x8x8xf32> to vector<2x8xf32>
    %317 = vector.shape_cast %316 : vector<2x8xf32> to vector<2x8x1xf32>
    %318 = tpu.reciprocal %317 {approx = true} : vector<2x8x1xf32> -> vector<2x8x1xf32>
    %319 = vector.broadcast %318 : vector<2x8x1xf32> to vector<2x8x8xf32>
    %320 = arith.mulf %315, %319 : vector<2x8x8xf32>
    "tpu.trace_start"() <{level = 10 : i32, message = "bqk,bkd->bqd"}> : () -> ()
    %cst_254 = arith.constant dense<0.000000e+00> : vector<2x8x8xf32>
    %321 = tpu.matmul %320, %309, %cst_254 {dimension_numbers = #tpu.dot_dimension_numbers<[2], [1], [1], [2], [0, 0, 0, 1, 1, 2], [0], [0]>} : vector<2x8x8xf32>, vector<2x8x8xf32>, vector<2x8x8xf32> -> vector<2x8x8xf32>
    "tpu.trace_stop"() : () -> ()
    %322 = vector.shape_cast %321 : vector<2x8x8xf32> to vector<16x8xf32>
    %c1_255 = arith.constant 1 : index
    %c1_256 = arith.constant 1 : index
    %c0_257 = arith.constant 0 : index
    %c0_258 = arith.constant 0 : index
    %323 = vector.load %arg9[%c1_255, %c1_256, %c0_257, %c0_258] : memref<2x4x8x32xf32, #tpu.memory_space<vmem>>, vector<1x1x8x32xf32>
    %324 = vector.shape_cast %323 : vector<1x1x8x32xf32> to vector<8x32xf32>
    %cst_259 = arith.constant dense<0.000000e+00> : vector<16x32xf32>
    %325 = tpu.matmul %322, %324, %cst_259 {dimension_numbers = #tpu.dot_dimension_numbers<[1], [0], [0], [1], [0, 0, 1, 1], [], []>} : vector<16x8xf32>, vector<8x32xf32>, vector<16x32xf32> -> vector<16x32xf32>
    %326 = arith.addf %285, %325 : vector<16x32xf32>
    %c1_260 = arith.constant 1 : index
    %c2_261 = arith.constant 2 : index
    %c0_262 = arith.constant 0 : index
    %c0_263 = arith.constant 0 : index
    %327 = vector.load %arg3[%c1_260, %c2_261, %c0_262, %c0_263] : memref<2x4x32x8xf32, #tpu.memory_space<vmem>>, vector<1x1x32x8xf32>
    %328 = vector.shape_cast %327 : vector<1x1x32x8xf32> to vector<32x8xf32>
    %cst_264 = arith.constant dense<0.000000e+00> : vector<16x8xf32>
    %329 = tpu.matmul %243, %328, %cst_264 {dimension_numbers = #tpu.dot_dimension_numbers<[1], [0], [0], [1], [0, 0, 1, 1], [], []>} : vector<16x32xf32>, vector<32x8xf32>, vector<16x8xf32> -> vector<16x8xf32>
    %c1_265 = arith.constant 1 : index
    %c2_266 = arith.constant 2 : index
    %c0_267 = arith.constant 0 : index
    %c0_268 = arith.constant 0 : index
    %330 = vector.load %arg6[%c1_265, %c2_266, %c0_267, %c0_268] : memref<2x4x1x8xf32, #tpu.memory_space<vmem>>, vector<1x1x1x8xf32>
    %331 = vector.shape_cast %330 : vector<1x1x1x8xf32> to vector<1x8xf32>
    %332 = vector.broadcast %331 : vector<1x8xf32> to vector<16x8xf32>
    %333 = arith.addf %329, %332 : vector<16x8xf32>
    %334 = vector.shape_cast %333 : vector<16x8xf32> to vector<2x8x8xf32>
    %c1_269 = arith.constant 1 : index
    %c2_270 = arith.constant 2 : index
    %c0_271 = arith.constant 0 : index
    %c0_272 = arith.constant 0 : index
    %335 = vector.load %arg4[%c1_269, %c2_270, %c0_271, %c0_272] : memref<2x4x32x8xf32, #tpu.memory_space<vmem>>, vector<1x1x32x8xf32>
    %336 = vector.shape_cast %335 : vector<1x1x32x8xf32> to vector<32x8xf32>
    %cst_273 = arith.constant dense<0.000000e+00> : vector<16x8xf32>
    %337 = tpu.matmul %243, %336, %cst_273 {dimension_numbers = #tpu.dot_dimension_numbers<[1], [0], [0], [1], [0, 0, 1, 1], [], []>} : vector<16x32xf32>, vector<32x8xf32>, vector<16x8xf32> -> vector<16x8xf32>
    %c1_274 = arith.constant 1 : index
    %c2_275 = arith.constant 2 : index
    %c0_276 = arith.constant 0 : index
    %c0_277 = arith.constant 0 : index
    %338 = vector.load %arg7[%c1_274, %c2_275, %c0_276, %c0_277] : memref<2x4x1x8xf32, #tpu.memory_space<vmem>>, vector<1x1x1x8xf32>
    %339 = vector.shape_cast %338 : vector<1x1x1x8xf32> to vector<1x8xf32>
    %340 = vector.broadcast %339 : vector<1x8xf32> to vector<16x8xf32>
    %341 = arith.addf %337, %340 : vector<16x8xf32>
    %342 = vector.shape_cast %341 : vector<16x8xf32> to vector<2x8x8xf32>
    %c1_278 = arith.constant 1 : index
    %c2_279 = arith.constant 2 : index
    %c0_280 = arith.constant 0 : index
    %c0_281 = arith.constant 0 : index
    %343 = vector.load %arg5[%c1_278, %c2_279, %c0_280, %c0_281] : memref<2x4x32x8xf32, #tpu.memory_space<vmem>>, vector<1x1x32x8xf32>
    %344 = vector.shape_cast %343 : vector<1x1x32x8xf32> to vector<32x8xf32>
    %cst_282 = arith.constant dense<0.000000e+00> : vector<16x8xf32>
    %345 = tpu.matmul %243, %344, %cst_282 {dimension_numbers = #tpu.dot_dimension_numbers<[1], [0], [0], [1], [0, 0, 1, 1], [], []>} : vector<16x32xf32>, vector<32x8xf32>, vector<16x8xf32> -> vector<16x8xf32>
    %c1_283 = arith.constant 1 : index
    %c2_284 = arith.constant 2 : index
    %c0_285 = arith.constant 0 : index
    %c0_286 = arith.constant 0 : index
    %346 = vector.load %arg8[%c1_283, %c2_284, %c0_285, %c0_286] : memref<2x4x1x8xf32, #tpu.memory_space<vmem>>, vector<1x1x1x8xf32>
    %347 = vector.shape_cast %346 : vector<1x1x1x8xf32> to vector<1x8xf32>
    %348 = vector.broadcast %347 : vector<1x8xf32> to vector<16x8xf32>
    %349 = arith.addf %345, %348 : vector<16x8xf32>
    %350 = vector.shape_cast %349 : vector<16x8xf32> to vector<2x8x8xf32>
    "tpu.trace_start"() <{level = 10 : i32, message = "bqd,bkd->bqk"}> : () -> ()
    %cst_287 = arith.constant dense<0.000000e+00> : vector<2x8x8xf32>
    %351 = tpu.matmul %334, %342, %cst_287 {dimension_numbers = #tpu.dot_dimension_numbers<[2], [2], [1], [1], [0, 0, 0, 1, 1, 1], [0], [0]>} : vector<2x8x8xf32>, vector<2x8x8xf32>, vector<2x8x8xf32> -> vector<2x8x8xf32>
    "tpu.trace_stop"() : () -> ()
    %cst_288 = arith.constant dense<0xFF800000> : vector<2x8xf32>
    %352 = vector.multi_reduction <maximumf>, %351, %cst_288 [2] : vector<2x8x8xf32> to vector<2x8xf32>
    %353 = vector.shape_cast %352 : vector<2x8xf32> to vector<2x8x1xf32>
    %354 = vector.broadcast %353 : vector<2x8x1xf32> to vector<2x8x8xf32>
    %355 = arith.subf %351, %354 : vector<2x8x8xf32>
    %356 = math.exp %355 : vector<2x8x8xf32>
    %cst_289 = arith.constant dense<0.000000e+00> : vector<2x8xf32>
    %357 = vector.multi_reduction <add>, %356, %cst_289 [2] : vector<2x8x8xf32> to vector<2x8xf32>
    %358 = vector.shape_cast %357 : vector<2x8xf32> to vector<2x8x1xf32>
    %359 = tpu.reciprocal %358 {approx = true} : vector<2x8x1xf32> -> vector<2x8x1xf32>
    %360 = vector.broadcast %359 : vector<2x8x1xf32> to vector<2x8x8xf32>
    %361 = arith.mulf %356, %360 : vector<2x8x8xf32>
    "tpu.trace_start"() <{level = 10 : i32, message = "bqk,bkd->bqd"}> : () -> ()
    %cst_290 = arith.constant dense<0.000000e+00> : vector<2x8x8xf32>
    %362 = tpu.matmul %361, %350, %cst_290 {dimension_numbers = #tpu.dot_dimension_numbers<[2], [1], [1], [2], [0, 0, 0, 1, 1, 2], [0], [0]>} : vector<2x8x8xf32>, vector<2x8x8xf32>, vector<2x8x8xf32> -> vector<2x8x8xf32>
    "tpu.trace_stop"() : () -> ()
    %363 = vector.shape_cast %362 : vector<2x8x8xf32> to vector<16x8xf32>
    %c1_291 = arith.constant 1 : index
    %c2_292 = arith.constant 2 : index
    %c0_293 = arith.constant 0 : index
    %c0_294 = arith.constant 0 : index
    %364 = vector.load %arg9[%c1_291, %c2_292, %c0_293, %c0_294] : memref<2x4x8x32xf32, #tpu.memory_space<vmem>>, vector<1x1x8x32xf32>
    %365 = vector.shape_cast %364 : vector<1x1x8x32xf32> to vector<8x32xf32>
    %cst_295 = arith.constant dense<0.000000e+00> : vector<16x32xf32>
    %366 = tpu.matmul %363, %365, %cst_295 {dimension_numbers = #tpu.dot_dimension_numbers<[1], [0], [0], [1], [0, 0, 1, 1], [], []>} : vector<16x8xf32>, vector<8x32xf32>, vector<16x32xf32> -> vector<16x32xf32>
    %367 = arith.addf %326, %366 : vector<16x32xf32>
    %c1_296 = arith.constant 1 : index
    %c3_297 = arith.constant 3 : index
    %c0_298 = arith.constant 0 : index
    %c0_299 = arith.constant 0 : index
    %368 = vector.load %arg3[%c1_296, %c3_297, %c0_298, %c0_299] : memref<2x4x32x8xf32, #tpu.memory_space<vmem>>, vector<1x1x32x8xf32>
    %369 = vector.shape_cast %368 : vector<1x1x32x8xf32> to vector<32x8xf32>
    %cst_300 = arith.constant dense<0.000000e+00> : vector<16x8xf32>
    %370 = tpu.matmul %243, %369, %cst_300 {dimension_numbers = #tpu.dot_dimension_numbers<[1], [0], [0], [1], [0, 0, 1, 1], [], []>} : vector<16x32xf32>, vector<32x8xf32>, vector<16x8xf32> -> vector<16x8xf32>
    %c1_301 = arith.constant 1 : index
    %c3_302 = arith.constant 3 : index
    %c0_303 = arith.constant 0 : index
    %c0_304 = arith.constant 0 : index
    %371 = vector.load %arg6[%c1_301, %c3_302, %c0_303, %c0_304] : memref<2x4x1x8xf32, #tpu.memory_space<vmem>>, vector<1x1x1x8xf32>
    %372 = vector.shape_cast %371 : vector<1x1x1x8xf32> to vector<1x8xf32>
    %373 = vector.broadcast %372 : vector<1x8xf32> to vector<16x8xf32>
    %374 = arith.addf %370, %373 : vector<16x8xf32>
    %375 = vector.shape_cast %374 : vector<16x8xf32> to vector<2x8x8xf32>
    %c1_305 = arith.constant 1 : index
    %c3_306 = arith.constant 3 : index
    %c0_307 = arith.constant 0 : index
    %c0_308 = arith.constant 0 : index
    %376 = vector.load %arg4[%c1_305, %c3_306, %c0_307, %c0_308] : memref<2x4x32x8xf32, #tpu.memory_space<vmem>>, vector<1x1x32x8xf32>
    %377 = vector.shape_cast %376 : vector<1x1x32x8xf32> to vector<32x8xf32>
    %cst_309 = arith.constant dense<0.000000e+00> : vector<16x8xf32>
    %378 = tpu.matmul %243, %377, %cst_309 {dimension_numbers = #tpu.dot_dimension_numbers<[1], [0], [0], [1], [0, 0, 1, 1], [], []>} : vector<16x32xf32>, vector<32x8xf32>, vector<16x8xf32> -> vector<16x8xf32>
    %c1_310 = arith.constant 1 : index
    %c3_311 = arith.constant 3 : index
    %c0_312 = arith.constant 0 : index
    %c0_313 = arith.constant 0 : index
    %379 = vector.load %arg7[%c1_310, %c3_311, %c0_312, %c0_313] : memref<2x4x1x8xf32, #tpu.memory_space<vmem>>, vector<1x1x1x8xf32>
    %380 = vector.shape_cast %379 : vector<1x1x1x8xf32> to vector<1x8xf32>
    %381 = vector.broadcast %380 : vector<1x8xf32> to vector<16x8xf32>
    %382 = arith.addf %378, %381 : vector<16x8xf32>
    %383 = vector.shape_cast %382 : vector<16x8xf32> to vector<2x8x8xf32>
    %c1_314 = arith.constant 1 : index
    %c3_315 = arith.constant 3 : index
    %c0_316 = arith.constant 0 : index
    %c0_317 = arith.constant 0 : index
    %384 = vector.load %arg5[%c1_314, %c3_315, %c0_316, %c0_317] : memref<2x4x32x8xf32, #tpu.memory_space<vmem>>, vector<1x1x32x8xf32>
    %385 = vector.shape_cast %384 : vector<1x1x32x8xf32> to vector<32x8xf32>
    %cst_318 = arith.constant dense<0.000000e+00> : vector<16x8xf32>
    %386 = tpu.matmul %243, %385, %cst_318 {dimension_numbers = #tpu.dot_dimension_numbers<[1], [0], [0], [1], [0, 0, 1, 1], [], []>} : vector<16x32xf32>, vector<32x8xf32>, vector<16x8xf32> -> vector<16x8xf32>
    %c1_319 = arith.constant 1 : index
    %c3_320 = arith.constant 3 : index
    %c0_321 = arith.constant 0 : index
    %c0_322 = arith.constant 0 : index
    %387 = vector.load %arg8[%c1_319, %c3_320, %c0_321, %c0_322] : memref<2x4x1x8xf32, #tpu.memory_space<vmem>>, vector<1x1x1x8xf32>
    %388 = vector.shape_cast %387 : vector<1x1x1x8xf32> to vector<1x8xf32>
    %389 = vector.broadcast %388 : vector<1x8xf32> to vector<16x8xf32>
    %390 = arith.addf %386, %389 : vector<16x8xf32>
    %391 = vector.shape_cast %390 : vector<16x8xf32> to vector<2x8x8xf32>
    "tpu.trace_start"() <{level = 10 : i32, message = "bqd,bkd->bqk"}> : () -> ()
    %cst_323 = arith.constant dense<0.000000e+00> : vector<2x8x8xf32>
    %392 = tpu.matmul %375, %383, %cst_323 {dimension_numbers = #tpu.dot_dimension_numbers<[2], [2], [1], [1], [0, 0, 0, 1, 1, 1], [0], [0]>} : vector<2x8x8xf32>, vector<2x8x8xf32>, vector<2x8x8xf32> -> vector<2x8x8xf32>
    "tpu.trace_stop"() : () -> ()
    %cst_324 = arith.constant dense<0xFF800000> : vector<2x8xf32>
    %393 = vector.multi_reduction <maximumf>, %392, %cst_324 [2] : vector<2x8x8xf32> to vector<2x8xf32>
    %394 = vector.shape_cast %393 : vector<2x8xf32> to vector<2x8x1xf32>
    %395 = vector.broadcast %394 : vector<2x8x1xf32> to vector<2x8x8xf32>
    %396 = arith.subf %392, %395 : vector<2x8x8xf32>
    %397 = math.exp %396 : vector<2x8x8xf32>
    %cst_325 = arith.constant dense<0.000000e+00> : vector<2x8xf32>
    %398 = vector.multi_reduction <add>, %397, %cst_325 [2] : vector<2x8x8xf32> to vector<2x8xf32>
    %399 = vector.shape_cast %398 : vector<2x8xf32> to vector<2x8x1xf32>
    %400 = tpu.reciprocal %399 {approx = true} : vector<2x8x1xf32> -> vector<2x8x1xf32>
    %401 = vector.broadcast %400 : vector<2x8x1xf32> to vector<2x8x8xf32>
    %402 = arith.mulf %397, %401 : vector<2x8x8xf32>
    "tpu.trace_start"() <{level = 10 : i32, message = "bqk,bkd->bqd"}> : () -> ()
    %cst_326 = arith.constant dense<0.000000e+00> : vector<2x8x8xf32>
    %403 = tpu.matmul %402, %391, %cst_326 {dimension_numbers = #tpu.dot_dimension_numbers<[2], [1], [1], [2], [0, 0, 0, 1, 1, 2], [0], [0]>} : vector<2x8x8xf32>, vector<2x8x8xf32>, vector<2x8x8xf32> -> vector<2x8x8xf32>
    "tpu.trace_stop"() : () -> ()
    %404 = vector.shape_cast %403 : vector<2x8x8xf32> to vector<16x8xf32>
    %c1_327 = arith.constant 1 : index
    %c3_328 = arith.constant 3 : index
    %c0_329 = arith.constant 0 : index
    %c0_330 = arith.constant 0 : index
    %405 = vector.load %arg9[%c1_327, %c3_328, %c0_329, %c0_330] : memref<2x4x8x32xf32, #tpu.memory_space<vmem>>, vector<1x1x8x32xf32>
    %406 = vector.shape_cast %405 : vector<1x1x8x32xf32> to vector<8x32xf32>
    %cst_331 = arith.constant dense<0.000000e+00> : vector<16x32xf32>
    %407 = tpu.matmul %404, %406, %cst_331 {dimension_numbers = #tpu.dot_dimension_numbers<[1], [0], [0], [1], [0, 0, 1, 1], [], []>} : vector<16x8xf32>, vector<8x32xf32>, vector<16x32xf32> -> vector<16x32xf32>
    %408 = arith.addf %367, %407 : vector<16x32xf32>
    %c1_332 = arith.constant 1 : index
    %c0_333 = arith.constant 0 : index
    %c0_334 = arith.constant 0 : index
    %409 = vector.load %arg10[%c1_332, %c0_333, %c0_334] : memref<2x1x32xf32, #tpu.memory_space<vmem>>, vector<1x1x32xf32>
    %410 = vector.shape_cast %409 : vector<1x1x32xf32> to vector<1x32xf32>
    %411 = vector.broadcast %410 : vector<1x32xf32> to vector<16x32xf32>
    %412 = arith.addf %408, %411 : vector<16x32xf32>
    %413 = arith.addf %243, %412 : vector<16x32xf32>
    %c1_335 = arith.constant 1 : index
    %c0_336 = arith.constant 0 : index
    %c0_337 = arith.constant 0 : index
    %414 = vector.load %arg11[%c1_335, %c0_336, %c0_337] : memref<2x1x32xf32, #tpu.memory_space<vmem>>, vector<1x1x32xf32>
    %415 = vector.shape_cast %414 : vector<1x1x32xf32> to vector<1x32xf32>
    %c1_338 = arith.constant 1 : index
    %c0_339 = arith.constant 0 : index
    %c0_340 = arith.constant 0 : index
    %416 = vector.load %arg12[%c1_338, %c0_339, %c0_340] : memref<2x1x32xf32, #tpu.memory_space<vmem>>, vector<1x1x32xf32>
    %417 = vector.shape_cast %416 : vector<1x1x32xf32> to vector<1x32xf32>
    %cst_341 = arith.constant dense<0.000000e+00> : vector<16xf32>
    %418 = vector.multi_reduction <add>, %413, %cst_341 [1] : vector<16x32xf32> to vector<16xf32>
    %419 = vector.shape_cast %418 : vector<16xf32> to vector<16x1xf32>
    %cst_342 = arith.constant 3.200000e+01 : f32
    %420 = vector.broadcast %cst_342 : f32 to vector<16x1xf32>
    %421 = arith.divf %419, %420 : vector<16x1xf32>
    %422 = vector.broadcast %421 : vector<16x1xf32> to vector<16x32xf32>
    %423 = arith.subf %413, %422 : vector<16x32xf32>
    %424 = arith.mulf %423, %423 : vector<16x32xf32>
    %cst_343 = arith.constant dense<0.000000e+00> : vector<16xf32>
    %425 = vector.multi_reduction <add>, %424, %cst_343 [1] : vector<16x32xf32> to vector<16xf32>
    %426 = vector.shape_cast %425 : vector<16xf32> to vector<16x1xf32>
    %cst_344 = arith.constant 3.200000e+01 : f32
    %427 = vector.broadcast %cst_344 : f32 to vector<16x1xf32>
    %428 = arith.divf %426, %427 : vector<16x1xf32>
    %429 = vector.broadcast %421 : vector<16x1xf32> to vector<16x32xf32>
    %430 = arith.subf %413, %429 : vector<16x32xf32>
    %cst_345 = arith.constant 9.99999974E-6 : f32
    %431 = vector.broadcast %cst_345 : f32 to vector<16x1xf32>
    %432 = arith.addf %428, %431 : vector<16x1xf32>
    %433 = math.rsqrt %432 : vector<16x1xf32>
    %434 = vector.broadcast %433 : vector<16x1xf32> to vector<16x32xf32>
    %435 = arith.mulf %430, %434 : vector<16x32xf32>
    %436 = vector.broadcast %415 : vector<1x32xf32> to vector<16x32xf32>
    %437 = arith.mulf %435, %436 : vector<16x32xf32>
    %438 = vector.broadcast %417 : vector<1x32xf32> to vector<16x32xf32>
    %439 = arith.addf %437, %438 : vector<16x32xf32>
    %c1_346 = arith.constant 1 : index
    %c0_347 = arith.constant 0 : index
    %c0_348 = arith.constant 0 : index
    %440 = vector.load %arg15[%c1_346, %c0_347, %c0_348] : memref<2x32x64xf32, #tpu.memory_space<vmem>>, vector<1x32x64xf32>
    %441 = vector.shape_cast %440 : vector<1x32x64xf32> to vector<32x64xf32>
    %cst_349 = arith.constant dense<0.000000e+00> : vector<16x64xf32>
    %442 = tpu.matmul %439, %441, %cst_349 {dimension_numbers = #tpu.dot_dimension_numbers<[1], [0], [0], [1], [0, 0, 1, 1], [], []>} : vector<16x32xf32>, vector<32x64xf32>, vector<16x64xf32> -> vector<16x64xf32>
    %c1_350 = arith.constant 1 : index
    %c0_351 = arith.constant 0 : index
    %c0_352 = arith.constant 0 : index
    %443 = vector.load %arg16[%c1_350, %c0_351, %c0_352] : memref<2x1x64xf32, #tpu.memory_space<vmem>>, vector<1x1x64xf32>
    %444 = vector.shape_cast %443 : vector<1x1x64xf32> to vector<1x64xf32>
    %445 = vector.broadcast %444 : vector<1x64xf32> to vector<16x64xf32>
    %446 = arith.addf %442, %445 : vector<16x64xf32>
    %cst_353 = arith.constant 0.000000e+00 : f32
    %447 = vector.broadcast %cst_353 : f32 to vector<16x64xf32>
    %448 = arith.maximumf %446, %447 : vector<16x64xf32>
    %c1_354 = arith.constant 1 : index
    %c0_355 = arith.constant 0 : index
    %c0_356 = arith.constant 0 : index
    %449 = vector.load %arg17[%c1_354, %c0_355, %c0_356] : memref<2x64x32xf32, #tpu.memory_space<vmem>>, vector<1x64x32xf32>
    %450 = vector.shape_cast %449 : vector<1x64x32xf32> to vector<64x32xf32>
    %cst_357 = arith.constant dense<0.000000e+00> : vector<16x32xf32>
    %451 = tpu.matmul %448, %450, %cst_357 {dimension_numbers = #tpu.dot_dimension_numbers<[1], [0], [0], [1], [0, 0, 1, 1], [], []>} : vector<16x64xf32>, vector<64x32xf32>, vector<16x32xf32> -> vector<16x32xf32>
    %c1_358 = arith.constant 1 : index
    %c0_359 = arith.constant 0 : index
    %c0_360 = arith.constant 0 : index
    %452 = vector.load %arg18[%c1_358, %c0_359, %c0_360] : memref<2x1x32xf32, #tpu.memory_space<vmem>>, vector<1x1x32xf32>
    %453 = vector.shape_cast %452 : vector<1x1x32xf32> to vector<1x32xf32>
    %454 = vector.broadcast %453 : vector<1x32xf32> to vector<16x32xf32>
    %455 = arith.addf %451, %454 : vector<16x32xf32>
    %456 = arith.addf %439, %455 : vector<16x32xf32>
    %c1_361 = arith.constant 1 : index
    %c0_362 = arith.constant 0 : index
    %c0_363 = arith.constant 0 : index
    %457 = vector.load %arg13[%c1_361, %c0_362, %c0_363] : memref<2x1x32xf32, #tpu.memory_space<vmem>>, vector<1x1x32xf32>
    %458 = vector.shape_cast %457 : vector<1x1x32xf32> to vector<1x32xf32>
    %c1_364 = arith.constant 1 : index
    %c0_365 = arith.constant 0 : index
    %c0_366 = arith.constant 0 : index
    %459 = vector.load %arg14[%c1_364, %c0_365, %c0_366] : memref<2x1x32xf32, #tpu.memory_space<vmem>>, vector<1x1x32xf32>
    %460 = vector.shape_cast %459 : vector<1x1x32xf32> to vector<1x32xf32>
    %cst_367 = arith.constant dense<0.000000e+00> : vector<16xf32>
    %461 = vector.multi_reduction <add>, %456, %cst_367 [1] : vector<16x32xf32> to vector<16xf32>
    %462 = vector.shape_cast %461 : vector<16xf32> to vector<16x1xf32>
    %cst_368 = arith.constant 3.200000e+01 : f32
    %463 = vector.broadcast %cst_368 : f32 to vector<16x1xf32>
    %464 = arith.divf %462, %463 : vector<16x1xf32>
    %465 = vector.broadcast %464 : vector<16x1xf32> to vector<16x32xf32>
    %466 = arith.subf %456, %465 : vector<16x32xf32>
    %467 = arith.mulf %466, %466 : vector<16x32xf32>
    %cst_369 = arith.constant dense<0.000000e+00> : vector<16xf32>
    %468 = vector.multi_reduction <add>, %467, %cst_369 [1] : vector<16x32xf32> to vector<16xf32>
    %469 = vector.shape_cast %468 : vector<16xf32> to vector<16x1xf32>
    %cst_370 = arith.constant 3.200000e+01 : f32
    %470 = vector.broadcast %cst_370 : f32 to vector<16x1xf32>
    %471 = arith.divf %469, %470 : vector<16x1xf32>
    %472 = vector.broadcast %464 : vector<16x1xf32> to vector<16x32xf32>
    %473 = arith.subf %456, %472 : vector<16x32xf32>
    %cst_371 = arith.constant 9.99999974E-6 : f32
    %474 = vector.broadcast %cst_371 : f32 to vector<16x1xf32>
    %475 = arith.addf %471, %474 : vector<16x1xf32>
    %476 = math.rsqrt %475 : vector<16x1xf32>
    %477 = vector.broadcast %476 : vector<16x1xf32> to vector<16x32xf32>
    %478 = arith.mulf %473, %477 : vector<16x32xf32>
    %479 = vector.broadcast %458 : vector<1x32xf32> to vector<16x32xf32>
    %480 = arith.mulf %478, %479 : vector<16x32xf32>
    %481 = vector.broadcast %460 : vector<1x32xf32> to vector<16x32xf32>
    %482 = arith.addf %480, %481 : vector<16x32xf32>
    %483 = vector.shape_cast %482 : vector<16x32xf32> to vector<2x8x32xf32>
    %cst_372 = arith.constant dense<0.000000e+00> : vector<2x32xf32>
    %484 = vector.multi_reduction <add>, %483, %cst_372 [1] : vector<2x8x32xf32> to vector<2x32xf32>
    %cst_373 = arith.constant 8.000000e+00 : f32
    %485 = vector.broadcast %cst_373 : f32 to vector<2x32xf32>
    %486 = arith.divf %484, %485 : vector<2x32xf32>
    %c0_374 = arith.constant 0 : index
    %c0_375 = arith.constant 0 : index
    %487 = vector.load %arg19[%c0_374, %c0_375] : memref<32x2xf32, #tpu.memory_space<vmem>>, vector<32x2xf32>
    %cst_376 = arith.constant dense<0.000000e+00> : vector<2x2xf32>
    %488 = tpu.matmul %486, %487, %cst_376 {dimension_numbers = #tpu.dot_dimension_numbers<[1], [0], [0], [1], [0, 0, 1, 1], [], []>} : vector<2x32xf32>, vector<32x2xf32>, vector<2x2xf32> -> vector<2x2xf32>
    %c0_377 = arith.constant 0 : index
    %c0_378 = arith.constant 0 : index
    %489 = vector.load %arg20[%c0_377, %c0_378] : memref<1x2xf32, #tpu.memory_space<vmem>>, vector<1x2xf32>
    %490 = vector.broadcast %489 : vector<1x2xf32> to vector<2x2xf32>
    %491 = arith.addf %488, %490 : vector<2x2xf32>
    %c0_379 = arith.constant 0 : index
    %c0_380 = arith.constant 0 : index
    %492 = vector.load %arg21[%c0_379, %c0_380] : memref<2x2xf32, #tpu.memory_space<vmem>>, vector<2x2xf32>
    tpu.vector_store %arg21[%c0_379, %c0_380], %491 {strides = array<i32>} : memref<2x2xf32, #tpu.memory_space<vmem>>, vector<2x2xf32>,
    return
  }
}

</mosaic_0001>

<bundles_post_ra>
// kernel: transformer_forward.1
= control target key start
LH: loop header
LB: loop body
LE: loop exit
PB: predicated region body
PF: predicated region fallthrough
CT: control target
= control target key end

     0   :  { %s8699_s0 = inlined_call_operand.vmem [shape: f32[16,16], index: 0, kind: input, shape index: {}]   ;;  %s8700_s1 = inlined_call_operand.vmem [shape: f32[16,32], index: 1, kind: input, shape index: {}]   ;;  %s8701_s2 = inlined_call_operand.vmem [shape: f32[16,32], index: 2, kind: input, shape index: {}]   ;;  %s8702_s3 = inlined_call_operand.vmem [shape: f32[2,4,32,8], index: 3, kind: input, shape index: {}]   ;;  %s8703_s4 = inlined_call_operand.vmem [shape: f32[2,4,32,8], index: 4, kind: input, shape index: {}]   ;;  %s8704_s5 = inlined_call_operand.vmem [shape: f32[2,4,32,8], index: 5, kind: input, shape index: {}]   ;;  %s8705_s6 = inlined_call_operand.vmem [shape: f32[2,4,1,8], index: 6, kind: input, shape index: {}]   ;;  %s8706_s7 = inlined_call_operand.vmem [shape: f32[2,4,1,8], index: 7, kind: input, shape index: {}]   ;;  %s8707_s8 = inlined_call_operand.vmem [shape: f32[2,4,1,8], index: 8, kind: input, shape index: {}]   ;;  %s8708_s9 = inlined_call_operand.vmem [shape: f32[2,4,8,32], index: 9, kind: input, shape index: {}]   ;;  %s8709_s10 = inlined_call_operand.vmem [shape: f32[2,1,32], index: 10, kind: input, shape index: {}]   ;;  %s8710_s11 = inlined_call_operand.vmem [shape: f32[2,1,32], index: 11, kind: input, shape index: {}]   ;;  %s8711_s12 = inlined_call_operand.vmem [shape: f32[2,1,32], index: 12, kind: input, shape index: {}]   ;;  %s8712_s13 = inlined_call_operand.vmem [shape: f32[2,1,32], index: 13, kind: input, shape index: {}]   ;;  %s8713_s14 = inlined_call_operand.vmem [shape: f32[2,1,32], index: 14, kind: input, shape index: {}]   ;;  %s8714_s15 = inlined_call_operand.vmem [shape: f32[2,32,64], index: 15, kind: input, shape index: {}]   ;;  %s8715_s16 = inlined_call_operand.vmem [shape: f32[2,1,64], index: 16, kind: input, shape index: {}]   ;;  %s8716_s17 = inlined_call_operand.vmem [shape: f32[2,64,32], index: 17, kind: input, shape index: {}]   ;;  %s8717_s18 = inlined_call_operand.vmem [shape: f32[2,1,32], index: 18, kind: input, shape index: {}]   ;;  %s8718_s19 = inlined_call_operand.vmem [shape: f32[32,2], index: 19, kind: input, shape index: {}]   ;;  %s8719_s20 = inlined_call_operand.vmem [shape: f32[1,2], index: 20, kind: input, shape index: {}]   ;;  %s8720_s21 = inlined_call_operand.hbm [shape: f32[2,2], index: 21, kind: output, shape index: {}]  }
   0x1   :  { %8727 = sst [smem:[#allocation5_spill]] %s8699_s0 }
   0x2   :  { %8728 = sst [smem:[#allocation6_spill]] %s8700_s1 }
   0x3   :  { %8729 = sst [smem:[#allocation7_spill]] %s8701_s2 }
   0x4   :  { %8730 = sst [smem:[#allocation8_spill]] %s8702_s3 }
   0x5   :  { %8731 = sst [smem:[#allocation9_spill]] %s8703_s4 }
   0x6   :  { %8732 = sst [smem:[#allocation10_spill]] %s8704_s5 }
   0x7   :  { %s8733_s26 = sld [smem:[#allocation7_spill]]  ;;  %s8734_s0 = sld [smem:[#allocation5_spill]]  ;;  %vm75_vm0 = vcmask 130048  }
   0x8   :  { %s8735_s5 = sld [smem:[#allocation8_spill]]  ;;  %s8736_s2 = sld [smem:[#allocation9_spill]] }
   0xd   :  { %v71_v0 = vld [vmem:[%s8733_s26] sm:$0xff]  ;;  %v72_v1 = vld [vmem:[%s8733_s26 + $0x8] sm:$0xff] }
   0xe   :  { %v69_v2 = vld [vmem:[%s8734_s0] sm:$0xff]  ;;  %v7329_v3 = vpack.c.bf16 %v72_v1, %v71_v0  ;;  %v158_v5 = vld [vmem:[%s8735_s5 + $0x8] sm:$0xff] }
   0xf   :  { %6791 = vmatprep.mubr.msk.f32.mxu0 %vm75_vm0, %v69_v2  ;;  %v157_v4 = vld [vmem:[%s8735_s5] sm:$0xff]  ;;  %v251_v8 = vld [vmem:[%s8736_s2 + $0x8] sm:$0xff] }
  0x10   :  { %v7333_v6 = vpack.c.bf16 %v158_v5, %v157_v4  ;;  %v250_v7 = vld [vmem:[%s8736_s2] sm:$0xff]  ;;  %7330 = vmatprep.subr.bf16.mxu0 %v7329_v3 }
  0x11   :  { %v7341_v9 = vpack.c.bf16 %v251_v8, %v250_v7 }
  0x12   :  { %26 = vsyncpa [#allocation3], 0  ;;  %7332 = vmatpush3.bf16.msra.mxu0 %v7329_v3  ;;  %v70_v10 = vld [vmem:[%s8734_s0 + $0x8] sm:$0xff]  ;;  %7334 = vmatprep.subr.bf16.mxu1 %v7333_v6  ;;  %v159_v11 = vld [vmem:[%s8735_s5 + $0x10] sm:$0xff]  ;;  %s8737_s26 = sld [smem:[#allocation10_spill]]  ;;  %s8738_s4 = sld [smem:[#allocation6_spill]] }
  0x13   :  { %7336 = vmatpush3.bf16.msra.mxu1 %v7333_v6  ;;  %7342 = vmatprep.subr.bf16.mxu0 %v7341_v9  ;;  %v160_v12 = vld [vmem:[%s8735_s5 + $0x18] sm:$0xff]  ;;  %v252_v14 = vld [vmem:[%s8736_s2 + $0x10] sm:$0xff]  ;;  %vm168_vm1 = vcmask 261120   ;;  %v7699_v29 = vmov 0.0   ;;  %vm7700_vm2 = vmmov 0   ;;  %vm422_vm3 = vcmask 64512  }
  0x14   :  { %v7337_v13 = vpack.c.bf16 %v160_v12, %v159_v11  ;;  %v253_v15 = vld [vmem:[%s8736_s2 + $0x18] sm:$0xff]  ;;  %v6226_v30 = vld [vmem:[%s8706_s7] ss:$0 sm:$0xff]  ;;  %v6247_v62 = vld [vmem:[%s8736_s2 + $0x28] sm:$0xff]  ;;  %vm2995_vm4 = vcmask 523264   ;;  %vm6131_vm5 = vcmask 1041409  }
  0x15   :  { %6792 = vmatmul.mubr.msk.f32.vlgmr.msra.gmra.mrb[0].mxu0 %vm75_vm0, %v70_v10  ;;  %v7345_v16 = vpack.c.bf16 %v253_v15, %v252_v14  ;;  %v6223_v35 = vld [vmem:[%s8705_s6] ss:$0 sm:$0xff]  ;;  %v6239_v1 = vld [vmem:[%s8735_s5 + $0x28] sm:$0xff]  ;;  %v6248_v5 = vld [vmem:[%s8736_s2 + $0x30] sm:$0xff]  ;;  %vm6205_vm6 = vcmask 9216  }
  0x16   :  { %7344 = vmatpush3.bf16.msra.mxu0 %v7341_v9  ;;  %7338 = vmatprep.subr.bf16.mxu1 %v7337_v13  ;;  %v6229_v39 = vld [vmem:[%s8707_s8] ss:$0 sm:$0xff]  ;;  %v6249_v6 = vld [vmem:[%s8736_s2 + $0x38] sm:$0xff]  ;;  %v6240_v10 = vld [vmem:[%s8735_s5 + $0x30] sm:$0xff] }
  0x17   :  { %7340 = vmatpush3.bf16.msra.mxu1 %v7337_v13  ;;  %7346 = vmatprep.subr.bf16.mxu0 %v7345_v16  ;;  %v6246_v61 = vld [vmem:[%s8736_s2 + $0x20] sm:$0xff]  ;;  %v7369_v9 = vpack.c.bf16 %v6249_v6, %v6248_v5  ;;  %v6241_v11 = vld [vmem:[%s8735_s5 + $0x38] sm:$0xff] }
  0x18   :  { %v336_v17 = vld [vmem:[%s8737_s26] sm:$0xff]  ;;  %v337_v18 = vld [vmem:[%s8737_s26 + $0x8] sm:$0xff]  ;;  %v338_v23 = vld [vmem:[%s8737_s26 + $0x10] sm:$0xff]  ;;  %v7365_v63 = vpack.c.bf16 %v6247_v62, %v6246_v61  ;;  %v7361_v14 = vpack.c.bf16 %v6241_v11, %v6240_v10 }
  0x19   :  { %v7349_v19 = vpack.c.bf16 %v337_v18, %v336_v17  ;;  %v73_v20 = vld [vmem:[%s8738_s4] sm:$0xff]  ;;  %v74_v21 = vld [vmem:[%s8738_s4 + $0x8] sm:$0xff]  ;;  %v339_v24 = vld [vmem:[%s8737_s26 + $0x18] sm:$0xff] }
  0x1a   :  { %7348 = vmatpush3.bf16.msra.mxu0 %v7345_v16  ;;  %v7353_v28 = vpack.c.bf16 %v339_v24, %v338_v23  ;;  %v6238_v0 = vld [vmem:[%s8735_s5 + $0x20] sm:$0xff]  ;;  %v6255_v16 = vld [vmem:[%s8737_s26 + $0x28] sm:$0xff]  ;;  %v6256_v18 = vld [vmem:[%s8737_s26 + $0x30] sm:$0xff] }
  0x1b   :  { %7350 = vmatprep.subr.bf16.mxu1 %v7349_v19  ;;  %6827 = vmatprep.subr.mxu0 %v7699_v29  ;;  %v7357_v2 = vpack.c.bf16 %v6239_v1, %v6238_v0  ;;  %v6254_v15 = vld [vmem:[%s8737_s26 + $0x20] sm:$0xff]  ;;  %v6291_v10 = vld [vmem:[%s8737_s26 + $0x50] sm:$0xff]  ;;  %v6292_v11 = vld [vmem:[%s8737_s26 + $0x58] sm:$0xff] }
  0x1c   :  { %v7373_v17 = vpack.c.bf16 %v6255_v16, %v6254_v15  ;;  %v6281_v16 = vld [vmem:[%s8736_s2 + $0x40] sm:$0xff] }
  0xe8   :  { %v6793_v22 = vpop.f32.mrb[0].mxu0 }
  0xe9   :  { %v148_v25 = vpop.f32.mrb[1].mxu0  ;;  %v7871_v27 = vadd.f32 %v6793_v22, %v74_v21 }
  0xea   :  { %v7869_v26 = vadd.f32 %v148_v25, %v73_v20  ;;  %v6251_v25 = vld [vmem:[%s8706_s7 + $0x1] ss:$0 sm:$0xff] }
  0xec   :  { %6802 = vmatprep.mubr.msk.f32.mxu1 %vm168_vm1, %v7869_v26  ;;  %6813 = vmatprep.mubr.msk.f32.mxu0 %vm168_vm1, %v7869_v26 }
  0xed   :  { %6803 = vmatmul.mubr.msk.f32.vlgmr.msra.gmra.mrb[0].mxu1 %vm168_vm1, %v7871_v27  ;;  %6814 = vmatmul.mubr.msk.f32.vlgmr.msra.gmra.mrb[2].mxu0 %vm168_vm1, %v7871_v27 }
  0xee   :  { %7352 = vmatpush3.bf16.msra.mxu1 %v7349_v19  ;;  %6824 = vmatprep.mubr.msk.f32.mxu1 %vm168_vm1, %v7869_v26  ;;  %v6257_v19 = vld [vmem:[%s8737_s26 + $0x38] sm:$0xff] }
  0xef   :  { %7354 = vmatprep.subr.bf16.mxu1 %v7353_v28  ;;  %6829 = vmatprep.mubr.msk.f32.mxu0 %vm7700_vm2, %v7699_v29  ;;  %v7377_v20 = vpack.c.bf16 %v6257_v19, %v6256_v18 }
  0xf2   :  { %7356 = vmatpush3.bf16.msra.mxu1 %v7353_v28 }
  0xf3   :  { %6837 = vmatprep.subr.mxu1 %v7699_v29 }
  0xf5   :  { %6825 = vmatmul.mubr.msk.f32.vlgmr.msra.gmra.mrb[2].mxu1 %vm168_vm1, %v7871_v27 }
  0xf6   :  { %6839 = vmatprep.mubr.msk.f32.mxu1 %vm7700_vm2, %v7699_v29 }
 0x1c0   :  { %v6804_v31 = vpop.f32.mrb[0].mxu1  ;;  %v6815_v32 = vpop.f32.mrb[2].mxu0 }
 0x1c1   :  { %v241_v33 = vpop.f32.mrb[1].mxu1  ;;  %v327_v34 = vpop.f32.mrb[3].mxu0  ;;  %v333_v38 = vadd.f32 %v6815_v32, %v6226_v30  ;;  %v247_v41 = vadd.f32 %v6804_v31, %v6223_v35  ;;  %v6243_v32 = vld [vmem:[%s8705_s6 + $0x1] ss:$0 sm:$0xff] }
 0x1c2   :  { %v328_v36 = vadd.f32 %v6226_v30, %v327_v34  ;;  %v242_v37 = vadd.f32 %v6223_v35, %v241_v33 }
 0x1c4   :  { %6828 = vmatpush3.xpose.msk.msra.mxu0 %vm422_vm3, %v328_v36 }
 0x1c5   :  { %6832 = vmatprep.subr.mxu0 %v7699_v29 }
 0x1c7   :  { %6830 = vmatmul.mubr.msk.f32.vlgmr.msra.gmra.mrb[4].mxu0 %vm422_vm3, %v242_v37 }
 0x1c8   :  { %v6826_v40 = vpop.f32.mrb[2].mxu1  ;;  %6833 = vmatpush3.xpose.msk.msra.mxu0 %vm422_vm3, %v333_v38  ;;  %6834 = vmatprep.mubr.msk.f32.mxu0 %vm7700_vm2, %v7699_v29  ;;  %v6259_v38 = vld [vmem:[%s8707_s8 + $0x1] ss:$0 sm:$0xff] }
 0x1c9   :  { %v413_v42 = vpop.f32.mrb[3].mxu1  ;;  %6842 = vmatprep.subr.mxu0 %v7699_v29  ;;  %v419_v43 = vadd.f32 %v6826_v40, %v6229_v39 }
 0x1ca   :  { %v414_v44 = vadd.f32 %v6229_v39, %v413_v42 }
 0x1cb   :  { %6835 = vmatmul.mubr.msk.f32.vlgmr.msra.gmra.mrb[6].mxu0 %vm422_vm3, %v247_v41 }
 0x1cc   :  { %6838 = vmatpush3.msra.mxu1 %v414_v44  ;;  %6843 = vmatpush3.msra.mxu0 %v419_v43 }
 0x1cd   :  { %6844 = vmatprep.mubr.msk.f32.mxu0 %vm7700_vm2, %v7699_v29  ;;  %7366 = vmatprep.subr.bf16.mxu0 %v7365_v63 }
 0x1ce   :  { %7358 = vmatprep.subr.bf16.mxu1 %v7357_v2 }
 0x29a   :  { %v495_v45 = vpop.f32.mrb[4].mxu0 }
 0x29b   :  { %v6831_v46 = vpop.f32.mrb[5].mxu0  ;;  %v575_v50 = vsel %vm422_vm3, %v495_v45, -inf }
 0x29e   :  { %v571_v47 = vpop.f32.mrb[6].mxu0 }
 0x29f   :  { %v6836_v48 = vpop.f32.mrb[7].mxu0  ;;  %v578_v49 = vsel %vm422_vm3, %v571_v47, -inf }
 0x2a0   :  { %579 = vmax.xlane.f32.xlu0 %v578_v49 }
 0x2a4   :  { %576 = vmax.xlane.f32.xlu0 %v575_v50 }
 0x32d   :  { %v580_v51 = vpop.xlane.xlu0 %579 }
 0x32e   :  { %v582_v52 = vsub.f32 %v571_v47, %v580_v51 }
 0x330   :  { %v585_v53 = vmul.f32 1.442695, %v582_v52 }
 0x331   :  { %v577_v54 = vpop.xlane.xlu0 %576 }
 0x332   :  { %7595 = vpow2.f32 %v585_v53  ;;  %v581_v55 = vsub.f32 %v495_v45, %v577_v54 }
 0x334   :  { %v583_v56 = vmul.f32 1.442695, %v581_v55 }
 0x336   :  { %7597 = vpow2.f32 %v583_v56 }
 0x33c   :  { %v7596_v57 = vpop.eup %7595 }
 0x33d   :  { %v590_v58 = vsel %vm422_vm3, %v7596_v57, 0.0 }
 0x33e   :  { %591 = vadd.xlane.f32.xlu1 %v590_v58 }
 0x340   :  { %v7598_v59 = vpop.eup %7597 }
 0x341   :  { %v587_v60 = vsel %vm422_vm3, %v7598_v59, 0.0 }
 0x342   :  { %588 = vadd.xlane.f32.xlu1 %v587_v60  ;;  %v6274_v60 = vld [vmem:[%s8735_s5 + $0x48] sm:$0xff] }
 0x3cb   :  { %v592_v3 = vpop.xlane.xlu1 %591 }
 0x3cc   :  { %7599 = vrcp.f32 %v592_v3  ;;  %v6276_v3 = vld [vmem:[%s8735_s5 + $0x58] sm:$0xff] }
 0x3cf   :  { %v589_v4 = vpop.xlane.xlu1 %588 }
 0x3d0   :  { %7601 = vrcp.f32 %v589_v4 }
 0x3d6   :  { %v7600_v7 = vpop.eup %7599 }
 0x3d7   :  { %v596_v8 = vmul.f32 %v7600_v7, %v7596_v57  ;;  %v6289_v7 = vld [vmem:[%s8737_s26 + $0x40] sm:$0xff] }
 0x3d9   :  { %6845 = vmatmul.mubr.msk.f32.vlgmr.msra.gmra.mrb[8].mxu0 %vm422_vm3, %v596_v8  ;;  %v6290_v8 = vld [vmem:[%s8737_s26 + $0x48] sm:$0xff] }
 0x3da   :  { %v7602_v12 = vpop.eup %7601  ;;  %7368 = vmatpush3.bf16.msra.mxu0 %v7365_v63  ;;  %6866 = vmatprep.mubr.msk.f32.mxu0 %vm168_vm1, %v7869_v26 }
 0x3db   :  { %v595_v13 = vmul.f32 %v7602_v12, %v7598_v59  ;;  %7370 = vmatprep.subr.bf16.mxu0 %v7369_v9  ;;  %v6273_v59 = vld [vmem:[%s8735_s5 + $0x40] sm:$0xff]  ;;  %v7401_v12 = vpack.c.bf16 %v6292_v11, %v6291_v10  ;;  %v6324_v11 = vld [vmem:[%s8737_s26 + $0x70] sm:$0xff] }
 0x3dc   :  { %v7381_v61 = vpack.c.bf16 %v6274_v60, %v6273_v59  ;;  %v6306_v59 = vld [vmem:[%s8735_s5 + $0x60] sm:$0xff]  ;;  %v6307_v60 = vld [vmem:[%s8735_s5 + $0x68] sm:$0xff] }
 0x3dd   :  { %6840 = vmatmul.mubr.msk.f32.vlgmr.msra.gmra.mrb[4].mxu1 %vm422_vm3, %v595_v13  ;;  %v6268_v13 = vld [vmem:[%s8708_s9 + $0x8] sm:$0xff] }
 0x3de   :  { %7360 = vmatpush3.bf16.msra.mxu1 %v7357_v2  ;;  %7372 = vmatpush3.bf16.msra.mxu0 %v7369_v9  ;;  %v6275_v2 = vld [vmem:[%s8735_s5 + $0x50] sm:$0xff]  ;;  %v7397_v9 = vpack.c.bf16 %v6290_v8, %v6289_v7  ;;  %v6322_v8 = vld [vmem:[%s8737_s26 + $0x60] sm:$0xff] }
 0x3df   :  { %6855 = vmatprep.mubr.msk.f32.mxu1 %vm168_vm1, %v7869_v26  ;;  %7362 = vmatprep.subr.bf16.mxu1 %v7361_v14  ;;  %v7385_v6 = vpack.c.bf16 %v6276_v3, %v6275_v2  ;;  %v6309_v2 = vld [vmem:[%s8735_s5 + $0x78] sm:$0xff] }
 0x3e0   :  { %6880 = vmatprep.subr.mxu0 %v7699_v29 }
 0x3e1   :  { %6867 = vmatmul.mubr.msk.f32.vlgmr.msra.gmra.mrb[10].mxu0 %vm168_vm1, %v7871_v27 }
 0x3e2   :  { %7364 = vmatpush3.bf16.msra.mxu1 %v7361_v14  ;;  %6882 = vmatprep.mubr.msk.f32.mxu0 %vm7700_vm2, %v7699_v29  ;;  %v743_v14 = vld [vmem:[%s8708_s9] sm:$0xff] }
 0x3e3   :  { %7374 = vmatprep.subr.bf16.mxu1 %v7373_v17 }
 0x3e5   :  { %6856 = vmatmul.mubr.msk.f32.vlgmr.msra.gmra.mrb[6].mxu1 %vm168_vm1, %v7871_v27 }
 0x3e6   :  { %7376 = vmatpush3.bf16.msra.mxu1 %v7373_v17  ;;  %6877 = vmatprep.mubr.msk.f32.mxu1 %vm168_vm1, %v7869_v26  ;;  %v6282_v17 = vld [vmem:[%s8736_s2 + $0x48] sm:$0xff] }
 0x3e7   :  { %7378 = vmatprep.subr.bf16.mxu1 %v7377_v20  ;;  %v7389_v19 = vpack.c.bf16 %v6282_v17, %v6281_v16  ;;  %v6316_v17 = vld [vmem:[%s8736_s2 + $0x70] sm:$0xff] }
 0x3ea   :  { %7380 = vmatpush3.bf16.msra.mxu1 %v7377_v20 }
 0x3eb   :  { %6890 = vmatprep.subr.mxu1 %v7699_v29 }
 0x3ed   :  { %6878 = vmatmul.mubr.msk.f32.vlgmr.msra.gmra.mrb[8].mxu1 %vm168_vm1, %v7871_v27 }
 0x3ee   :  { %6892 = vmatprep.mubr.msk.f32.mxu1 %vm7700_vm2, %v7699_v29 }
 0x4ac   :  { %v7970_v21 = vpop.f32.mrb[8].mxu0 }
 0x4ad   :  { %v6846_v22 = vpop.f32.mrb[9].mxu0 }
 0x4b0   :  { %v7972_v23 = vpop.f32.mrb[4].mxu1 }
 0x4b1   :  { %v6841_v24 = vpop.f32.mrb[5].mxu1 }
 0x4b2   :  { %v6283_v24 = vld [vmem:[%s8736_s2 + $0x50] sm:$0xff] }
 0x4b4   :  { %v6868_v28 = vpop.f32.mrb[10].mxu0 }
 0x4b5   :  { %v911_v30 = vpop.f32.mrb[11].mxu0  ;;  %v917_v36 = vadd.f32 %v6868_v28, %v6251_v25 }
 0x4b6   :  { %v912_v31 = vadd.f32 %v6251_v25, %v911_v30  ;;  %v6284_v25 = vld [vmem:[%s8736_s2 + $0x58] sm:$0xff] }
 0x4b7   :  { %v7393_v28 = vpack.c.bf16 %v6284_v25, %v6283_v24 }
 0x4b8   :  { %v6857_v33 = vpop.f32.mrb[6].mxu1  ;;  %6881 = vmatpush3.xpose.msk.msra.mxu0 %vm422_vm3, %v912_v31 }
 0x4b9   :  { %v823_v34 = vpop.f32.mrb[7].mxu1  ;;  %6885 = vmatprep.subr.mxu0 %v7699_v29  ;;  %v829_v37 = vadd.f32 %v6857_v33, %v6243_v32 }
 0x4ba   :  { %v824_v35 = vadd.f32 %v6243_v32, %v823_v34  ;;  %v6278_v34 = vld [vmem:[%s8705_s6 + $0x2] ss:$0 sm:$0xff] }
 0x4bc   :  { %6883 = vmatmul.mubr.msk.f32.vlgmr.msra.gmra.mrb[12].mxu0 %vm422_vm3, %v824_v35 }
 0x4bd   :  { %6886 = vmatpush3.xpose.msk.msra.mxu0 %vm422_vm3, %v917_v36  ;;  %6887 = vmatprep.mubr.msk.f32.mxu0 %vm7700_vm2, %v7699_v29 }
 0x4be   :  { %6895 = vmatprep.subr.mxu0 %v7699_v29 }
 0x4c0   :  { %v6879_v39 = vpop.f32.mrb[8].mxu1  ;;  %6888 = vmatmul.mubr.msk.f32.vlgmr.msra.gmra.mrb[14].mxu0 %vm422_vm3, %v829_v37  ;;  %v6294_v37 = vld [vmem:[%s8707_s8 + $0x2] ss:$0 sm:$0xff] }
 0x4c1   :  { %v1005_v40 = vadd.f32 %v6879_v39, %v6259_v38  ;;  %v999_v41 = vpop.f32.mrb[9].mxu1  ;;  %6897 = vmatprep.mubr.msk.f32.mxu0 %vm7700_vm2, %v7699_v29 }
 0x4c2   :  { %v1000_v42 = vadd.f32 %v6259_v38, %v999_v41 }
 0x4c3   :  { %6896 = vmatpush3.msra.mxu0 %v1005_v40 }
 0x4c4   :  { %6891 = vmatpush3.msra.mxu1 %v1000_v42  ;;  %7382 = vmatprep.subr.bf16.mxu0 %v7381_v61 }
 0x4c5   :  { %6900 = vmatprep.subr.mxu1 %v6268_v13 }
 0x58f   :  { %v1080_v43 = vpop.f32.mrb[12].mxu0 }
 0x590   :  { %v6884_v44 = vpop.f32.mrb[13].mxu0  ;;  %v1160_v45 = vsel %vm422_vm3, %v1080_v43, -inf }
 0x591   :  { %1161 = vmax.xlane.f32.xlu0 %v1160_v45 }
 0x593   :  { %v1156_v46 = vpop.f32.mrb[14].mxu0 }
 0x594   :  { %v6889_v47 = vpop.f32.mrb[15].mxu0  ;;  %v1163_v48 = vsel %vm422_vm3, %v1156_v46, -inf }
 0x595   :  { %1164 = vmax.xlane.f32.xlu1 %v1163_v48 }
 0x61e   :  { %v1162_v49 = vpop.xlane.xlu0 %1161 }
 0x61f   :  { %v1166_v50 = vsub.f32 %v1080_v43, %v1162_v49 }
 0x621   :  { %v1168_v51 = vmul.f32 1.442695, %v1166_v50 }
 0x622   :  { %v1165_v52 = vpop.xlane.xlu1 %1164 }
 0x623   :  { %7603 = vpow2.f32 %v1168_v51  ;;  %v1167_v53 = vsub.f32 %v1156_v46, %v1165_v52 }
 0x625   :  { %v1170_v54 = vmul.f32 1.442695, %v1167_v53 }
 0x627   :  { %7605 = vpow2.f32 %v1170_v54 }
 0x62d   :  { %v7604_v55 = vpop.eup %7603 }
 0x62e   :  { %v1172_v56 = vsel %vm422_vm3, %v7604_v55, 0.0 }
 0x62f   :  { %1173 = vadd.xlane.f32.xlu0 %v1172_v56 }
 0x631   :  { %v7606_v57 = vpop.eup %7605 }
 0x632   :  { %v1175_v58 = vsel %vm422_vm3, %v7606_v57, 0.0 }
 0x633   :  { %1176 = vadd.xlane.f32.xlu1 %v1175_v58 }
 0x6bc   :  { %v1174_v62 = vpop.xlane.xlu0 %1173 }
 0x6bd   :  { %7607 = vrcp.f32 %v1174_v62  ;;  %v6303_v62 = vld [vmem:[%s8708_s9 + $0x10] sm:$0xff] }
 0x6c0   :  { %v1177_v63 = vpop.xlane.xlu1 %1176 }
 0x6c1   :  { %7609 = vrcp.f32 %v1177_v63 }
 0x6c7   :  { %v7608_v0 = vpop.eup %7607 }
 0x6c8   :  { %v1180_v1 = vmul.f32 %v7608_v0, %v7604_v55 }
 0x6ca   :  { %6893 = vmatmul.mubr.msk.f32.vlgmr.msra.gmra.mrb[10].mxu1 %vm422_vm3, %v1180_v1  ;;  %v6308_v1 = vld [vmem:[%s8735_s5 + $0x70] sm:$0xff] }
 0x6cb   :  { %v7610_v4 = vpop.eup %7609  ;;  %6901 = vmatpush3.msra.mxu1 %v6268_v13 }
 0x6cc   :  { %v1181_v5 = vmul.f32 %v7610_v4, %v7606_v57  ;;  %6905 = vmatprep.subr.mxu1 %v743_v14 }
 0x6ce   :  { %6898 = vmatmul.mubr.msk.f32.vlgmr.msra.gmra.mrb[16].mxu0 %vm422_vm3, %v1181_v5 }
 0x6cf   :  { %7384 = vmatpush3.bf16.msra.mxu0 %v7381_v61  ;;  %6918 = vmatprep.mubr.msk.f32.mxu0 %vm168_vm1, %v7869_v26  ;;  %v7405_v61 = vpack.c.bf16 %v6307_v60, %v6306_v59 }
 0x6d0   :  { %7386 = vmatprep.subr.bf16.mxu0 %v7385_v6 }
 0x6d3   :  { %7388 = vmatpush3.bf16.msra.mxu0 %v7385_v6  ;;  %v7409_v6 = vpack.c.bf16 %v6309_v2, %v6308_v1 }
 0x6d4   :  { %7398 = vmatprep.subr.bf16.mxu0 %v7397_v9 }
 0x6d6   :  { %6919 = vmatmul.mubr.msk.f32.vlgmr.msra.gmra.mrb[18].mxu0 %vm168_vm1, %v7871_v27 }
 0x6d7   :  { %7400 = vmatpush3.bf16.msra.mxu0 %v7397_v9  ;;  %6940 = vmatprep.mubr.msk.f32.mxu0 %vm168_vm1, %v7869_v26  ;;  %v6323_v9 = vld [vmem:[%s8737_s26 + $0x68] sm:$0xff] }
 0x6d8   :  { %7402 = vmatprep.subr.bf16.mxu0 %v7401_v12  ;;  %v7421_v10 = vpack.c.bf16 %v6323_v9, %v6322_v8 }
 0x6db   :  { %7404 = vmatpush3.bf16.msra.mxu0 %v7401_v12  ;;  %v6325_v12 = vld [vmem:[%s8737_s26 + $0x78] sm:$0xff] }
 0x6dc   :  { %6948 = vmatprep.subr.mxu0 %v7699_v29  ;;  %v7425_v13 = vpack.c.bf16 %v6325_v12, %v6324_v11 }
 0x6de   :  { %6941 = vmatmul.mubr.msk.f32.vlgmr.msra.gmra.mrb[20].mxu0 %vm168_vm1, %v7871_v27 }
 0x6df   :  { %6950 = vmatprep.mubr.msk.f32.mxu0 %vm7700_vm2, %v7699_v29 }
 0x79d   :  { %v1251_v15 = vpop.f32.mrb[10].mxu1 }
 0x79e   :  { %v6894_v18 = vpop.f32.mrb[11].mxu1  ;;  %6902 = vmatprep.mubr.msk.f32.mxu1 %vm422_vm3, %v1251_v15  ;;  %v6315_v15 = vld [vmem:[%s8736_s2 + $0x68] sm:$0xff] }
 0x79f   :  { %v6317_v18 = vld [vmem:[%s8736_s2 + $0x78] sm:$0xff] }
 0x7a0   :  { %v7417_v24 = vpack.c.bf16 %v6317_v18, %v6316_v17 }
 0x7a1   :  { %v1324_v20 = vpop.f32.mrb[16].mxu0 }
 0x7a2   :  { %v6899_v22 = vpop.f32.mrb[17].mxu0  ;;  %6903 = vmatmul.mubr.msk.f32.vlgmr.msra.gmra.mrb[12].mxu1 %vm422_vm3, %v1324_v20 }
 0x7a3   :  { %6906 = vmatpush3.msra.mxu1 %v743_v14  ;;  %6907 = vmatprep.mubr.msk.f32.mxu1 %vm422_vm3, %v7972_v23  ;;  %v6314_v14 = vld [vmem:[%s8736_s2 + $0x60] sm:$0xff] }
 0x7a4   :  { %7390 = vmatprep.subr.bf16.mxu1 %v7389_v19  ;;  %v7413_v16 = vpack.c.bf16 %v6315_v15, %v6314_v14 }
 0x7a9   :  { %v6920_v30 = vpop.f32.mrb[18].mxu0 }
 0x7aa   :  { %v1571_v31 = vpop.f32.mrb[19].mxu0  ;;  %6908 = vmatmul.mubr.msk.f32.vlgmr.msra.gmra.mrb[12].mxu1 %vm422_vm3, %v7970_v21  ;;  %v6286_v21 = vld [vmem:[%s8706_s7 + $0x2] ss:$0 sm:$0xff]  ;;  %v1577_v39 = vadd.f32 %v6920_v30, %v6278_v34 }
 0x7ab   :  { %7392 = vmatpush3.bf16.msra.mxu1 %v7389_v19  ;;  %6929 = vmatprep.mubr.msk.f32.mxu1 %vm168_vm1, %v7869_v26  ;;  %v1572_v40 = vadd.f32 %v6278_v34, %v1571_v31  ;;  %v6327_v31 = vld [vmem:[%s8707_s8 + $0x3] ss:$0 sm:$0xff] }
 0x7ac   :  { %7394 = vmatprep.subr.bf16.mxu1 %v7393_v28  ;;  %v6319_v34 = vld [vmem:[%s8706_s7 + $0x3] ss:$0 sm:$0xff] }
 0x7af   :  { %7396 = vmatpush3.bf16.msra.mxu1 %v7393_v28 }
 0x7b0   :  { %6943 = vmatprep.subr.mxu1 %v7699_v29 }
 0x7b1   :  { %v6942_v23 = vpop.f32.mrb[20].mxu0 }
 0x7b2   :  { %6930 = vmatmul.mubr.msk.f32.vlgmr.msra.gmra.mrb[14].mxu1 %vm168_vm1, %v7871_v27  ;;  %v1747_v32 = vpop.f32.mrb[21].mxu0  ;;  %v1753_v41 = vadd.f32 %v6942_v23, %v6294_v37 }
 0x7b3   :  { %6945 = vmatprep.mubr.msk.f32.mxu1 %vm7700_vm2, %v7699_v29  ;;  %v1748_v42 = vadd.f32 %v6294_v37, %v1747_v32  ;;  %v6311_v37 = vld [vmem:[%s8705_s6 + $0x3] ss:$0 sm:$0xff] }
 0x885   :  { %v6931_v33 = vpop.f32.mrb[14].mxu1 }
 0x886   :  { %v1665_v35 = vadd.f32 %v6931_v33, %v6286_v21  ;;  %v1659_v36 = vpop.f32.mrb[15].mxu1 }
 0x887   :  { %v1660_v38 = vadd.f32 %v6286_v21, %v1659_v36 }
 0x888   :  { %6949 = vmatpush3.xpose.msk.msra.mxu0 %vm422_vm3, %v1665_v35 }
 0x889   :  { %6944 = vmatpush3.xpose.msk.msra.mxu1 %vm422_vm3, %v1660_v38  ;;  %6958 = vmatprep.subr.mxu0 %v7699_v29 }
 0x88a   :  { %6953 = vmatprep.subr.mxu1 %v7699_v29 }
 0x88b   :  { %6951 = vmatmul.mubr.msk.f32.vlgmr.msra.gmra.mrb[22].mxu0 %vm422_vm3, %v1577_v39 }
 0x88c   :  { %6946 = vmatmul.mubr.msk.f32.vlgmr.msra.gmra.mrb[16].mxu1 %vm422_vm3, %v1572_v40  ;;  %6959 = vmatpush3.msra.mxu0 %v1753_v41 }
 0x88d   :  { %6954 = vmatpush3.msra.mxu1 %v1748_v42  ;;  %6960 = vmatprep.mubr.msk.f32.mxu0 %vm7700_vm2, %v7699_v29 }
 0x88e   :  { %6955 = vmatprep.mubr.msk.f32.mxu1 %vm7700_vm2, %v7699_v29  ;;  %7406 = vmatprep.subr.bf16.mxu0 %v7405_v61 }
 0x88f   :  { %6963 = vmatprep.subr.mxu1 %v6303_v62 }
 0x95e   :  { %v1904_v43 = vpop.f32.mrb[22].mxu0 }
 0x95f   :  { %v1828_v44 = vpop.f32.mrb[16].mxu1  ;;  %v6952_v45 = vpop.f32.mrb[23].mxu0  ;;  %v1911_v46 = vsel %vm422_vm3, %v1904_v43, -inf }
 0x960   :  { %1912 = vmax.xlane.f32.xlu1 %v1911_v46  ;;  %v6947_v47 = vpop.f32.mrb[17].mxu1  ;;  %v1908_v48 = vsel %vm422_vm3, %v1828_v44, -inf }
 0x961   :  { %1909 = vmax.xlane.f32.xlu0 %v1908_v48 }
 0x9ed   :  { %v1913_v49 = vpop.xlane.xlu1 %1912 }
 0x9ee   :  { %v1915_v50 = vsub.f32 %v1904_v43, %v1913_v49  ;;  %v1910_v51 = vpop.xlane.xlu0 %1909 }
 0x9ef   :  { %v1914_v52 = vsub.f32 %v1828_v44, %v1910_v51 }
 0x9f0   :  { %v1918_v53 = vmul.f32 1.442695, %v1915_v50 }
 0x9f1   :  { %v1916_v54 = vmul.f32 1.442695, %v1914_v52 }
 0x9f2   :  { %7611 = vpow2.f32 %v1918_v53 }
 0x9f3   :  { %7613 = vpow2.f32 %v1916_v54 }
 0x9fc   :  { %v7612_v55 = vpop.eup %7611 }
 0x9fd   :  { %v7614_v56 = vpop.eup %7613  ;;  %v1923_v57 = vsel %vm422_vm3, %v7612_v55, 0.0 }
 0x9fe   :  { %1924 = vadd.xlane.f32.xlu1 %v1923_v57  ;;  %v1920_v58 = vsel %vm422_vm3, %v7614_v56, 0.0 }
 0x9ff   :  { %1921 = vadd.xlane.f32.xlu0 %v1920_v58 }
 0xa8b   :  { %v1925_v63 = vpop.xlane.xlu1 %1924 }
 0xa8c   :  { %7615 = vrcp.f32 %v1925_v63  ;;  %v1922_v0 = vpop.xlane.xlu0 %1921 }
 0xa8d   :  { %7617 = vrcp.f32 %v1922_v0  ;;  %v6336_v0 = vld [vmem:[%s8708_s9 + $0x18] sm:$0xff] }
 0xa96   :  { %v7616_v3 = vpop.eup %7615 }
 0xa97   :  { %v7618_v4 = vpop.eup %7617  ;;  %v1929_v5 = vmul.f32 %v7616_v3, %v7612_v55 }
 0xa98   :  { %v1928_v7 = vmul.f32 %v7618_v4, %v7614_v56 }
 0xa99   :  { %6961 = vmatmul.mubr.msk.f32.vlgmr.msra.gmra.mrb[24].mxu0 %vm422_vm3, %v1929_v5  ;;  %v6339_v5 = vld [vmem:[%s8709_s10] ss:$0 sm:$0xff] }
 0xa9a   :  { %7408 = vmatpush3.bf16.msra.mxu0 %v7405_v61  ;;  %6956 = vmatmul.mubr.msk.f32.vlgmr.msra.gmra.mrb[18].mxu1 %vm422_vm3, %v1928_v7 }
 0xa9b   :  { %6976 = vmatprep.mubr.msk.f32.mxu0 %vm168_vm1, %v7869_v26  ;;  %7410 = vmatprep.subr.bf16.mxu0 %v7409_v6 }
 0xa9c   :  { %6964 = vmatpush3.msra.mxu1 %v6303_v62 }
 0xa9d   :  { %7414 = vmatprep.subr.bf16.mxu1 %v7413_v16 }
 0xa9e   :  { %7412 = vmatpush3.bf16.msra.mxu0 %v7409_v6 }
 0xa9f   :  { %7422 = vmatprep.subr.bf16.mxu0 %v7421_v10 }
 0xaa1   :  { %6977 = vmatmul.mubr.msk.f32.vlgmr.msra.gmra.mrb[26].mxu0 %vm168_vm1, %v7871_v27 }
 0xaa2   :  { %7424 = vmatpush3.bf16.msra.mxu0 %v7421_v10  ;;  %6998 = vmatprep.mubr.msk.f32.mxu0 %vm168_vm1, %v7869_v26 }
 0xaa3   :  { %7426 = vmatprep.subr.bf16.mxu0 %v7425_v13 }
 0xaa6   :  { %7428 = vmatpush3.bf16.msra.mxu0 %v7425_v13 }
 0xaa7   :  { %7011 = vmatprep.subr.mxu0 %v7699_v29 }
 0xaa9   :  { %6999 = vmatmul.mubr.msk.f32.vlgmr.msra.gmra.mrb[28].mxu0 %vm168_vm1, %v7871_v27 }
 0xaaa   :  { %7013 = vmatprep.mubr.msk.f32.mxu0 %vm7700_vm2, %v7699_v29 }
 0xb6c   :  { %v2072_v19 = vpop.f32.mrb[24].mxu0 }
 0xb6d   :  { %v1999_v20 = vpop.f32.mrb[18].mxu1  ;;  %v6962_v22 = vpop.f32.mrb[25].mxu0 }
 0xb6e   :  { %v6957_v25 = vpop.f32.mrb[19].mxu1  ;;  %6965 = vmatprep.mubr.msk.f32.mxu1 %vm422_vm3, %v1999_v20 }
 0xb6f   :  { %6966 = vmatmul.mubr.msk.f32.vlgmr.msra.gmra.mrb[12].mxu1 %vm422_vm3, %v2072_v19  ;;  %v2887_v25 = vld [vmem:[%s8714_s15 + $0x8] sm:$0xff] }
 0xb70   :  { %7416 = vmatpush3.bf16.msra.mxu1 %v7413_v16  ;;  %6987 = vmatprep.mubr.msk.f32.mxu1 %vm168_vm1, %v7869_v26 }
 0xb71   :  { %7418 = vmatprep.subr.bf16.mxu1 %v7417_v24 }
 0xb74   :  { %v6978_v28 = vpop.f32.mrb[26].mxu0  ;;  %7420 = vmatpush3.bf16.msra.mxu1 %v7417_v24 }
 0xb75   :  { %v2240_v30 = vpop.f32.mrb[27].mxu0  ;;  %7001 = vmatprep.subr.mxu1 %v7699_v29  ;;  %v2246_v41 = vadd.f32 %v6978_v28, %v6311_v37 }
 0xb76   :  { %v2241_v39 = vadd.f32 %v6311_v37, %v2240_v30  ;;  %v2888_v30 = vld [vmem:[%s8714_s15 + $0x10] sm:$0xff]  ;;  %v2984_v37 = vld [vmem:[%s8716_s17 + $0x20] sm:$0xff] }
 0xb77   :  { %6988 = vmatmul.mubr.msk.f32.vlgmr.msra.gmra.mrb[20].mxu1 %vm168_vm1, %v7871_v27 }
 0xb78   :  { %7003 = vmatprep.mubr.msk.f32.mxu1 %vm7700_vm2, %v7699_v29 }
 0xb7c   :  { %v7000_v23 = vpop.f32.mrb[28].mxu0 }
 0xb7d   :  { %v2422_v32 = vadd.f32 %v7000_v23, %v6327_v31  ;;  %v2416_v21 = vpop.f32.mrb[29].mxu0 }
 0xb7e   :  { %v2417_v33 = vadd.f32 %v6327_v31, %v2416_v21  ;;  %v2889_v31 = vld [vmem:[%s8714_s15 + $0x18] sm:$0xff]  ;;  %v2981_v21 = vld [vmem:[%s8716_s17 + $0x8] sm:$0xff] }
 0xb7f   :  { %v7433_v23 = vpack.c.bf16 %v2889_v31, %v2888_v30  ;;  %v6352_v30 = vld [vmem:[%s8735_s5 + $0x90] sm:$0xff]  ;;  %v6353_v31 = vld [vmem:[%s8735_s5 + $0x98] sm:$0xff] }
 0xb80   :  { %7012 = vmatpush3.msra.mxu0 %v2417_v33  ;;  %v2982_v33 = vld [vmem:[%s8716_s17 + $0x10] sm:$0xff] }
 0xc4a   :  { %v6989_v35 = vpop.f32.mrb[20].mxu1 }
 0xc4b   :  { %v2328_v36 = vpop.f32.mrb[21].mxu1  ;;  %v2334_v40 = vadd.f32 %v6989_v35, %v6319_v34  ;;  %v2983_v35 = vld [vmem:[%s8716_s17 + $0x18] sm:$0xff] }
 0xc4c   :  { %v2329_v38 = vadd.f32 %v6319_v34, %v2328_v36  ;;  %v7441_v36 = vpack.c.bf16 %v2983_v35, %v2982_v33  ;;  %v6359_v35 = vld [vmem:[%s8736_s2 + $0x88] sm:$0xff] }
 0xc4e   :  { %7002 = vmatpush3.xpose.msk.msra.mxu1 %vm422_vm3, %v2329_v38  ;;  %v2985_v38 = vld [vmem:[%s8716_s17 + $0x28] sm:$0xff] }
 0xc4f   :  { %7006 = vmatprep.subr.mxu1 %v7699_v29 }
 0xc51   :  { %7004 = vmatmul.mubr.msk.f32.vlgmr.msra.gmra.mrb[22].mxu1 %vm422_vm3, %v2241_v39  ;;  %v7445_v39 = vpack.c.bf16 %v2985_v38, %v2984_v37 }
 0xc52   :  { %7007 = vmatpush3.xpose.msk.msra.mxu1 %vm422_vm3, %v2334_v40  ;;  %7008 = vmatprep.mubr.msk.f32.mxu1 %vm7700_vm2, %v7699_v29 }
 0xc53   :  { %7016 = vmatprep.subr.mxu1 %v7699_v29 }
 0xc55   :  { %7009 = vmatmul.mubr.msk.f32.vlgmr.msra.gmra.mrb[24].mxu1 %vm422_vm3, %v2246_v41 }
 0xc56   :  { %7017 = vmatpush3.msra.mxu1 %v2422_v32  ;;  %7018 = vmatprep.mubr.msk.f32.mxu1 %vm7700_vm2, %v7699_v29  ;;  %v2980_v32 = vld [vmem:[%s8716_s17] sm:$0xff] }
 0xc57   :  { %7021 = vmatprep.subr.mxu1 %v6336_v0  ;;  %v7437_v34 = vpack.c.bf16 %v2981_v21, %v2980_v32  ;;  %v6368_v32 = vld [vmem:[%s8737_s26 + $0x90] sm:$0xff]  ;;  %v6369_v21 = vld [vmem:[%s8737_s26 + $0x98] sm:$0xff] }
 0xc58   :  { %v7473_v33 = vpack.c.bf16 %v6369_v21, %v6368_v32  ;;  %v6383_v21 = vld [vmem:[%s8735_s5 + $0xb0] sm:$0xff] }
 0xd24   :  { %v2497_v42 = vpop.f32.mrb[22].mxu1 }
 0xd25   :  { %v7005_v43 = vpop.f32.mrb[23].mxu1  ;;  %v2577_v44 = vsel %vm422_vm3, %v2497_v42, -inf }
 0xd26   :  { %2578 = vmax.xlane.f32.xlu0 %v2577_v44 }
 0xd28   :  { %v2573_v45 = vpop.f32.mrb[24].mxu1 }
 0xd29   :  { %v7010_v46 = vpop.f32.mrb[25].mxu1  ;;  %v2580_v47 = vsel %vm422_vm3, %v2573_v45, -inf }
 0xd2a   :  { %2581 = vmax.xlane.f32.xlu1 %v2580_v47  ;;  %v6340_v47 = vld [vmem:[%s8710_s11] ss:$0 sm:$0xff] }
 0xdb3   :  { %v2579_v48 = vpop.xlane.xlu0 %2578 }
 0xdb4   :  { %v2583_v49 = vsub.f32 %v2497_v42, %v2579_v48 }
 0xdb6   :  { %v2585_v50 = vmul.f32 1.442695, %v2583_v49 }
 0xdb7   :  { %v2582_v51 = vpop.xlane.xlu1 %2581 }
 0xdb8   :  { %7619 = vpow2.f32 %v2585_v50  ;;  %v2584_v52 = vsub.f32 %v2573_v45, %v2582_v51  ;;  %v6341_v51 = vld [vmem:[%s8711_s12] ss:$0 sm:$0xff] }
 0xdba   :  { %v2587_v53 = vmul.f32 1.442695, %v2584_v52 }
 0xdbc   :  { %7621 = vpow2.f32 %v2587_v53 }
 0xdc2   :  { %v7620_v54 = vpop.eup %7619 }
 0xdc3   :  { %v2589_v55 = vsel %vm422_vm3, %v7620_v54, 0.0 }
 0xdc4   :  { %2590 = vadd.xlane.f32.xlu0 %v2589_v55 }
 0xdc6   :  { %v7622_v56 = vpop.eup %7621 }
 0xdc7   :  { %v2592_v57 = vsel %vm422_vm3, %v7622_v56, 0.0 }
 0xdc8   :  { %2593 = vadd.xlane.f32.xlu1 %v2592_v57  ;;  %v2987_v57 = vld [vmem:[%s8716_s17 + $0x38] sm:$0xff] }
 0xe51   :  { %v2591_v58 = vpop.xlane.xlu0 %2590 }
 0xe52   :  { %7623 = vrcp.f32 %v2591_v58 }
 0xe55   :  { %v2594_v59 = vpop.xlane.xlu1 %2593 }
 0xe56   :  { %7625 = vrcp.f32 %v2594_v59  ;;  %v6342_v59 = vld [vmem:[%s8715_s16] ss:$0 sm:$0xff] }
 0xe5c   :  { %v7624_v60 = vpop.eup %7623 }
 0xe5d   :  { %v2597_v61 = vmul.f32 %v7624_v60, %v7620_v54 }
 0xe5f   :  { %7014 = vmatmul.mubr.msk.f32.vlgmr.msra.gmra.mrb[30].mxu0 %vm422_vm3, %v2597_v61 }
 0xe60   :  { %v7626_v62 = vpop.eup %7625 }
 0xe61   :  { %v2598_v63 = vmul.f32 %v7626_v62, %v7622_v56  ;;  %v2986_v56 = vld [vmem:[%s8716_s17 + $0x30] sm:$0xff] }
 0xe62   :  { %v7449_v58 = vpack.c.bf16 %v2987_v57, %v2986_v56  ;;  %v6371_v56 = vld [vmem:[%s8707_s8 + $0x4] ss:$0 sm:$0xff] }
 0xe63   :  { %7019 = vmatmul.mubr.msk.f32.vlgmr.msra.gmra.mrb[26].mxu1 %vm422_vm3, %v2598_v63 }
 0xe64   :  { %7022 = vmatpush3.msra.mxu1 %v6336_v0 }
 0xe65   :  { %7438 = vmatprep.subr.bf16.mxu1 %v7437_v34 }
 0xf32   :  { %v2668_v1 = vpop.f32.mrb[30].mxu0 }
 0xf33   :  { %v7015_v2 = vpop.f32.mrb[31].mxu0  ;;  %7023 = vmatprep.mubr.msk.f32.mxu1 %vm422_vm3, %v2668_v1 }
 0xf34   :  { %v6345_v2 = vld [vmem:[%s8717_s18] ss:$0 sm:$0xff] }
 0xf36   :  { %v2741_v3 = vpop.f32.mrb[26].mxu1 }
 0xf37   :  { %v7020_v4 = vpop.f32.mrb[27].mxu1  ;;  %7024 = vmatmul.mubr.msk.f32.vlgmr.msra.gmra.mrb[12].mxu1 %vm422_vm3, %v2741_v3 }
 0xf38   :  { %7440 = vmatpush3.bf16.msra.mxu1 %v7437_v34  ;;  %v6358_v34 = vld [vmem:[%s8736_s2 + $0x80] sm:$0xff] }
 0xf39   :  { %7442 = vmatprep.subr.bf16.mxu1 %v7441_v36 }
 0xf3c   :  { %7444 = vmatpush3.bf16.msra.mxu1 %v7441_v36  ;;  %v7461_v36 = vpack.c.bf16 %v6359_v35, %v6358_v34 }
 0xf3d   :  { %7446 = vmatprep.subr.bf16.mxu1 %v7445_v39 }
 0xf40   :  { %7448 = vmatpush3.bf16.msra.mxu1 %v7445_v39 }
 0xf41   :  { %7450 = vmatprep.subr.bf16.mxu1 %v7449_v58 }
 0xf44   :  { %7452 = vmatpush3.bf16.msra.mxu1 %v7449_v58 }
0x100a   :  { %v7025_v6 = vpop.f32.mrb[12].mxu1 }
0x100b   :  { %v2838_v7 = vadd.f32 %v7025_v6, %v6339_v5  ;;  %v2819_v8 = vpop.f32.mrb[13].mxu1 }
0x100c   :  { %v2837_v9 = vadd.f32 %v6339_v5, %v2819_v8 }
0x100d   :  { %v2840_v10 = vadd.f32 %v2838_v7, %v7871_v27 }
0x100e   :  { %v2839_v11 = vadd.f32 %v2837_v9, %v7869_v26  ;;  %v2886_v26 = vld [vmem:[%s8714_s15] sm:$0xff] }
0x100f   :  { %v2846_v12 = vsel %vm168_vm1, %v2840_v10, 0.0  ;;  %v7429_v28 = vpack.c.bf16 %v2887_v25, %v2886_v26  ;;  %v6366_v26 = vld [vmem:[%s8737_s26 + $0x80] sm:$0xff]  ;;  %v6367_v25 = vld [vmem:[%s8737_s26 + $0x88] sm:$0xff] }
0x1010   :  { %2847 = vadd.xlane.f32.xlu1 %v2846_v12  ;;  %v2843_v13 = vsel %vm168_vm1, %v2839_v11, 0.0 }
0x1011   :  { %2844 = vadd.xlane.f32.xlu0 %v2843_v13  ;;  %7430 = vmatprep.subr.bf16.mxu0 %v7429_v28 }
0x1012   :  { %7432 = vmatpush3.bf16.msra.mxu0 %v7429_v28  ;;  %v7469_v28 = vpack.c.bf16 %v6367_v25, %v6366_v26  ;;  %v6382_v26 = vld [vmem:[%s8735_s5 + $0xa8] sm:$0xff] }
0x1013   :  { %7434 = vmatprep.subr.bf16.mxu0 %v7433_v23 }
0x1014   :  { %7470 = vmatprep.subr.bf16.mxu1 %v7469_v28 }
0x1016   :  { %7436 = vmatpush3.bf16.msra.mxu0 %v7433_v23  ;;  %v7457_v23 = vpack.c.bf16 %v6353_v31, %v6352_v30  ;;  %v6390_v30 = vld [vmem:[%s8736_s2 + $0xa8] sm:$0xff] }
0x109d   :  { %v2848_v14 = vpop.xlane.xlu1 %2847 }
0x109e   :  { %v2851_v15 = vmul.f32 0.03125, %v2848_v14  ;;  %v2845_v16 = vpop.xlane.xlu0 %2844 }
0x109f   :  { %v2850_v17 = vmul.f32 0.03125, %v2845_v16 }
0x10a0   :  { %v2853_v18 = vsub.f32 %v2840_v10, %v2851_v15 }
0x10a1   :  { %v2852_v19 = vsub.f32 %v2839_v11, %v2850_v17 }
0x10a2   :  { %v2855_v20 = vmul.f32 %v2853_v18, %v2853_v18 }
0x10a3   :  { %v2854_v22 = vmul.f32 %v2852_v19, %v2852_v19 }
0x10a4   :  { %v2859_v24 = vsel %vm168_vm1, %v2855_v20, 0.0 }
0x10a5   :  { %2860 = vadd.xlane.f32.xlu1 %v2859_v24  ;;  %v2856_v27 = vsel %vm168_vm1, %v2854_v22, 0.0  ;;  %v6350_v22 = vld [vmem:[%s8735_s5 + $0x80] sm:$0xff]  ;;  %v6351_v24 = vld [vmem:[%s8735_s5 + $0x88] sm:$0xff] }
0x10a6   :  { %2857 = vadd.xlane.f32.xlu0 %v2856_v27  ;;  %v7453_v27 = vpack.c.bf16 %v6351_v24, %v6350_v22 }
0x10a8   :  { %7454 = vmatprep.subr.bf16.mxu0 %v7453_v27 }
0x1132   :  { %v2861_v40 = vpop.xlane.xlu1 %2860 }
0x1133   :  { %v2863_v41 = vmul.f32 0.03125, %v2861_v40  ;;  %v2858_v42 = vpop.xlane.xlu0 %2857 }
0x1134   :  { %v2862_v43 = vmul.f32 0.03125, %v2858_v42 }
0x1135   :  { %v2865_v44 = vadd.f32 1e-05, %v2863_v41 }
0x1136   :  { %v2864_v45 = vadd.f32 1e-05, %v2862_v43 }
0x1137   :  { %7627 = vrsqrt.f32 %v2865_v44  ;;  %v6348_v44 = vld [vmem:[%s8712_s13] ss:$0 sm:$0xff] }
0x1138   :  { %7629 = vrsqrt.f32 %v2864_v45 }
0x1141   :  { %v7628_v46 = vpop.eup %7627 }
0x1142   :  { %v7630_v48 = vpop.eup %7629  ;;  %v2869_v49 = vmul.f32 %v7628_v46, %v2853_v18 }
0x1143   :  { %v2868_v50 = vmul.f32 %v7630_v48, %v2852_v19  ;;  %v6349_v48 = vld [vmem:[%s8713_s14] ss:$0 sm:$0xff] }
0x1144   :  { %v2877_v52 = vmul.f32 %v6340_v47, %v2869_v49 }
0x1145   :  { %v2876_v53 = vmul.f32 %v6340_v47, %v2868_v50 }
0x1146   :  { %v2885_v55 = vadd.f32 %v6341_v51, %v2877_v52  ;;  %v6361_v52 = vld [vmem:[%s8736_s2 + $0x98] sm:$0xff] }
0x1147   :  { %v2884_v54 = vadd.f32 %v6341_v51, %v2876_v53  ;;  %v6360_v51 = vld [vmem:[%s8736_s2 + $0x90] sm:$0xff] }
0x1149   :  { %7034 = vmatprep.mubr.msk.f32.mxu0 %vm168_vm1, %v2884_v54 }
0x114a   :  { %7035 = vmatmul.mubr.msk.f32.vlgmr.msra.gmra.mrb[32].mxu0 %vm168_vm1, %v2885_v55 }
0x114b   :  { %7456 = vmatpush3.bf16.msra.mxu0 %v7453_v27  ;;  %v6381_v27 = vld [vmem:[%s8735_s5 + $0xa0] sm:$0xff] }
0x114c   :  { %7458 = vmatprep.subr.bf16.mxu0 %v7457_v23  ;;  %v7477_v25 = vpack.c.bf16 %v6382_v26, %v6381_v27 }
0x114f   :  { %7460 = vmatpush3.bf16.msra.mxu0 %v7457_v23 }
0x1150   :  { %7462 = vmatprep.subr.bf16.mxu0 %v7461_v36 }
0x121d   :  { %v7036_v60 = vpop.f32.mrb[32].mxu0 }
0x121e   :  { %v2975_v61 = vadd.f32 %v7036_v60, %v6342_v59  ;;  %v2969_v62 = vpop.f32.mrb[33].mxu0 }
0x121f   :  { %v2970_v63 = vadd.f32 %v6342_v59, %v2969_v62  ;;  %v6363_v62 = vld [vmem:[%s8706_s7 + $0x4] ss:$0 sm:$0xff] }
0x1220   :  { %v2979_v1 = vmax.f32 %v2975_v61, 0.0 }
0x1221   :  { %v2978_v0 = vmax.f32 %v2970_v63, 0.0 }
0x1223   :  { %7053 = vmatprep.mubr.msk.f32.mxu1 %vm2995_vm4, %v2978_v0 }
0x1224   :  { %7054 = vmatmul.mubr.msk.f32.vlgmr.msra.gmra.mrb[28].mxu1 %vm2995_vm4, %v2979_v1  ;;  %v6355_v1 = vld [vmem:[%s8705_s6 + $0x4] ss:$0 sm:$0xff] }
0x1225   :  { %7472 = vmatpush3.bf16.msra.mxu1 %v7469_v28  ;;  %v6389_v28 = vld [vmem:[%s8736_s2 + $0xa0] sm:$0xff] }
0x1226   :  { %7474 = vmatprep.subr.bf16.mxu1 %v7473_v33  ;;  %v7485_v31 = vpack.c.bf16 %v6390_v30, %v6389_v28 }
0x1229   :  { %7476 = vmatpush3.bf16.msra.mxu1 %v7473_v33  ;;  %v6384_v33 = vld [vmem:[%s8735_s5 + $0xb8] sm:$0xff] }
0x122a   :  { %7099 = vmatprep.subr.mxu1 %v7699_v29 }
0x12f7   :  { %v7055_v3 = vpop.f32.mrb[28].mxu1 }
0x12f8   :  { %v3074_v4 = vadd.f32 %v7055_v3, %v6345_v2  ;;  %v3068_v5 = vpop.f32.mrb[29].mxu1 }
0x12f9   :  { %v3069_v6 = vadd.f32 %v6345_v2, %v3068_v5 }
0x12fa   :  { %v3078_v7 = vadd.f32 %v3074_v4, %v2885_v55  ;;  %v7465_v55 = vpack.c.bf16 %v6361_v52, %v6360_v51 }
0x12fb   :  { %v3077_v8 = vadd.f32 %v3069_v6, %v2884_v54 }
0x12fc   :  { %v3084_v9 = vsel %vm168_vm1, %v3078_v7, 0.0 }
0x12fd   :  { %3085 = vadd.xlane.f32.xlu1 %v3084_v9  ;;  %v3081_v10 = vsel %vm168_vm1, %v3077_v8, 0.0 }
0x12fe   :  { %3082 = vadd.xlane.f32.xlu0 %v3081_v10 }
0x138a   :  { %v3086_v11 = vpop.xlane.xlu1 %3085 }
0x138b   :  { %v3088_v12 = vmul.f32 0.03125, %v3086_v11  ;;  %v3083_v13 = vpop.xlane.xlu0 %3082 }
0x138c   :  { %v3087_v14 = vmul.f32 0.03125, %v3083_v13 }
0x138d   :  { %v3090_v15 = vsub.f32 %v3078_v7, %v3088_v12 }
0x138e   :  { %v3089_v16 = vsub.f32 %v3077_v8, %v3087_v14 }
0x138f   :  { %v3092_v17 = vmul.f32 %v3090_v15, %v3090_v15 }
0x1390   :  { %v3091_v18 = vmul.f32 %v3089_v16, %v3089_v16 }
0x1391   :  { %v3096_v19 = vsel %vm168_vm1, %v3092_v17, 0.0 }
0x1392   :  { %3097 = vadd.xlane.f32.xlu1 %v3096_v19  ;;  %v3093_v20 = vsel %vm168_vm1, %v3091_v18, 0.0 }
0x1393   :  { %3094 = vadd.xlane.f32.xlu0 %v3093_v20 }
0x141f   :  { %v3098_v37 = vpop.xlane.xlu1 %3097 }
0x1420   :  { %v3100_v38 = vmul.f32 0.03125, %v3098_v37  ;;  %v3095_v39 = vpop.xlane.xlu0 %3094  ;;  %v6391_v37 = vld [vmem:[%s8736_s2 + $0xb0] sm:$0xff] }
0x1421   :  { %v3099_v40 = vmul.f32 0.03125, %v3095_v39  ;;  %v6397_v39 = vld [vmem:[%s8737_s26 + $0xa0] sm:$0xff] }
0x1422   :  { %v3102_v41 = vadd.f32 1e-05, %v3100_v38  ;;  %v6392_v38 = vld [vmem:[%s8736_s2 + $0xb8] sm:$0xff] }
0x1423   :  { %v3101_v42 = vadd.f32 1e-05, %v3099_v40  ;;  %v6398_v40 = vld [vmem:[%s8737_s26 + $0xa8] sm:$0xff] }
0x1424   :  { %7631 = vrsqrt.f32 %v3102_v41 }
0x1425   :  { %7633 = vrsqrt.f32 %v3101_v42 }
0x142e   :  { %v7632_v43 = vpop.eup %7631 }
0x142f   :  { %v7634_v45 = vpop.eup %7633  ;;  %v3106_v46 = vmul.f32 %v7632_v43, %v3090_v15  ;;  %v7489_v43 = vpack.c.bf16 %v6392_v38, %v6391_v37  ;;  %v6434_v37 = vld [vmem:[%s8737_s26 + $0xd0] sm:$0xff]  ;;  %v6435_v38 = vld [vmem:[%s8737_s26 + $0xd8] sm:$0xff] }
0x1430   :  { %v3105_v47 = vmul.f32 %v7634_v45, %v3089_v16  ;;  %v6399_v45 = vld [vmem:[%s8737_s26 + $0xb0] sm:$0xff] }
0x1431   :  { %v3114_v49 = vmul.f32 %v6348_v44, %v3106_v46  ;;  %v6400_v46 = vld [vmem:[%s8737_s26 + $0xb8] sm:$0xff] }
0x1432   :  { %v3113_v50 = vmul.f32 %v6348_v44, %v3105_v47  ;;  %v7493_v44 = vpack.c.bf16 %v6398_v40, %v6397_v39  ;;  %v7497_v47 = vpack.c.bf16 %v6400_v46, %v6399_v45  ;;  %v7521_v39 = vpack.c.bf16 %v6435_v38, %v6434_v37  ;;  %v6411_v40 = vld [vmem:[%s8708_s9 + $0x28] sm:$0xff]  ;;  %v6467_v38 = vld [vmem:[%s8737_s26 + $0xf0] sm:$0xff] }
0x1433   :  { %v8289_v54 = vadd.f32 %v6349_v48, %v3114_v49 }
0x1434   :  { %v8287_v53 = vadd.f32 %v6349_v48, %v3113_v50 }
0x1436   :  { %7064 = vmatprep.mubr.msk.f32.mxu0 %vm168_vm1, %v8287_v53  ;;  %7086 = vmatprep.mubr.msk.f32.mxu1 %vm168_vm1, %v8287_v53 }
0x1437   :  { %7065 = vmatmul.mubr.msk.f32.vlgmr.msra.gmra.mrb[34].mxu0 %vm168_vm1, %v8289_v54  ;;  %7087 = vmatmul.mubr.msk.f32.vlgmr.msra.gmra.mrb[30].mxu1 %vm168_vm1, %v8289_v54 }
0x1438   :  { %7464 = vmatpush3.bf16.msra.mxu0 %v7461_v36  ;;  %7075 = vmatprep.mubr.msk.f32.mxu0 %vm168_vm1, %v8287_v53  ;;  %v7481_v36 = vpack.c.bf16 %v6384_v33, %v6383_v21 }
0x1439   :  { %7466 = vmatprep.subr.bf16.mxu0 %v7465_v55  ;;  %7101 = vmatprep.mubr.msk.f32.mxu1 %vm7700_vm2, %v7699_v29 }
0x143c   :  { %7468 = vmatpush3.bf16.msra.mxu0 %v7465_v55 }
0x143d   :  { %7089 = vmatprep.subr.mxu0 %v7699_v29 }
0x143f   :  { %7076 = vmatmul.mubr.msk.f32.vlgmr.msra.gmra.mrb[36].mxu0 %vm168_vm1, %v8289_v54 }
0x1440   :  { %7091 = vmatprep.mubr.msk.f32.mxu0 %vm7700_vm2, %v7699_v29 }
0x150a   :  { %v7066_v57 = vpop.f32.mrb[34].mxu0  ;;  %v7088_v58 = vpop.f32.mrb[30].mxu1 }
0x150b   :  { %v3208_v59 = vpop.f32.mrb[35].mxu0  ;;  %v3384_v60 = vpop.f32.mrb[31].mxu1  ;;  %v3214_v5 = vadd.f32 %v7066_v57, %v6355_v1  ;;  %v3390_v6 = vadd.f32 %v7088_v58, %v6371_v56 }
0x150c   :  { %v3385_v61 = vadd.f32 %v6371_v56, %v3384_v60  ;;  %v3209_v3 = vadd.f32 %v6355_v1, %v3208_v59  ;;  %v6394_v56 = vld [vmem:[%s8706_s7 + $0x5] ss:$0 sm:$0xff] }
0x150d   :  { %v6386_v59 = vld [vmem:[%s8705_s6 + $0x5] ss:$0 sm:$0xff] }
0x150e   :  { %7100 = vmatpush3.msra.mxu1 %v3385_v61  ;;  %v6402_v61 = vld [vmem:[%s8707_s8 + $0x5] ss:$0 sm:$0xff] }
0x150f   :  { %7478 = vmatprep.subr.bf16.mxu1 %v7477_v25 }
0x1512   :  { %v7077_v63 = vpop.f32.mrb[36].mxu0 }
0x1513   :  { %v3296_v0 = vpop.f32.mrb[37].mxu0  ;;  %v3302_v4 = vadd.f32 %v7077_v63, %v6363_v62 }
0x1514   :  { %v3297_v2 = vadd.f32 %v6363_v62, %v3296_v0 }
0x1516   :  { %7090 = vmatpush3.xpose.msk.msra.mxu0 %vm422_vm3, %v3297_v2 }
0x1517   :  { %7094 = vmatprep.subr.mxu0 %v7699_v29 }
0x1519   :  { %7092 = vmatmul.mubr.msk.f32.vlgmr.msra.gmra.mrb[38].mxu0 %vm422_vm3, %v3209_v3 }
0x151a   :  { %7095 = vmatpush3.xpose.msk.msra.mxu0 %vm422_vm3, %v3302_v4  ;;  %7096 = vmatprep.mubr.msk.f32.mxu0 %vm7700_vm2, %v7699_v29 }
0x151b   :  { %7104 = vmatprep.subr.mxu0 %v7699_v29 }
0x151d   :  { %7097 = vmatmul.mubr.msk.f32.vlgmr.msra.gmra.mrb[40].mxu0 %vm422_vm3, %v3214_v5 }
0x151e   :  { %7105 = vmatpush3.msra.mxu0 %v3390_v6  ;;  %7106 = vmatprep.mubr.msk.f32.mxu0 %vm7700_vm2, %v7699_v29 }
0x151f   :  { %7486 = vmatprep.subr.bf16.mxu0 %v7485_v31 }
0x15ec   :  { %v3465_v7 = vpop.f32.mrb[38].mxu0 }
0x15ed   :  { %v7093_v8 = vpop.f32.mrb[39].mxu0  ;;  %v3545_v9 = vsel %vm422_vm3, %v3465_v7, -inf }
0x15ee   :  { %3546 = vmax.xlane.f32.xlu1 %v3545_v9 }
0x15f0   :  { %v3541_v10 = vpop.f32.mrb[40].mxu0 }
0x15f1   :  { %v7098_v11 = vpop.f32.mrb[41].mxu0  ;;  %v3548_v12 = vsel %vm422_vm3, %v3541_v10, -inf }
0x15f2   :  { %3549 = vmax.xlane.f32.xlu0 %v3548_v12 }
0x167b   :  { %v3547_v13 = vpop.xlane.xlu1 %3546 }
0x167c   :  { %v3551_v14 = vsub.f32 %v3465_v7, %v3547_v13 }
0x167e   :  { %v3553_v15 = vmul.f32 1.442695, %v3551_v14 }
0x167f   :  { %v3550_v16 = vpop.xlane.xlu0 %3549 }
0x1680   :  { %7635 = vpow2.f32 %v3553_v15  ;;  %v3552_v17 = vsub.f32 %v3541_v10, %v3550_v16 }
0x1682   :  { %v3555_v18 = vmul.f32 1.442695, %v3552_v17 }
0x1684   :  { %7637 = vpow2.f32 %v3555_v18 }
0x168a   :  { %v7636_v19 = vpop.eup %7635 }
0x168b   :  { %v3557_v20 = vsel %vm422_vm3, %v7636_v19, 0.0 }
0x168c   :  { %3558 = vadd.xlane.f32.xlu1 %v3557_v20 }
0x168e   :  { %v7638_v22 = vpop.eup %7637 }
0x168f   :  { %v3560_v24 = vsel %vm422_vm3, %v7638_v22, 0.0 }
0x1690   :  { %3561 = vadd.xlane.f32.xlu0 %v3560_v24  ;;  %v6417_v24 = vld [vmem:[%s8735_s5 + $0xc8] sm:$0xff] }
0x1719   :  { %v3559_v23 = vpop.xlane.xlu1 %3558 }
0x171a   :  { %7639 = vrcp.f32 %v3559_v23  ;;  %v6419_v23 = vld [vmem:[%s8735_s5 + $0xd8] sm:$0xff] }
0x171d   :  { %v3562_v32 = vpop.xlane.xlu0 %3561 }
0x171e   :  { %7641 = vrcp.f32 %v3562_v32 }
0x1724   :  { %v7640_v34 = vpop.eup %7639 }
0x1725   :  { %v3565_v35 = vmul.f32 %v7640_v34, %v7636_v19  ;;  %v6432_v34 = vld [vmem:[%s8737_s26 + $0xc0] sm:$0xff] }
0x1727   :  { %7102 = vmatmul.mubr.msk.f32.vlgmr.msra.gmra.mrb[32].mxu1 %vm422_vm3, %v3565_v35  ;;  %v6433_v35 = vld [vmem:[%s8737_s26 + $0xc8] sm:$0xff] }
0x1728   :  { %v7642_v41 = vpop.eup %7641  ;;  %7480 = vmatpush3.bf16.msra.mxu1 %v7477_v25  ;;  %7117 = vmatprep.mubr.msk.f32.mxu1 %vm168_vm1, %v8287_v53 }
0x1729   :  { %v3566_v42 = vmul.f32 %v7642_v41, %v7638_v22  ;;  %7482 = vmatprep.subr.bf16.mxu1 %v7481_v36  ;;  %v6416_v22 = vld [vmem:[%s8735_s5 + $0xc0] sm:$0xff] }
0x172a   :  { %v7501_v27 = vpack.c.bf16 %v6417_v24, %v6416_v22  ;;  %v6380_v41 = vld [vmem:[%s8708_s9 + $0x20] sm:$0xff]  ;;  %v6450_v24 = vld [vmem:[%s8735_s5 + $0xe8] sm:$0xff] }
0x172b   :  { %7107 = vmatmul.mubr.msk.f32.vlgmr.msra.gmra.mrb[42].mxu0 %vm422_vm3, %v3566_v42  ;;  %v6449_v22 = vld [vmem:[%s8735_s5 + $0xe0] sm:$0xff] }
0x172c   :  { %7484 = vmatpush3.bf16.msra.mxu1 %v7481_v36  ;;  %7488 = vmatpush3.bf16.msra.mxu0 %v7485_v31  ;;  %v6418_v31 = vld [vmem:[%s8735_s5 + $0xd0] sm:$0xff]  ;;  %v7517_v36 = vpack.c.bf16 %v6433_v35, %v6432_v34  ;;  %v6465_v35 = vld [vmem:[%s8737_s26 + $0xe0] sm:$0xff] }
0x172d   :  { %7128 = vmatprep.mubr.msk.f32.mxu0 %vm168_vm1, %v8287_v53  ;;  %7490 = vmatprep.subr.bf16.mxu0 %v7489_v43  ;;  %v7505_v33 = vpack.c.bf16 %v6419_v23, %v6418_v31  ;;  %v6452_v31 = vld [vmem:[%s8735_s5 + $0xf8] sm:$0xff] }
0x172e   :  { %7494 = vmatprep.subr.bf16.mxu1 %v7493_v44 }
0x172f   :  { %7118 = vmatmul.mubr.msk.f32.vlgmr.msra.gmra.mrb[34].mxu1 %vm168_vm1, %v8289_v54 }
0x1730   :  { %7492 = vmatpush3.bf16.msra.mxu0 %v7489_v43  ;;  %7496 = vmatpush3.bf16.msra.mxu1 %v7493_v44  ;;  %v6424_v43 = vld [vmem:[%s8736_s2 + $0xc0] sm:$0xff]  ;;  %v6425_v44 = vld [vmem:[%s8736_s2 + $0xc8] sm:$0xff] }
0x1731   :  { %7139 = vmatprep.mubr.msk.f32.mxu1 %vm168_vm1, %v8287_v53  ;;  %7498 = vmatprep.subr.bf16.mxu1 %v7497_v47  ;;  %v7509_v46 = vpack.c.bf16 %v6425_v44, %v6424_v43  ;;  %v6459_v44 = vld [vmem:[%s8736_s2 + $0xf0] sm:$0xff] }
0x1732   :  { %7142 = vmatprep.subr.mxu0 %v7699_v29 }
0x1733   :  { %7129 = vmatmul.mubr.msk.f32.vlgmr.msra.gmra.mrb[44].mxu0 %vm168_vm1, %v8289_v54 }
0x1734   :  { %7500 = vmatpush3.bf16.msra.mxu1 %v7497_v47  ;;  %7144 = vmatprep.mubr.msk.f32.mxu0 %vm7700_vm2, %v7699_v29 }
0x1735   :  { %7152 = vmatprep.subr.mxu1 %v7699_v29 }
0x1737   :  { %7140 = vmatmul.mubr.msk.f32.vlgmr.msra.gmra.mrb[36].mxu1 %vm168_vm1, %v8289_v54 }
0x1738   :  { %7154 = vmatprep.mubr.msk.f32.mxu1 %vm7700_vm2, %v7699_v29 }
0x17fa   :  { %v8387_v48 = vpop.f32.mrb[32].mxu1 }
0x17fb   :  { %v7103_v49 = vpop.f32.mrb[33].mxu1 }
0x17fe   :  { %v8389_v50 = vpop.f32.mrb[42].mxu0 }
0x17ff   :  { %v7108_v51 = vpop.f32.mrb[43].mxu0 }
0x1800   :  { %v6426_v51 = vld [vmem:[%s8736_s2 + $0xd0] sm:$0xff] }
0x1802   :  { %v7119_v52 = vpop.f32.mrb[34].mxu1 }
0x1803   :  { %v3794_v55 = vpop.f32.mrb[35].mxu1  ;;  %v3800_v3 = vadd.f32 %v7119_v52, %v6386_v59  ;;  %v6427_v52 = vld [vmem:[%s8736_s2 + $0xd8] sm:$0xff] }
0x1804   :  { %v3795_v63 = vadd.f32 %v6386_v59, %v3794_v55  ;;  %v7513_v55 = vpack.c.bf16 %v6427_v52, %v6426_v51 }
0x1806   :  { %v7130_v57 = vpop.f32.mrb[44].mxu0 }
0x1807   :  { %v3882_v58 = vpop.f32.mrb[45].mxu0  ;;  %v3888_v1 = vadd.f32 %v7130_v57, %v6394_v56 }
0x1808   :  { %v3883_v60 = vadd.f32 %v6394_v56, %v3882_v58 }
0x180a   :  { %v7141_v62 = vpop.f32.mrb[36].mxu1  ;;  %7143 = vmatpush3.xpose.msk.msra.mxu0 %vm422_vm3, %v3883_v60  ;;  %v6421_v60 = vld [vmem:[%s8705_s6 + $0x6] ss:$0 sm:$0xff] }
0x180b   :  { %v3970_v0 = vpop.f32.mrb[37].mxu1  ;;  %7147 = vmatprep.subr.mxu0 %v7699_v29  ;;  %v3976_v4 = vadd.f32 %v7141_v62, %v6402_v61 }
0x180c   :  { %v3971_v2 = vadd.f32 %v6402_v61, %v3970_v0 }
0x180d   :  { %7145 = vmatmul.mubr.msk.f32.vlgmr.msra.gmra.mrb[46].mxu0 %vm422_vm3, %v3795_v63  ;;  %v6437_v63 = vld [vmem:[%s8707_s8 + $0x6] ss:$0 sm:$0xff] }
0x180e   :  { %7148 = vmatpush3.xpose.msk.msra.mxu0 %vm422_vm3, %v3888_v1  ;;  %7153 = vmatpush3.msra.mxu1 %v3971_v2 }
0x180f   :  { %7149 = vmatprep.mubr.msk.f32.mxu0 %vm7700_vm2, %v7699_v29  ;;  %7157 = vmatprep.subr.mxu0 %v7699_v29 }
0x1810   :  { %7162 = vmatprep.subr.mxu1 %v6411_v40 }
0x1811   :  { %7150 = vmatmul.mubr.msk.f32.vlgmr.msra.gmra.mrb[48].mxu0 %vm422_vm3, %v3800_v3 }
0x1812   :  { %7158 = vmatpush3.msra.mxu0 %v3976_v4  ;;  %7159 = vmatprep.mubr.msk.f32.mxu0 %vm7700_vm2, %v7699_v29 }
0x1813   :  { %7502 = vmatprep.subr.bf16.mxu0 %v7501_v27 }
0x18e0   :  { %v4051_v5 = vpop.f32.mrb[46].mxu0 }
0x18e1   :  { %v7146_v6 = vpop.f32.mrb[47].mxu0  ;;  %v4131_v7 = vsel %vm422_vm3, %v4051_v5, -inf }
0x18e2   :  { %4132 = vmax.xlane.f32.xlu0 %v4131_v7 }
0x18e4   :  { %v4127_v8 = vpop.f32.mrb[48].mxu0 }
0x18e5   :  { %v7151_v9 = vpop.f32.mrb[49].mxu0  ;;  %v4134_v10 = vsel %vm422_vm3, %v4127_v8, -inf }
0x18e6   :  { %4135 = vmax.xlane.f32.xlu1 %v4134_v10 }
0x196f   :  { %v4133_v11 = vpop.xlane.xlu0 %4132 }
0x1970   :  { %v4137_v12 = vsub.f32 %v4051_v5, %v4133_v11 }
0x1972   :  { %v4139_v13 = vmul.f32 1.442695, %v4137_v12 }
0x1973   :  { %v4136_v14 = vpop.xlane.xlu1 %4135 }
0x1974   :  { %7643 = vpow2.f32 %v4139_v13  ;;  %v4138_v15 = vsub.f32 %v4127_v8, %v4136_v14 }
0x1976   :  { %v4141_v16 = vmul.f32 1.442695, %v4138_v15 }
0x1978   :  { %7645 = vpow2.f32 %v4141_v16 }
0x197e   :  { %v7644_v17 = vpop.eup %7643 }
0x197f   :  { %v4143_v18 = vsel %vm422_vm3, %v7644_v17, 0.0 }
0x1980   :  { %4144 = vadd.xlane.f32.xlu0 %v4143_v18 }
0x1982   :  { %v7646_v19 = vpop.eup %7645 }
0x1983   :  { %v4146_v20 = vsel %vm422_vm3, %v7646_v19, 0.0 }
0x1984   :  { %4147 = vadd.xlane.f32.xlu1 %v4146_v20 }
0x1a0d   :  { %v4145_v26 = vpop.xlane.xlu0 %4144 }
0x1a0e   :  { %7647 = vrcp.f32 %v4145_v26  ;;  %v6446_v26 = vld [vmem:[%s8708_s9 + $0x30] sm:$0xff] }
0x1a11   :  { %v4148_v25 = vpop.xlane.xlu1 %4147 }
0x1a12   :  { %7649 = vrcp.f32 %v4148_v25 }
0x1a18   :  { %v7648_v28 = vpop.eup %7647 }
0x1a19   :  { %v4151_v30 = vmul.f32 %v7648_v28, %v7644_v17 }
0x1a1b   :  { %7155 = vmatmul.mubr.msk.f32.vlgmr.msra.gmra.mrb[38].mxu1 %vm422_vm3, %v4151_v30  ;;  %v6451_v30 = vld [vmem:[%s8735_s5 + $0xf0] sm:$0xff] }
0x1a1c   :  { %v7650_v32 = vpop.eup %7649  ;;  %7163 = vmatpush3.msra.mxu1 %v6411_v40 }
0x1a1d   :  { %v4152_v21 = vmul.f32 %v7650_v32, %v7646_v19  ;;  %7167 = vmatprep.subr.mxu1 %v6380_v41 }
0x1a1f   :  { %7160 = vmatmul.mubr.msk.f32.vlgmr.msra.gmra.mrb[50].mxu0 %vm422_vm3, %v4152_v21 }
0x1a20   :  { %7504 = vmatpush3.bf16.msra.mxu0 %v7501_v27  ;;  %7180 = vmatprep.mubr.msk.f32.mxu0 %vm168_vm1, %v8287_v53  ;;  %v7525_v27 = vpack.c.bf16 %v6450_v24, %v6449_v22 }
0x1a21   :  { %7506 = vmatprep.subr.bf16.mxu0 %v7505_v33 }
0x1a24   :  { %7508 = vmatpush3.bf16.msra.mxu0 %v7505_v33  ;;  %v7529_v33 = vpack.c.bf16 %v6452_v31, %v6451_v30 }
0x1a25   :  { %7518 = vmatprep.subr.bf16.mxu0 %v7517_v36 }
0x1a27   :  { %7181 = vmatmul.mubr.msk.f32.vlgmr.msra.gmra.mrb[52].mxu0 %vm168_vm1, %v8289_v54 }
0x1a28   :  { %7520 = vmatpush3.bf16.msra.mxu0 %v7517_v36  ;;  %7202 = vmatprep.mubr.msk.f32.mxu0 %vm168_vm1, %v8287_v53  ;;  %v6466_v36 = vld [vmem:[%s8737_s26 + $0xe8] sm:$0xff] }
0x1a29   :  { %7522 = vmatprep.subr.bf16.mxu0 %v7521_v39  ;;  %v7541_v37 = vpack.c.bf16 %v6466_v36, %v6465_v35 }
0x1a2c   :  { %7524 = vmatpush3.bf16.msra.mxu0 %v7521_v39  ;;  %v6468_v39 = vld [vmem:[%s8737_s26 + $0xf8] sm:$0xff] }
0x1a2d   :  { %7210 = vmatprep.subr.mxu0 %v7699_v29  ;;  %v7545_v40 = vpack.c.bf16 %v6468_v39, %v6467_v38 }
0x1a2f   :  { %7203 = vmatmul.mubr.msk.f32.vlgmr.msra.gmra.mrb[54].mxu0 %vm168_vm1, %v8289_v54 }
0x1a30   :  { %7212 = vmatprep.mubr.msk.f32.mxu0 %vm7700_vm2, %v7699_v29 }
0x1aee   :  { %v4222_v42 = vpop.f32.mrb[38].mxu1 }
0x1aef   :  { %v7156_v45 = vpop.f32.mrb[39].mxu1  ;;  %7164 = vmatprep.mubr.msk.f32.mxu1 %vm422_vm3, %v4222_v42  ;;  %v6458_v42 = vld [vmem:[%s8736_s2 + $0xe8] sm:$0xff] }
0x1af0   :  { %v6460_v45 = vld [vmem:[%s8736_s2 + $0xf8] sm:$0xff] }
0x1af1   :  { %v7537_v51 = vpack.c.bf16 %v6460_v45, %v6459_v44 }
0x1af2   :  { %v4295_v47 = vpop.f32.mrb[50].mxu0 }
0x1af3   :  { %v7161_v49 = vpop.f32.mrb[51].mxu0  ;;  %7165 = vmatmul.mubr.msk.f32.vlgmr.msra.gmra.mrb[40].mxu1 %vm422_vm3, %v4295_v47 }
0x1af4   :  { %7168 = vmatpush3.msra.mxu1 %v6380_v41  ;;  %7169 = vmatprep.mubr.msk.f32.mxu1 %vm422_vm3, %v8387_v48  ;;  %v6457_v41 = vld [vmem:[%s8736_s2 + $0xe0] sm:$0xff] }
0x1af5   :  { %7510 = vmatprep.subr.bf16.mxu1 %v7509_v46  ;;  %v7533_v43 = vpack.c.bf16 %v6458_v42, %v6457_v41 }
0x1afa   :  { %v7182_v56 = vpop.f32.mrb[52].mxu0 }
0x1afb   :  { %v4542_v57 = vpop.f32.mrb[53].mxu0  ;;  %7170 = vmatmul.mubr.msk.f32.vlgmr.msra.gmra.mrb[40].mxu1 %vm422_vm3, %v8389_v50  ;;  %v6429_v50 = vld [vmem:[%s8706_s7 + $0x6] ss:$0 sm:$0xff]  ;;  %v4548_v1 = vadd.f32 %v7182_v56, %v6421_v60 }
0x1afc   :  { %7512 = vmatpush3.bf16.msra.mxu1 %v7509_v46  ;;  %7191 = vmatprep.mubr.msk.f32.mxu1 %vm168_vm1, %v8287_v53  ;;  %v4543_v2 = vadd.f32 %v6421_v60, %v4542_v57  ;;  %v6470_v57 = vld [vmem:[%s8707_s8 + $0x7] ss:$0 sm:$0xff] }
0x1afd   :  { %7514 = vmatprep.subr.bf16.mxu1 %v7513_v55  ;;  %v6462_v60 = vld [vmem:[%s8706_s7 + $0x7] ss:$0 sm:$0xff] }
0x1b00   :  { %7516 = vmatpush3.bf16.msra.mxu1 %v7513_v55 }
0x1b01   :  { %7205 = vmatprep.subr.mxu1 %v7699_v29 }
0x1b02   :  { %v7204_v48 = vpop.f32.mrb[54].mxu0 }
0x1b03   :  { %7192 = vmatmul.mubr.msk.f32.vlgmr.msra.gmra.mrb[42].mxu1 %vm168_vm1, %v8289_v54  ;;  %v4718_v58 = vpop.f32.mrb[55].mxu0  ;;  %v4724_v3 = vadd.f32 %v7204_v48, %v6437_v63 }
0x1b04   :  { %7207 = vmatprep.mubr.msk.f32.mxu1 %vm7700_vm2, %v7699_v29  ;;  %v4719_v4 = vadd.f32 %v6437_v63, %v4718_v58  ;;  %v6454_v63 = vld [vmem:[%s8705_s6 + $0x7] ss:$0 sm:$0xff]  ;;  %s7702_s6 = smov [#allocation2]  }
0x1b05   :  { %s6213_s7 = sshll.u32 %s7702_s6, 4  ;;  %s6214_s7 = int_to_ptr.vmem [resolvable:$true] %s6213_s7 }
0x1b06   :  { %s7675_s8 = scalar_lea.vmem %s6214_s7, 32  ;;  %p7680_p1 = scmp.lt.s32.totalorder %s6214_s7, %s6214_s7 }
0x1b07   :  { %p7676_p0 = scmp.ne.s32.totalorder %s6214_s7, %s7675_s8  ;;  %p7681_p2 = scmp.lt.s32.totalorder %s7675_s8, %s7675_s8 }
0x1b09   :  { %p7682_p3 = por %p7681_p2, %p7680_p1 }
0x1b0b   :  { %p7683_p4 = pnand %p7682_p3, %p7676_p0 }
0x1bd6   :  { %v7193_v59 = vpop.f32.mrb[42].mxu1 }
0x1bd7   :  { %v4636_v61 = vadd.f32 %v7193_v59, %v6429_v50  ;;  %v4630_v62 = vpop.f32.mrb[43].mxu1 }
0x1bd8   :  { %v4631_v0 = vadd.f32 %v6429_v50, %v4630_v62 }
0x1bd9   :  { %7211 = vmatpush3.xpose.msk.msra.mxu0 %vm422_vm3, %v4636_v61 }
0x1bda   :  { %7206 = vmatpush3.xpose.msk.msra.mxu1 %vm422_vm3, %v4631_v0  ;;  %7220 = vmatprep.subr.mxu0 %v7699_v29 }
0x1bdb   :  { %7215 = vmatprep.subr.mxu1 %v7699_v29 }
0x1bdc   :  { %7213 = vmatmul.mubr.msk.f32.vlgmr.msra.gmra.mrb[56].mxu0 %vm422_vm3, %v4548_v1 }
0x1bdd   :  { %7208 = vmatmul.mubr.msk.f32.vlgmr.msra.gmra.mrb[44].mxu1 %vm422_vm3, %v4543_v2  ;;  %7221 = vmatpush3.msra.mxu0 %v4724_v3 }
0x1bde   :  { %7216 = vmatpush3.msra.mxu1 %v4719_v4  ;;  %7222 = vmatprep.mubr.msk.f32.mxu0 %vm7700_vm2, %v7699_v29 }
0x1bdf   :  { %7217 = vmatprep.mubr.msk.f32.mxu1 %vm7700_vm2, %v7699_v29  ;;  %7526 = vmatprep.subr.bf16.mxu0 %v7525_v27 }
0x1be0   :  { %7225 = vmatprep.subr.mxu1 %v6446_v26 }
0x1caf   :  { %v4875_v5 = vpop.f32.mrb[56].mxu0 }
0x1cb0   :  { %v4799_v6 = vpop.f32.mrb[44].mxu1  ;;  %v7214_v7 = vpop.f32.mrb[57].mxu0  ;;  %v4882_v8 = vsel %vm422_vm3, %v4875_v5, -inf }
0x1cb1   :  { %4883 = vmax.xlane.f32.xlu1 %v4882_v8  ;;  %v7209_v9 = vpop.f32.mrb[45].mxu1  ;;  %v4879_v10 = vsel %vm422_vm3, %v4799_v6, -inf }
0x1cb2   :  { %4880 = vmax.xlane.f32.xlu0 %v4879_v10 }
0x1d3e   :  { %v4884_v11 = vpop.xlane.xlu1 %4883 }
0x1d3f   :  { %v4886_v12 = vsub.f32 %v4875_v5, %v4884_v11  ;;  %v4881_v13 = vpop.xlane.xlu0 %4880 }
0x1d40   :  { %v4885_v14 = vsub.f32 %v4799_v6, %v4881_v13 }
0x1d41   :  { %v4889_v15 = vmul.f32 1.442695, %v4886_v12 }
0x1d42   :  { %v4887_v16 = vmul.f32 1.442695, %v4885_v14 }
0x1d43   :  { %7651 = vpow2.f32 %v4889_v15 }
0x1d44   :  { %7653 = vpow2.f32 %v4887_v16 }
0x1d4d   :  { %v7652_v17 = vpop.eup %7651 }
0x1d4e   :  { %v7654_v18 = vpop.eup %7653  ;;  %v4894_v19 = vsel %vm422_vm3, %v7652_v17, 0.0 }
0x1d4f   :  { %4895 = vadd.xlane.f32.xlu1 %v4894_v19  ;;  %v4891_v20 = vsel %vm422_vm3, %v7654_v18, 0.0 }
0x1d50   :  { %4892 = vadd.xlane.f32.xlu0 %v4891_v20 }
0x1ddc   :  { %v4896_v25 = vpop.xlane.xlu1 %4895 }
0x1ddd   :  { %7655 = vrcp.f32 %v4896_v25  ;;  %v4893_v28 = vpop.xlane.xlu0 %4892 }
0x1dde   :  { %7657 = vrcp.f32 %v4893_v28  ;;  %v6479_v28 = vld [vmem:[%s8708_s9 + $0x38] sm:$0xff] }
0x1de7   :  { %v7656_v23 = vpop.eup %7655 }
0x1de8   :  { %v7658_v32 = vpop.eup %7657  ;;  %v4900_v21 = vmul.f32 %v7656_v23, %v7652_v17 }
0x1de9   :  { %v4899_v34 = vmul.f32 %v7658_v32, %v7654_v18 }
0x1dea   :  { %7223 = vmatmul.mubr.msk.f32.vlgmr.msra.gmra.mrb[58].mxu0 %vm422_vm3, %v4900_v21  ;;  %v6483_v21 = vld [vmem:[%s8709_s10 + $0x1] ss:$0 sm:$0xff] }
0x1deb   :  { %7528 = vmatpush3.bf16.msra.mxu0 %v7525_v27  ;;  %7218 = vmatmul.mubr.msk.f32.vlgmr.msra.gmra.mrb[46].mxu1 %vm422_vm3, %v4899_v34 }
0x1dec   :  { %7238 = vmatprep.mubr.msk.f32.mxu0 %vm168_vm1, %v8287_v53  ;;  %7530 = vmatprep.subr.bf16.mxu0 %v7529_v33 }
0x1ded   :  { %7226 = vmatpush3.msra.mxu1 %v6446_v26 }
0x1dee   :  { %7534 = vmatprep.subr.bf16.mxu1 %v7533_v43 }
0x1def   :  { %7532 = vmatpush3.bf16.msra.mxu0 %v7529_v33 }
0x1df0   :  { %7542 = vmatprep.subr.bf16.mxu0 %v7541_v37 }
0x1df2   :  { %7239 = vmatmul.mubr.msk.f32.vlgmr.msra.gmra.mrb[60].mxu0 %vm168_vm1, %v8289_v54 }
0x1df3   :  { %7544 = vmatpush3.bf16.msra.mxu0 %v7541_v37  ;;  %7260 = vmatprep.mubr.msk.f32.mxu0 %vm168_vm1, %v8287_v53 }
0x1df4   :  { %7546 = vmatprep.subr.bf16.mxu0 %v7545_v40 }
0x1df7   :  { %7548 = vmatpush3.bf16.msra.mxu0 %v7545_v40 }
0x1df8   :  { %7273 = vmatprep.subr.mxu0 %v7699_v29 }
0x1dfa   :  { %7261 = vmatmul.mubr.msk.f32.vlgmr.msra.gmra.mrb[62].mxu0 %vm168_vm1, %v8289_v54 }
0x1dfb   :  { %7275 = vmatprep.mubr.msk.f32.mxu0 %vm7700_vm2, %v7699_v29 }
0x1ebd   :  { %v5043_v46 = vpop.f32.mrb[58].mxu0 }
0x1ebe   :  { %v4970_v47 = vpop.f32.mrb[46].mxu1  ;;  %v7224_v49 = vpop.f32.mrb[59].mxu0 }
0x1ebf   :  { %v7219_v52 = vpop.f32.mrb[47].mxu1  ;;  %7227 = vmatprep.mubr.msk.f32.mxu1 %vm422_vm3, %v4970_v47 }
0x1ec0   :  { %7228 = vmatmul.mubr.msk.f32.vlgmr.msra.gmra.mrb[40].mxu1 %vm422_vm3, %v5043_v46  ;;  %v6489_v52 = vld [vmem:[%s8714_s15 + $0x28] sm:$0xff] }
0x1ec1   :  { %7536 = vmatpush3.bf16.msra.mxu1 %v7533_v43  ;;  %7249 = vmatprep.mubr.msk.f32.mxu1 %vm168_vm1, %v8287_v53 }
0x1ec2   :  { %7538 = vmatprep.subr.bf16.mxu1 %v7537_v51 }
0x1ec5   :  { %v7240_v55 = vpop.f32.mrb[60].mxu0  ;;  %7540 = vmatpush3.bf16.msra.mxu1 %v7537_v51 }
0x1ec6   :  { %v5211_v56 = vpop.f32.mrb[61].mxu0  ;;  %7263 = vmatprep.subr.mxu1 %v7699_v29  ;;  %v5217_v3 = vadd.f32 %v7240_v55, %v6454_v63 }
0x1ec7   :  { %v5212_v1 = vadd.f32 %v6454_v63, %v5211_v56  ;;  %v6490_v56 = vld [vmem:[%s8714_s15 + $0x30] sm:$0xff]  ;;  %v6500_v63 = vld [vmem:[%s8716_s17 + $0x60] sm:$0xff] }
0x1ec8   :  { %7250 = vmatmul.mubr.msk.f32.vlgmr.msra.gmra.mrb[48].mxu1 %vm168_vm1, %v8289_v54 }
0x1ec9   :  { %7265 = vmatprep.mubr.msk.f32.mxu1 %vm7700_vm2, %v7699_v29 }
0x1ecd   :  { %v7262_v48 = vpop.f32.mrb[62].mxu0 }
0x1ece   :  { %v5393_v58 = vadd.f32 %v7262_v48, %v6470_v57  ;;  %v5387_v50 = vpop.f32.mrb[63].mxu0 }
0x1ecf   :  { %v5388_v59 = vadd.f32 %v6470_v57, %v5387_v50  ;;  %v6491_v57 = vld [vmem:[%s8714_s15 + $0x38] sm:$0xff]  ;;  %v6497_v50 = vld [vmem:[%s8716_s17 + $0x48] sm:$0xff] }
0x1ed0   :  { %v7553_v48 = vpack.c.bf16 %v6491_v57, %v6490_v56 }
0x1ed1   :  { %7274 = vmatpush3.msra.mxu0 %v5388_v59  ;;  %v6498_v59 = vld [vmem:[%s8716_s17 + $0x50] sm:$0xff] }
0x1f9b   :  { %v7251_v61 = vpop.f32.mrb[48].mxu1 }
0x1f9c   :  { %v5299_v62 = vpop.f32.mrb[49].mxu1  ;;  %v5305_v2 = vadd.f32 %v7251_v61, %v6462_v60  ;;  %v6499_v61 = vld [vmem:[%s8716_s17 + $0x58] sm:$0xff] }
0x1f9d   :  { %v5300_v0 = vadd.f32 %v6462_v60, %v5299_v62  ;;  %v7561_v62 = vpack.c.bf16 %v6499_v61, %v6498_v59  ;;  %v6510_v61 = vld [vmem:[%s8712_s13 + $0x1] ss:$0 sm:$0xff] }
0x1f9f   :  { %7264 = vmatpush3.xpose.msk.msra.mxu1 %vm422_vm3, %v5300_v0  ;;  %v6501_v0 = vld [vmem:[%s8716_s17 + $0x68] sm:$0xff] }
0x1fa0   :  { %7268 = vmatprep.subr.mxu1 %v7699_v29 }
0x1fa2   :  { %7266 = vmatmul.mubr.msk.f32.vlgmr.msra.gmra.mrb[50].mxu1 %vm422_vm3, %v5212_v1  ;;  %v7565_v1 = vpack.c.bf16 %v6501_v0, %v6500_v63  ;;  %v6511_v0 = vld [vmem:[%s8713_s14 + $0x1] ss:$0 sm:$0xff] }
0x1fa3   :  { %7269 = vmatpush3.xpose.msk.msra.mxu1 %vm422_vm3, %v5305_v2  ;;  %7270 = vmatprep.mubr.msk.f32.mxu1 %vm7700_vm2, %v7699_v29 }
0x1fa4   :  { %7278 = vmatprep.subr.mxu1 %v7699_v29 }
0x1fa6   :  { %7271 = vmatmul.mubr.msk.f32.vlgmr.msra.gmra.mrb[52].mxu1 %vm422_vm3, %v5217_v3 }
0x1fa7   :  { %7279 = vmatpush3.msra.mxu1 %v5393_v58  ;;  %7280 = vmatprep.mubr.msk.f32.mxu1 %vm7700_vm2, %v7699_v29  ;;  %v6496_v58 = vld [vmem:[%s8716_s17 + $0x40] sm:$0xff] }
0x1fa8   :  { %7283 = vmatprep.subr.mxu1 %v6479_v28  ;;  %v7557_v60 = vpack.c.bf16 %v6497_v50, %v6496_v58 }
0x2075   :  { %v5468_v4 = vpop.f32.mrb[50].mxu1 }
0x2076   :  { %v7267_v5 = vpop.f32.mrb[51].mxu1  ;;  %v5548_v6 = vsel %vm422_vm3, %v5468_v4, -inf }
0x2077   :  { %5549 = vmax.xlane.f32.xlu0 %v5548_v6 }
0x2079   :  { %v5544_v7 = vpop.f32.mrb[52].mxu1 }
0x207a   :  { %v7272_v8 = vpop.f32.mrb[53].mxu1  ;;  %v5551_v9 = vsel %vm422_vm3, %v5544_v7, -inf }
0x207b   :  { %5552 = vmax.xlane.f32.xlu1 %v5551_v9  ;;  %v6486_v9 = vld [vmem:[%s8710_s11 + $0x1] ss:$0 sm:$0xff] }
0x2104   :  { %v5550_v10 = vpop.xlane.xlu0 %5549 }
0x2105   :  { %v5554_v11 = vsub.f32 %v5468_v4, %v5550_v10 }
0x2107   :  { %v5556_v12 = vmul.f32 1.442695, %v5554_v11 }
0x2108   :  { %v5553_v13 = vpop.xlane.xlu1 %5552 }
0x2109   :  { %7659 = vpow2.f32 %v5556_v12  ;;  %v5555_v14 = vsub.f32 %v5544_v7, %v5553_v13  ;;  %v6487_v13 = vld [vmem:[%s8711_s12 + $0x1] ss:$0 sm:$0xff] }
0x210b   :  { %v5558_v15 = vmul.f32 1.442695, %v5555_v14 }
0x210d   :  { %7661 = vpow2.f32 %v5558_v15 }
0x2113   :  { %v7660_v16 = vpop.eup %7659 }
0x2114   :  { %v5560_v17 = vsel %vm422_vm3, %v7660_v16, 0.0 }
0x2115   :  { %5561 = vadd.xlane.f32.xlu0 %v5560_v17 }
0x2117   :  { %v7662_v18 = vpop.eup %7661 }
0x2118   :  { %v5563_v19 = vsel %vm422_vm3, %v7662_v18, 0.0 }
0x2119   :  { %5564 = vadd.xlane.f32.xlu1 %v5563_v19  ;;  %v6503_v19 = vld [vmem:[%s8716_s17 + $0x78] sm:$0xff] }
0x21a2   :  { %v5562_v20 = vpop.xlane.xlu0 %5561 }
0x21a3   :  { %7663 = vrcp.f32 %v5562_v20 }
0x21a6   :  { %v5565_v22 = vpop.xlane.xlu1 %5564 }
0x21a7   :  { %7665 = vrcp.f32 %v5565_v22  ;;  %v6493_v22 = vld [vmem:[%s8715_s16 + $0x1] ss:$0 sm:$0xff] }
0x21ad   :  { %v7664_v24 = vpop.eup %7663 }
0x21ae   :  { %v5568_v27 = vmul.f32 %v7664_v24, %v7660_v16 }
0x21b0   :  { %7276 = vmatmul.mubr.msk.f32.vlgmr.msra.gmra.mrb[64].mxu0 %vm422_vm3, %v5568_v27 }
0x21b1   :  { %v7666_v26 = vpop.eup %7665 }
0x21b2   :  { %v5569_v25 = vmul.f32 %v7666_v26, %v7662_v18  ;;  %v6502_v18 = vld [vmem:[%s8716_s17 + $0x70] sm:$0xff] }
0x21b3   :  { %v7569_v20 = vpack.c.bf16 %v6503_v19, %v6502_v18 }
0x21b4   :  { %7281 = vmatmul.mubr.msk.f32.vlgmr.msra.gmra.mrb[54].mxu1 %vm422_vm3, %v5569_v25 }
0x21b5   :  { %7284 = vmatpush3.msra.mxu1 %v6479_v28 }
0x21b6   :  { %7558 = vmatprep.subr.bf16.mxu1 %v7557_v60 }
0x2283   :  { %v5639_v30 = vpop.f32.mrb[64].mxu0 }
0x2284   :  { %v7277_v31 = vpop.f32.mrb[65].mxu0  ;;  %7285 = vmatprep.mubr.msk.f32.mxu1 %vm422_vm3, %v5639_v30  ;;  %v6505_v30 = vld [vmem:[%s8717_s18 + $0x1] ss:$0 sm:$0xff] }
0x2287   :  { %v5712_v23 = vpop.f32.mrb[54].mxu1 }
0x2288   :  { %v7282_v32 = vpop.f32.mrb[55].mxu1  ;;  %7286 = vmatmul.mubr.msk.f32.vlgmr.msra.gmra.mrb[40].mxu1 %vm422_vm3, %v5712_v23 }
0x2289   :  { %7560 = vmatpush3.bf16.msra.mxu1 %v7557_v60 }
0x228a   :  { %7562 = vmatprep.subr.bf16.mxu1 %v7561_v62 }
0x228d   :  { %7564 = vmatpush3.bf16.msra.mxu1 %v7561_v62 }
0x228e   :  { %7566 = vmatprep.subr.bf16.mxu1 %v7565_v1 }
0x2291   :  { %7568 = vmatpush3.bf16.msra.mxu1 %v7565_v1 }
0x2292   :  { %7570 = vmatprep.subr.bf16.mxu1 %v7569_v20 }
0x2295   :  { %7572 = vmatpush3.bf16.msra.mxu1 %v7569_v20 }
0x235b   :  { %v7287_v33 = vpop.f32.mrb[40].mxu1 }
0x235c   :  { %v5810_v34 = vadd.f32 %v7287_v33, %v6483_v21  ;;  %v5790_v35 = vpop.f32.mrb[41].mxu1 }
0x235d   :  { %v5809_v36 = vadd.f32 %v6483_v21, %v5790_v35 }
0x235e   :  { %v5812_v37 = vadd.f32 %v5810_v34, %v8289_v54 }
0x235f   :  { %v5811_v38 = vadd.f32 %v5809_v36, %v8287_v53  ;;  %v6488_v53 = vld [vmem:[%s8714_s15 + $0x20] sm:$0xff] }
0x2360   :  { %v5820_v39 = vsel %vm168_vm1, %v5812_v37, 0.0  ;;  %v7549_v55 = vpack.c.bf16 %v6489_v52, %v6488_v53  ;;  %v6121_v52 = vld [vmem:[%s8718_s19 + $0x18] sm:$0xff] }
0x2361   :  { %5821 = vadd.xlane.f32.xlu1 %v5820_v39  ;;  %v5817_v40 = vsel %vm168_vm1, %v5811_v38, 0.0 }
0x2362   :  { %5818 = vadd.xlane.f32.xlu0 %v5817_v40  ;;  %7550 = vmatprep.subr.bf16.mxu0 %v7549_v55 }
0x2363   :  { %7552 = vmatpush3.bf16.msra.mxu0 %v7549_v55 }
0x2364   :  { %7554 = vmatprep.subr.bf16.mxu0 %v7553_v48 }
0x2367   :  { %7556 = vmatpush3.bf16.msra.mxu0 %v7553_v48 }
0x23ee   :  { %v5822_v41 = vpop.xlane.xlu1 %5821 }
0x23ef   :  { %v5824_v42 = vmul.f32 0.03125, %v5822_v41  ;;  %v5819_v43 = vpop.xlane.xlu0 %5818 }
0x23f0   :  { %v5823_v44 = vmul.f32 0.03125, %v5819_v43 }
0x23f1   :  { %v5826_v45 = vsub.f32 %v5812_v37, %v5824_v42 }
0x23f2   :  { %v5825_v46 = vsub.f32 %v5811_v38, %v5823_v44 }
0x23f3   :  { %v5828_v47 = vmul.f32 %v5826_v45, %v5826_v45 }
0x23f4   :  { %v5827_v49 = vmul.f32 %v5825_v46, %v5825_v46 }
0x23f5   :  { %v5832_v51 = vsel %vm168_vm1, %v5828_v47, 0.0  ;;  %v6118_v47 = vld [vmem:[%s8718_s19] sm:$0xff] }
0x23f6   :  { %5833 = vadd.xlane.f32.xlu1 %v5832_v51  ;;  %v5829_v54 = vsel %vm168_vm1, %v5827_v49, 0.0  ;;  %v6119_v49 = vld [vmem:[%s8718_s19 + $0x8] sm:$0xff]  ;;  %v6120_v51 = vld [vmem:[%s8718_s19 + $0x10] sm:$0xff] }
0x23f7   :  { %5830 = vadd.xlane.f32.xlu0 %v5829_v54  ;;  %v7701_v54 = vmov 0.0|0.0   ;;  %v7574_v53 = vpack.c.bf16 %v6119_v49, %v6118_v47  ;;  %v7577_v55 = vpack.c.bf16 %v6121_v52, %v6120_v51 }
0x23f8   :  { %7573 = vmatprep.subr.bf16.mxu0 %v7701_v54 }
0x2483   :  { %v5834_v2 = vpop.xlane.xlu1 %5833 }
0x2484   :  { %v5836_v3 = vmul.f32 0.03125, %v5834_v2  ;;  %v5831_v4 = vpop.xlane.xlu0 %5830 }
0x2485   :  { %v5835_v5 = vmul.f32 0.03125, %v5831_v4 }
0x2486   :  { %v5838_v6 = vadd.f32 1e-05, %v5836_v3 }
0x2487   :  { %v5837_v7 = vadd.f32 1e-05, %v5835_v5 }
0x2488   :  { %7667 = vrsqrt.f32 %v5838_v6 }
0x2489   :  { %7669 = vrsqrt.f32 %v5837_v7 }
0x2492   :  { %v7668_v8 = vpop.eup %7667 }
0x2493   :  { %v7670_v10 = vpop.eup %7669  ;;  %v5842_v11 = vmul.f32 %v7668_v8, %v5826_v45 }
0x2494   :  { %v5841_v12 = vmul.f32 %v7670_v10, %v5825_v46 }
0x2495   :  { %v5850_v14 = vmul.f32 %v6486_v9, %v5842_v11 }
0x2496   :  { %v5849_v15 = vmul.f32 %v6486_v9, %v5841_v12 }
0x2497   :  { %v5858_v17 = vadd.f32 %v6487_v13, %v5850_v14 }
0x2498   :  { %v5857_v16 = vadd.f32 %v6487_v13, %v5849_v15 }
0x249a   :  { %7296 = vmatprep.mubr.msk.f32.mxu0 %vm168_vm1, %v5857_v16 }
0x249b   :  { %7297 = vmatmul.mubr.msk.f32.vlgmr.msra.gmra.mrb[66].mxu0 %vm168_vm1, %v5858_v17 }
0x249c   :  { %7326 = vmatprep.mubr.msk.f32.mxu0 %vm7700_vm2, %v7699_v29  ;;  %7575 = vmatpush3.bf16.msra.mxu0 %v7574_v53 }
0x249d   :  { %7576 = vmatprep.subr.bf16.mxu0 %v7701_v54 }
0x24a0   :  { %7578 = vmatpush3.bf16.msra.mxu0 %v7577_v55 }
0x256e   :  { %v7298_v24 = vpop.f32.mrb[66].mxu0 }
0x256f   :  { %v5950_v27 = vadd.f32 %v7298_v24, %v6493_v22  ;;  %v5944_v26 = vpop.f32.mrb[67].mxu0 }
0x2570   :  { %v5945_v25 = vadd.f32 %v6493_v22, %v5944_v26 }
0x2571   :  { %v5954_v28 = vmax.f32 %v5950_v27, 0.0  ;;  %v6512_v27 = vld [vmem:[%s8719_s20] ss:$0 sm:$0xff] }
0x2572   :  { %v5953_v29 = vmax.f32 %v5945_v25, 0.0 }
0x2574   :  { %7315 = vmatprep.mubr.msk.f32.mxu1 %vm2995_vm4, %v5953_v29 }
0x2575   :  { %7316 = vmatmul.mubr.msk.f32.vlgmr.msra.gmra.mrb[56].mxu1 %vm2995_vm4, %v5954_v28 }
0x2648   :  { %v7317_v31 = vpop.f32.mrb[56].mxu1 }
0x2649   :  { %v6050_v23 = vadd.f32 %v7317_v31, %v6505_v30  ;;  %v6044_v32 = vpop.f32.mrb[57].mxu1 }
0x264a   :  { %v6045_v21 = vadd.f32 %v6505_v30, %v6044_v32 }
0x264b   :  { %v6054_v33 = vadd.f32 %v6050_v23, %v5858_v17 }
0x264c   :  { %v6053_v34 = vadd.f32 %v6045_v21, %v5857_v16 }
0x264d   :  { %v6062_v35 = vsel %vm168_vm1, %v6054_v33, 0.0 }
0x264e   :  { %6063 = vadd.xlane.f32.xlu1 %v6062_v35  ;;  %v6059_v36 = vsel %vm168_vm1, %v6053_v34, 0.0 }
0x264f   :  { %6060 = vadd.xlane.f32.xlu0 %v6059_v36 }
0x26db   :  { %v6064_v37 = vpop.xlane.xlu1 %6063 }
0x26dc   :  { %v6066_v38 = vmul.f32 0.03125, %v6064_v37  ;;  %v6061_v39 = vpop.xlane.xlu0 %6060 }
0x26dd   :  { %v6065_v40 = vmul.f32 0.03125, %v6061_v39 }
0x26de   :  { %v6068_v41 = vsub.f32 %v6054_v33, %v6066_v38 }
0x26df   :  { %v6067_v42 = vsub.f32 %v6053_v34, %v6065_v40 }
0x26e0   :  { %v6070_v43 = vmul.f32 %v6068_v41, %v6068_v41 }
0x26e1   :  { %v6069_v44 = vmul.f32 %v6067_v42, %v6067_v42 }
0x26e2   :  { %v6074_v45 = vsel %vm168_vm1, %v6070_v43, 0.0 }
0x26e3   :  { %6075 = vadd.xlane.f32.xlu1 %v6074_v45  ;;  %v6071_v46 = vsel %vm168_vm1, %v6069_v44, 0.0 }
0x26e4   :  { %6072 = vadd.xlane.f32.xlu0 %v6071_v46 }
0x2770   :  { %v6076_v56 = vpop.xlane.xlu1 %6075 }
0x2771   :  { %v6078_v57 = vmul.f32 0.03125, %v6076_v56  ;;  %v6073_v48 = vpop.xlane.xlu0 %6072 }
0x2772   :  { %v6077_v58 = vmul.f32 0.03125, %v6073_v48 }
0x2773   :  { %v6080_v50 = vadd.f32 1e-05, %v6078_v57 }
0x2774   :  { %v6079_v59 = vadd.f32 1e-05, %v6077_v58 }
0x2775   :  { %7671 = vrsqrt.f32 %v6080_v50 }
0x2776   :  { %7673 = vrsqrt.f32 %v6079_v59 }
0x277f   :  { %v7672_v60 = vpop.eup %7671 }
0x2780   :  { %v7674_v62 = vpop.eup %7673  ;;  %v6084_v63 = vmul.f32 %v7672_v60, %v6068_v41 }
0x2781   :  { %v6083_v1 = vmul.f32 %v7674_v62, %v6067_v42 }
0x2782   :  { %v6092_v2 = vmul.f32 %v6510_v61, %v6084_v63 }
0x2783   :  { %v6091_v3 = vmul.f32 %v6510_v61, %v6083_v1 }
0x2784   :  { %v6100_v4 = vadd.f32 %v6511_v0, %v6092_v2 }
0x2785   :  { %v6099_v5 = vadd.f32 %v6511_v0, %v6091_v3 }
0x2786   :  { %v6108_v6 = vsel %vm168_vm1, %v6100_v4, 0.0 }
0x2787   :  { %v6101_v7 = vsel %vm168_vm1, %v6099_v5, 0.0  ;;  %v6109_v8 = vrot.slane %v6108_v6, 4 }
0x2788   :  { %v6102_v9 = vrot.slane %v6101_v7, 4 }
0x2789   :  { %v6110_v10 = vadd.f32 %v6109_v8, %v6108_v6 }
0x278a   :  { %v6103_v11 = vadd.f32 %v6102_v9, %v6101_v7 }
0x278b   :  { %v6111_v12 = vrot.slane %v6110_v10, 2 }
0x278c   :  { %v6104_v13 = vrot.slane %v6103_v11, 2 }
0x278d   :  { %v6112_v14 = vadd.f32 %v6111_v12, %v6110_v10 }
0x278e   :  { %v6105_v15 = vadd.f32 %v6104_v13, %v6103_v11 }
0x278f   :  { %v6113_v16 = vrot.slane %v6112_v14, 1 }
0x2790   :  { %v6106_v17 = vrot.slane %v6105_v15, 1 }
0x2791   :  { %v6114_v18 = vadd.f32 %v6113_v16, %v6112_v14 }
0x2792   :  { %v6107_v19 = vadd.f32 %v6106_v17, %v6105_v15 }
0x2793   :  { %v6117_v20 = vmul.f32 0.125, %v6114_v18 }
0x2794   :  { %v6116_v22 = vmul.f32 0.125, %v6107_v19 }
0x2796   :  { %v6132_v24 = vsel %vm6131_vm5, %v6117_v20, %v6116_v22 }
0x2797   :  { %7327 = vmatmul.mubr.msk.f32.vlgmr.msra.gmra.mrb[68].mxu0 %vm168_vm1, %v6132_v24 }
0x286a   :  { %v6201_v26 = vpop.f32.mrb[68].mxu0 }
0x286b   :  { %v6202_v25 = vadd.f32 %v6512_v27, %v6201_v26  ;;  %v7328_v29 = vpop.f32.mrb[69].mxu0 }
0x286d   :  { %6206 = vst.msk [vmem:[#allocation2] sm:$0x3] %vm6205_vm6, %v6202_v25 }
0x286e   :  { %7686 = shalt.err (!%p7683_p4)
}
0x286f   :  { %s7687_s10 = scalar_lea.hbm %s8720_s21, 32 }
0x2870   :  { %p7688_p5 = scmp.ne.s32.totalorder %s8720_s21, %s7687_s10  ;;  %p7691_p6 = scmp.lt.u32.totalorder %s7687_s10, %s8720_s21 }
0x2872   :  { %p7693_p7 = pnand %p7691_p6, %p7688_p5 }
0x2874   :  { %7696 = shalt.err (!%p7693_p7)
}
0x2875   :  { %6216 = dma.vmem_to_hbm [thread:$0]  %s6214_s7, 32, %s8720_s21, [#allocation3]  }
0x2876   :  { %7697 = dma.done.wait [#allocation3], 32  }
0x2877   :  { %7698 = vsyncadd [#allocation3], 4294967264 }
0x2878   :  { %6220 = vsyncpa [#allocation3], 1 }

</bundles_post_ra>
